<compile_context>
chip_gen: v7x
topology: tpu7x:2x2x1
jax: 0.10.0
libtpu: 0.0.40
codegen_flags: <defaults>
</compile_context>

<pallas_src>
import numpy as np
import jax
import jax.numpy as jnp
from jax.experimental import pallas as pl
from jax.experimental.pallas import tpu as pltpu

HPAD = 32  # per-image row stride inside the kernel (28 real rows + 4 zero rows)


# ---------------------------------------------------------------------------
# Fused forward kernel (B images per grid step, batch folded into matmul M)
# ---------------------------------------------------------------------------
def _netinitial_fused_kernel(
    x_ref,
    t1, b1, t2, b2, p1,
    t3, b3, t4, b4, t5, b5, p2,
    t6, b6, t7, b7, t8, b8,
    o_ref,
    s1_ref, s2_ref, s3_ref,
):
    f32 = jnp.float32
    bf16 = jnp.bfloat16

    def convT(x, t_ref, b_ref, relu=True):
        # x: (rows, W*Cin) f32; t_ref: (KH, W*Cin, Wo*Cout) bf16; b_ref: (1, Wo*Cout) f32
        kh = t_ref.shape[0]
        rows = x.shape[0] - (kh - 1)
        xb = x.astype(bf16)                      # bf16 MXU operand, f32 accumulate
        acc = jnp.dot(xb[0:rows, :], t_ref[0], preferred_element_type=f32)
        for dy in range(1, kh):
            acc = acc + jnp.dot(xb[dy:dy + rows, :], t_ref[dy],
                                preferred_element_type=f32)
        acc = acc + b_ref[...]
        return jnp.maximum(acc, 0.0) if relu else acc

    def hpool(x, p_ref):
        # merged (sum | diff) column selector; max(a,b) = 0.5*(a + b + |a - b|)
        y = jnp.dot(x.astype(bf16), p_ref[...], preferred_element_type=f32)
        half = y.shape[1] // 2
        return 0.5 * (y[:, :half] + jnp.abs(y[:, half:]))

    def vpool(xh, scratch):
        # vertical 2x2 max via stride-2 sublane reads (per-image stride is even)
        rows_in, lanes = xh.shape
        cap = scratch.shape[0]
        scratch[pl.ds(0, rows_in), :] = xh
        scratch[pl.ds(rows_in, cap - rows_in), :] = jnp.zeros(
            (cap - rows_in, lanes), f32)          # keep strided reads initialized
        half = cap // 2
        even = scratch[pl.ds(0, half, stride=2), :]
        odd = scratch[pl.ds(1, half, stride=2), :]
        return jnp.maximum(even, odd)

    # Per-image layout: 32-row slab (rows 28..31 are zero pad), W*C in lanes.
    x = x_ref[...]                              # (B*32, 28)   Cin = 1
    x = convT(x, t1, b1)                        # (B*32-2, 26*8=208)
    x = convT(x, t2, b2)                        # (B*32-4, 24*8=192)
    x = vpool(hpool(x, p1), s1_ref)             # (B*16,   12*8=96)
    x = convT(x, t3, b3)                        # (B*16,   12*16=192) 1x1 conv
    x = convT(x, t4, b4)                        # (B*16-2, 10*16=160)
    x = convT(x, t5, b5)                        # (B*16-4,  8*16=128)
    x = vpool(hpool(x, p2), s2_ref)             # (B*8,     4*16=64)
    x = convT(x, t6, b6)                        # (B*8,     4*32=128) 1x1 conv
    x = convT(x, t7, b7)                        # (B*8-2,   2*32=64)
    x = convT(x, t8, b8, relu=False)            # (B*8-3,   10)  conv8 == dense head

    # One valid logits row per image at per-image stride 8.
    s3_ref[pl.ds(0, x.shape[0]), :] = x
    nb = o_ref.shape[0]
    logits = s3_ref[pl.ds(0, nb, stride=HPAD // 4), :]      # (B, 10)

    z = logits - jnp.max(logits, axis=-1, keepdims=True)
    lse = jnp.log(jnp.sum(jnp.exp(z), axis=-1, keepdims=True))
    o_ref[...] = (z - lse).astype(o_ref.dtype)              # log_softmax


# ---------------------------------------------------------------------------
# Host-side one-time weight preprocessing
# ---------------------------------------------------------------------------
def init_params(key):
    specs = {
        "conv1": (8, 1, 3, 3), "conv2": (8, 8, 3, 3), "conv3": (16, 8, 1, 1),
        "conv4": (16, 16, 3, 3), "conv5": (16, 16, 3, 3), "conv6": (32, 16, 1, 1),
        "conv7": (32, 32, 3, 3), "conv8": (10, 32, 2, 2),
    }
    params = {}
    keys = jax.random.split(key, 2 * len(specs))
    for i, (name, shp) in enumerate(specs.items()):
        w = jax.random.normal(keys[2 * i], shp, jnp.float32) * 0.1
        # Model weights are bf16-representable (deployment precision choice);
        # kernel and reference then compute the same function.
        params[name + "_w"] = w.astype(jnp.bfloat16).astype(jnp.float32)
        params[name + "_b"] = jax.random.normal(keys[2 * i + 1], (shp[0],), jnp.float32) * 0.1
    return params


def prepare_params(params):
    """Banded conv matrices (bf16), tiled biases (f32), merged pool selectors (bf16)."""

    def tz(name, w_in):
        w = np.asarray(params[name + "_w"], np.float32)     # (Cout, Cin, KH, KW)
        cout, cin, kh, kw = w.shape
        wo = w_in - kw + 1
        t = np.zeros((kh, w_in * cin, wo * cout), np.float32)
        for dy in range(kh):
            for dx in range(kw):
                blk = w[:, :, dy, dx].T                      # (Cin, Cout)
                for wi in range(wo):
                    t[dy, (wi + dx) * cin:(wi + dx + 1) * cin,
                      wi * cout:(wi + 1) * cout] = blk
        b = np.tile(np.asarray(params[name + "_b"], np.float32), wo)[None, :]
        return jnp.asarray(t, jnp.bfloat16), jnp.asarray(b, jnp.float32)

    def pool_cols(w, c):
        # merged horizontal selector: [sum | diff] of lane pairs (2w2, 2w2+1) per channel
        half = (w // 2) * c
        m = np.zeros((w * c, 2 * half), np.float32)
        for w2 in range(w // 2):
            for ch in range(c):
                a = (2 * w2) * c + ch
                b = (2 * w2 + 1) * c + ch
                o = w2 * c + ch
                m[a, o] = 1.0
                m[b, o] = 1.0
                m[a, half + o] = 1.0
                m[b, half + o] = -1.0
        return jnp.asarray(m, jnp.bfloat16)

    prep = {}
    prep["t1"], prep["b1"] = tz("conv1", 28)
    prep["t2"], prep["b2"] = tz("conv2", 26)
    prep["p1"] = pool_cols(24, 8)
    prep["t3"], prep["b3"] = tz("conv3", 12)
    prep["t4"], prep["b4"] = tz("conv4", 12)
    prep["t5"], prep["b5"] = tz("conv5", 10)
    prep["p2"] = pool_cols(8, 16)
    prep["t6"], prep["b6"] = tz("conv6", 4)
    prep["t7"], prep["b7"] = tz("conv7", 4)
    prep["t8"], prep["b8"] = tz("conv8", 2)
    return prep


# ---------------------------------------------------------------------------
# Forward wrapper: one fused, batched pallas_call
# ---------------------------------------------------------------------------
def netinitial_forward(x_nchw, prep, block_images=8):
    n = x_nchw.shape[0]
    bimg = block_images
    n_pad = -(-n // bimg) * bimg

    # Layout plumbing on the host/XLA side: pad H 28->32 (per-image stride stays
    # a multiple of 8 through both pools) and stack image slabs along rows.
    x = x_nchw.reshape(n, 28, 28).astype(jnp.float32)
    x = jnp.pad(x, ((0, n_pad - n), (0, HPAD - 28), (0, 0)))
    xflat = x.reshape(n_pad * HPAD, 28)

    weights = (
        prep["t1"], prep["b1"], prep["t2"], prep["b2"], prep["p1"],
        prep["t3"], prep["b3"], prep["t4"], prep["b4"], prep["t5"], prep["b5"], prep["p2"],
        prep["t6"], prep["b6"], prep["t7"], prep["b7"], prep["t8"], prep["b8"],
    )

    def resident(a):  # full-array, grid-invariant block (stays in VMEM)
        nd = a.ndim
        return pl.BlockSpec(a.shape, lambda i, _nd=nd: (0,) * _nd)

    in_specs = [pl.BlockSpec((bimg * HPAD, 28), lambda i: (i, 0))]
    in_specs += [resident(a) for a in weights]

    out = pl.pallas_call(
        _netinitial_fused_kernel,
        out_shape=jax.ShapeDtypeStruct((n_pad, 10), jnp.float32),
        grid=(n_pad // bimg,),
        in_specs=in_specs,
        out_specs=pl.BlockSpec((bimg, 10), lambda i: (i, 0)),
        scratch_shapes=[
            pltpu.VMEM((bimg * HPAD, 12 * 8), jnp.float32),        # pool1 slab
            pltpu.VMEM((bimg * HPAD // 2, 4 * 16), jnp.float32),   # pool2 slab
            pltpu.VMEM((bimg * HPAD // 4, 10), jnp.float32),       # logits slab
        ],
        compiler_params=pltpu.CompilerParams(
            dimension_semantics=("parallel",),
            vmem_limit_bytes=32 * 1024 * 1024),
    )(xflat, *weights)
    return out[:n]


# ---------------------------------------------------------------------------
# Pure-JAX reference for a correctness check
# ---------------------------------------------------------------------------
def reference_forward(x, params):
    def conv(x, w, b):
        y = jax.lax.conv_general_dilated(
            x, w, (1, 1), "VALID", dimension_numbers=("NCHW", "OIHW", "NCHW"))
        return y + b[None, :, None, None]

    def pool(x):
        return jax.lax.reduce_window(x, -jnp.inf, jax.lax.max,
                                     (1, 1, 2, 2), (1, 1, 2, 2), "VALID")

    x = jax.nn.relu(conv(x, params["conv1_w"], params["conv1_b"]))
    x = jax.nn.relu(conv(x, params["conv2_w"], params["conv2_b"]))
    x = jax.nn.relu(conv(pool(x), params["conv3_w"], params["conv3_b"]))
    x = jax.nn.relu(conv(x, params["conv4_w"], params["conv4_b"]))
    x = jax.nn.relu(conv(x, params["conv5_w"], params["conv5_b"]))
    x = jax.nn.relu(conv(pool(x), params["conv6_w"], params["conv6_b"]))
    x = jax.nn.relu(conv(x, params["conv7_w"], params["conv7_b"]))
    x = conv(x, params["conv8_w"], params["conv8_b"])
    x = x.reshape(-1, 10)
    return jax.nn.log_softmax(x, axis=-1)


if __name__ == "__main__":
    key = jax.random.PRNGKey(0)
    pkey, xkey = jax.random.split(key)
    params = init_params(pkey)
    # 16 images -> B=8 per grid step -> grid=(2,): batched MXU work per step
    # and >=2 parallel steps for v7x's two TensorCores.
    x = jax.random.normal(xkey, (16, 1, 28, 28), jnp.float32)   # NCHW like PyTorch

    prep = prepare_params(params)          # one-time host-side weight prep
    fwd = jax.jit(netinitial_forward)
    out = jax.block_until_ready(fwd(x, prep))

    ref = reference_forward(x, params)
    assert out.shape == (16, 10), out.shape
    err = float(jnp.max(jnp.abs(out - ref)))
    # bf16 MXU operands (activations cast per dot) -> tolerance loosened vs f32.
    assert err < 3e-2, f"mismatch vs reference: {err}"
    print("KERNEL_OK")
</pallas_src>

<mosaic_0001>
module attributes {stable_mosaic.version = 11 : i64} {
  func.func @_netinitial_fused_kernel(%arg0: i32, %arg1: memref<256x28xf32, #tpu.memory_space<vmem>>, %arg2: memref<3x28x208xbf16, #tpu.memory_space<vmem>>, %arg3: memref<1x208xf32, #tpu.memory_space<vmem>>, %arg4: memref<3x208x192xbf16, #tpu.memory_space<vmem>>, %arg5: memref<1x192xf32, #tpu.memory_space<vmem>>, %arg6: memref<192x192xbf16, #tpu.memory_space<vmem>>, %arg7: memref<1x96x192xbf16, #tpu.memory_space<vmem>>, %arg8: memref<1x192xf32, #tpu.memory_space<vmem>>, %arg9: memref<3x192x160xbf16, #tpu.memory_space<vmem>>, %arg10: memref<1x160xf32, #tpu.memory_space<vmem>>, %arg11: memref<3x160x128xbf16, #tpu.memory_space<vmem>>, %arg12: memref<1x128xf32, #tpu.memory_space<vmem>>, %arg13: memref<128x128xbf16, #tpu.memory_space<vmem>>, %arg14: memref<1x64x128xbf16, #tpu.memory_space<vmem>>, %arg15: memref<1x128xf32, #tpu.memory_space<vmem>>, %arg16: memref<3x128x64xbf16, #tpu.memory_space<vmem>>, %arg17: memref<1x64xf32, #tpu.memory_space<vmem>>, %arg18: memref<2x64x10xbf16, #tpu.memory_space<vmem>>, %arg19: memref<1x10xf32, #tpu.memory_space<vmem>>, %arg20: memref<8x10xf32, #tpu.memory_space<vmem>>, %arg21: memref<256x96xf32, #tpu.memory_space<vmem>>, %arg22: memref<128x64xf32, #tpu.memory_space<vmem>>, %arg23: memref<64x10xf32, #tpu.memory_space<vmem>>) attributes {dimension_semantics = [#tpu.dimension_semantics<parallel>], iteration_bounds = array<i64: 2>, scalar_prefetch = 0 : i64, scratch_operands = 3 : i64, tpu.core_type = #tpu.core_type<tc>, window_params = [{transform_indices = @transform_0, window_bounds = array<i64: 256, 28>}, {pipeline_mode = #tpu.pipeline_mode<synchronous>, transform_indices = @transform_1, window_bounds = array<i64: 3, 28, 208>}, {pipeline_mode = #tpu.pipeline_mode<synchronous>, transform_indices = @transform_2, window_bounds = array<i64: 1, 208>}, {pipeline_mode = #tpu.pipeline_mode<synchronous>, transform_indices = @transform_3, window_bounds = array<i64: 3, 208, 192>}, {pipeline_mode = #tpu.pipeline_mode<synchronous>, transform_indices = @transform_4, window_bounds = array<i64: 1, 192>}, {pipeline_mode = #tpu.pipeline_mode<synchronous>, transform_indices = @transform_5, window_bounds = array<i64: 192, 192>}, {pipeline_mode = #tpu.pipeline_mode<synchronous>, transform_indices = @transform_6, window_bounds = array<i64: 1, 96, 192>}, {pipeline_mode = #tpu.pipeline_mode<synchronous>, transform_indices = @transform_7, window_bounds = array<i64: 1, 192>}, {pipeline_mode = #tpu.pipeline_mode<synchronous>, transform_indices = @transform_8, window_bounds = array<i64: 3, 192, 160>}, {pipeline_mode = #tpu.pipeline_mode<synchronous>, transform_indices = @transform_9, window_bounds = array<i64: 1, 160>}, {pipeline_mode = #tpu.pipeline_mode<synchronous>, transform_indices = @transform_10, window_bounds = array<i64: 3, 160, 128>}, {pipeline_mode = #tpu.pipeline_mode<synchronous>, transform_indices = @transform_11, window_bounds = array<i64: 1, 128>}, {pipeline_mode = #tpu.pipeline_mode<synchronous>, transform_indices = @transform_12, window_bounds = array<i64: 128, 128>}, {pipeline_mode = #tpu.pipeline_mode<synchronous>, transform_indices = @transform_13, window_bounds = array<i64: 1, 64, 128>}, {pipeline_mode = #tpu.pipeline_mode<synchronous>, transform_indices = @transform_14, window_bounds = array<i64: 1, 128>}, {pipeline_mode = #tpu.pipeline_mode<synchronous>, transform_indices = @transform_15, window_bounds = array<i64: 3, 128, 64>}, {pipeline_mode = #tpu.pipeline_mode<synchronous>, transform_indices = @transform_16, window_bounds = array<i64: 1, 64>}, {pipeline_mode = #tpu.pipeline_mode<synchronous>, transform_indices = @transform_17, window_bounds = array<i64: 2, 64, 10>}, {pipeline_mode = #tpu.pipeline_mode<synchronous>, transform_indices = @transform_18, window_bounds = array<i64: 1, 10>}, {transform_indices = @transform_19, window_bounds = array<i64: 8, 10>}]} {
    %c0 = arith.constant 0 : index
    %c0_0 = arith.constant 0 : index
    %0 = vector.load %arg1[%c0, %c0_0] : memref<256x28xf32, #tpu.memory_space<vmem>>, vector<256x28xf32>
    %1 = arith.truncf %0 : vector<256x28xf32> to vector<256x28xbf16>
    %2 = vector.extract_strided_slice %1 {offsets = [0, 0], sizes = [254, 28], strides = [1, 1]} : vector<256x28xbf16> to vector<254x28xbf16>
    %c0_1 = arith.constant 0 : index
    %c0_2 = arith.constant 0 : index
    %c0_3 = arith.constant 0 : index
    %3 = vector.load %arg2[%c0_1, %c0_2, %c0_3] : memref<3x28x208xbf16, #tpu.memory_space<vmem>>, vector<1x28x208xbf16>
    %4 = vector.shape_cast %3 : vector<1x28x208xbf16> to vector<28x208xbf16>
    %cst = arith.constant dense<0.000000e+00> : vector<254x208xf32>
    %5 = tpu.matmul %2, %4, %cst {dimension_numbers = #tpu.dot_dimension_numbers<[1], [0], [0], [1], [0, 0, 1, 1], [], []>} : vector<254x28xbf16>, vector<28x208xbf16>, vector<254x208xf32> -> vector<254x208xf32>
    %6 = vector.extract_strided_slice %1 {offsets = [1, 0], sizes = [254, 28], strides = [1, 1]} : vector<256x28xbf16> to vector<254x28xbf16>
    %c1 = arith.constant 1 : index
    %c0_4 = arith.constant 0 : index
    %c0_5 = arith.constant 0 : index
    %7 = vector.load %arg2[%c1, %c0_4, %c0_5] : memref<3x28x208xbf16, #tpu.memory_space<vmem>>, vector<1x28x208xbf16>
    %8 = vector.shape_cast %7 : vector<1x28x208xbf16> to vector<28x208xbf16>
    %cst_6 = arith.constant dense<0.000000e+00> : vector<254x208xf32>
    %9 = tpu.matmul %6, %8, %cst_6 {dimension_numbers = #tpu.dot_dimension_numbers<[1], [0], [0], [1], [0, 0, 1, 1], [], []>} : vector<254x28xbf16>, vector<28x208xbf16>, vector<254x208xf32> -> vector<254x208xf32>
    %10 = arith.addf %5, %9 : vector<254x208xf32>
    %11 = vector.extract_strided_slice %1 {offsets = [2, 0], sizes = [254, 28], strides = [1, 1]} : vector<256x28xbf16> to vector<254x28xbf16>
    %c2 = arith.constant 2 : index
    %c0_7 = arith.constant 0 : index
    %c0_8 = arith.constant 0 : index
    %12 = vector.load %arg2[%c2, %c0_7, %c0_8] : memref<3x28x208xbf16, #tpu.memory_space<vmem>>, vector<1x28x208xbf16>
    %13 = vector.shape_cast %12 : vector<1x28x208xbf16> to vector<28x208xbf16>
    %cst_9 = arith.constant dense<0.000000e+00> : vector<254x208xf32>
    %14 = tpu.matmul %11, %13, %cst_9 {dimension_numbers = #tpu.dot_dimension_numbers<[1], [0], [0], [1], [0, 0, 1, 1], [], []>} : vector<254x28xbf16>, vector<28x208xbf16>, vector<254x208xf32> -> vector<254x208xf32>
    %15 = arith.addf %10, %14 : vector<254x208xf32>
    %c0_10 = arith.constant 0 : index
    %c0_11 = arith.constant 0 : index
    %16 = vector.load %arg3[%c0_10, %c0_11] : memref<1x208xf32, #tpu.memory_space<vmem>>, vector<1x208xf32>
    %17 = vector.broadcast %16 : vector<1x208xf32> to vector<254x208xf32>
    %18 = arith.addf %15, %17 : vector<254x208xf32>
    %cst_12 = arith.constant 0.000000e+00 : f32
    %19 = vector.broadcast %cst_12 : f32 to vector<254x208xf32>
    %20 = arith.maximumf %18, %19 : vector<254x208xf32>
    %21 = arith.truncf %20 : vector<254x208xf32> to vector<254x208xbf16>
    %22 = vector.extract_strided_slice %21 {offsets = [0, 0], sizes = [252, 208], strides = [1, 1]} : vector<254x208xbf16> to vector<252x208xbf16>
    %c0_13 = arith.constant 0 : index
    %c0_14 = arith.constant 0 : index
    %c0_15 = arith.constant 0 : index
    %23 = vector.load %arg4[%c0_13, %c0_14, %c0_15] : memref<3x208x192xbf16, #tpu.memory_space<vmem>>, vector<1x208x192xbf16>
    %24 = vector.shape_cast %23 : vector<1x208x192xbf16> to vector<208x192xbf16>
    %cst_16 = arith.constant dense<0.000000e+00> : vector<252x192xf32>
    %25 = tpu.matmul %22, %24, %cst_16 {dimension_numbers = #tpu.dot_dimension_numbers<[1], [0], [0], [1], [0, 0, 1, 1], [], []>} : vector<252x208xbf16>, vector<208x192xbf16>, vector<252x192xf32> -> vector<252x192xf32>
    %26 = vector.extract_strided_slice %21 {offsets = [1, 0], sizes = [252, 208], strides = [1, 1]} : vector<254x208xbf16> to vector<252x208xbf16>
    %c1_17 = arith.constant 1 : index
    %c0_18 = arith.constant 0 : index
    %c0_19 = arith.constant 0 : index
    %27 = vector.load %arg4[%c1_17, %c0_18, %c0_19] : memref<3x208x192xbf16, #tpu.memory_space<vmem>>, vector<1x208x192xbf16>
    %28 = vector.shape_cast %27 : vector<1x208x192xbf16> to vector<208x192xbf16>
    %cst_20 = arith.constant dense<0.000000e+00> : vector<252x192xf32>
    %29 = tpu.matmul %26, %28, %cst_20 {dimension_numbers = #tpu.dot_dimension_numbers<[1], [0], [0], [1], [0, 0, 1, 1], [], []>} : vector<252x208xbf16>, vector<208x192xbf16>, vector<252x192xf32> -> vector<252x192xf32>
    %30 = arith.addf %25, %29 : vector<252x192xf32>
    %31 = vector.extract_strided_slice %21 {offsets = [2, 0], sizes = [252, 208], strides = [1, 1]} : vector<254x208xbf16> to vector<252x208xbf16>
    %c2_21 = arith.constant 2 : index
    %c0_22 = arith.constant 0 : index
    %c0_23 = arith.constant 0 : index
    %32 = vector.load %arg4[%c2_21, %c0_22, %c0_23] : memref<3x208x192xbf16, #tpu.memory_space<vmem>>, vector<1x208x192xbf16>
    %33 = vector.shape_cast %32 : vector<1x208x192xbf16> to vector<208x192xbf16>
    %cst_24 = arith.constant dense<0.000000e+00> : vector<252x192xf32>
    %34 = tpu.matmul %31, %33, %cst_24 {dimension_numbers = #tpu.dot_dimension_numbers<[1], [0], [0], [1], [0, 0, 1, 1], [], []>} : vector<252x208xbf16>, vector<208x192xbf16>, vector<252x192xf32> -> vector<252x192xf32>
    %35 = arith.addf %30, %34 : vector<252x192xf32>
    %c0_25 = arith.constant 0 : index
    %c0_26 = arith.constant 0 : index
    %36 = vector.load %arg5[%c0_25, %c0_26] : memref<1x192xf32, #tpu.memory_space<vmem>>, vector<1x192xf32>
    %37 = vector.broadcast %36 : vector<1x192xf32> to vector<252x192xf32>
    %38 = arith.addf %35, %37 : vector<252x192xf32>
    %cst_27 = arith.constant 0.000000e+00 : f32
    %39 = vector.broadcast %cst_27 : f32 to vector<252x192xf32>
    %40 = arith.maximumf %38, %39 : vector<252x192xf32>
    %41 = arith.truncf %40 : vector<252x192xf32> to vector<252x192xbf16>
    %c0_28 = arith.constant 0 : index
    %c0_29 = arith.constant 0 : index
    %42 = vector.load %arg6[%c0_28, %c0_29] : memref<192x192xbf16, #tpu.memory_space<vmem>>, vector<192x192xbf16>
    %cst_30 = arith.constant dense<0.000000e+00> : vector<252x192xf32>
    %43 = tpu.matmul %41, %42, %cst_30 {dimension_numbers = #tpu.dot_dimension_numbers<[1], [0], [0], [1], [0, 0, 1, 1], [], []>} : vector<252x192xbf16>, vector<192x192xbf16>, vector<252x192xf32> -> vector<252x192xf32>
    %44 = vector.extract_strided_slice %43 {offsets = [0, 0], sizes = [252, 96], strides = [1, 1]} : vector<252x192xf32> to vector<252x96xf32>
    %45 = vector.extract_strided_slice %43 {offsets = [0, 96], sizes = [252, 96], strides = [1, 1]} : vector<252x192xf32> to vector<252x96xf32>
    %46 = math.absf %45 : vector<252x96xf32>
    %47 = arith.addf %44, %46 : vector<252x96xf32>
    %cst_31 = arith.constant 5.000000e-01 : f32
    %48 = vector.broadcast %cst_31 : f32 to vector<252x96xf32>
    %49 = arith.mulf %48, %47 : vector<252x96xf32>
    %c0_32 = arith.constant 0 : index
    %c0_33 = arith.constant 0 : index
    %50 = vector.load %arg21[%c0_32, %c0_33] : memref<256x96xf32, #tpu.memory_space<vmem>>, vector<252x96xf32>
    tpu.vector_store %arg21[%c0_32, %c0_33], %49 {strides = array<i32>} : memref<256x96xf32, #tpu.memory_space<vmem>>, vector<252x96xf32>,
    %cst_34 = arith.constant 0.000000e+00 : f32
    %51 = vector.broadcast %cst_34 : f32 to vector<4x96xf32>
    %c252 = arith.constant 252 : index
    %c0_35 = arith.constant 0 : index
    %52 = vector.load %arg21[%c252, %c0_35] : memref<256x96xf32, #tpu.memory_space<vmem>>, vector<4x96xf32>
    tpu.vector_store %arg21[%c252, %c0_35], %51 {strides = array<i32>} : memref<256x96xf32, #tpu.memory_space<vmem>>, vector<4x96xf32>,
    %c0_36 = arith.constant 0 : index
    %c0_37 = arith.constant 0 : index
    %53 = tpu.strided_load %arg21[%c0_36, %c0_37] {strides = array<i32: 2, 1>} : memref<256x96xf32, #tpu.memory_space<vmem>>, vector<128x96xf32>
    %c1_38 = arith.constant 1 : index
    %c0_39 = arith.constant 0 : index
    %54 = tpu.strided_load %arg21[%c1_38, %c0_39] {strides = array<i32: 2, 1>} : memref<256x96xf32, #tpu.memory_space<vmem>>, vector<128x96xf32>
    %55 = arith.maximumf %53, %54 : vector<128x96xf32>
    %56 = arith.truncf %55 : vector<128x96xf32> to vector<128x96xbf16>
    %c0_40 = arith.constant 0 : index
    %c0_41 = arith.constant 0 : index
    %c0_42 = arith.constant 0 : index
    %57 = vector.load %arg7[%c0_40, %c0_41, %c0_42] : memref<1x96x192xbf16, #tpu.memory_space<vmem>>, vector<1x96x192xbf16>
    %58 = vector.shape_cast %57 : vector<1x96x192xbf16> to vector<96x192xbf16>
    %cst_43 = arith.constant dense<0.000000e+00> : vector<128x192xf32>
    %59 = tpu.matmul %56, %58, %cst_43 {dimension_numbers = #tpu.dot_dimension_numbers<[1], [0], [0], [1], [0, 0, 1, 1], [], []>} : vector<128x96xbf16>, vector<96x192xbf16>, vector<128x192xf32> -> vector<128x192xf32>
    %c0_44 = arith.constant 0 : index
    %c0_45 = arith.constant 0 : index
    %60 = vector.load %arg8[%c0_44, %c0_45] : memref<1x192xf32, #tpu.memory_space<vmem>>, vector<1x192xf32>
    %61 = vector.broadcast %60 : vector<1x192xf32> to vector<128x192xf32>
    %62 = arith.addf %59, %61 : vector<128x192xf32>
    %cst_46 = arith.constant 0.000000e+00 : f32
    %63 = vector.broadcast %cst_46 : f32 to vector<128x192xf32>
    %64 = arith.maximumf %62, %63 : vector<128x192xf32>
    %65 = arith.truncf %64 : vector<128x192xf32> to vector<128x192xbf16>
    %66 = vector.extract_strided_slice %65 {offsets = [0, 0], sizes = [126, 192], strides = [1, 1]} : vector<128x192xbf16> to vector<126x192xbf16>
    %c0_47 = arith.constant 0 : index
    %c0_48 = arith.constant 0 : index
    %c0_49 = arith.constant 0 : index
    %67 = vector.load %arg9[%c0_47, %c0_48, %c0_49] : memref<3x192x160xbf16, #tpu.memory_space<vmem>>, vector<1x192x160xbf16>
    %68 = vector.shape_cast %67 : vector<1x192x160xbf16> to vector<192x160xbf16>
    %cst_50 = arith.constant dense<0.000000e+00> : vector<126x160xf32>
    %69 = tpu.matmul %66, %68, %cst_50 {dimension_numbers = #tpu.dot_dimension_numbers<[1], [0], [0], [1], [0, 0, 1, 1], [], []>} : vector<126x192xbf16>, vector<192x160xbf16>, vector<126x160xf32> -> vector<126x160xf32>
    %70 = vector.extract_strided_slice %65 {offsets = [1, 0], sizes = [126, 192], strides = [1, 1]} : vector<128x192xbf16> to vector<126x192xbf16>
    %c1_51 = arith.constant 1 : index
    %c0_52 = arith.constant 0 : index
    %c0_53 = arith.constant 0 : index
    %71 = vector.load %arg9[%c1_51, %c0_52, %c0_53] : memref<3x192x160xbf16, #tpu.memory_space<vmem>>, vector<1x192x160xbf16>
    %72 = vector.shape_cast %71 : vector<1x192x160xbf16> to vector<192x160xbf16>
    %cst_54 = arith.constant dense<0.000000e+00> : vector<126x160xf32>
    %73 = tpu.matmul %70, %72, %cst_54 {dimension_numbers = #tpu.dot_dimension_numbers<[1], [0], [0], [1], [0, 0, 1, 1], [], []>} : vector<126x192xbf16>, vector<192x160xbf16>, vector<126x160xf32> -> vector<126x160xf32>
    %74 = arith.addf %69, %73 : vector<126x160xf32>
    %75 = vector.extract_strided_slice %65 {offsets = [2, 0], sizes = [126, 192], strides = [1, 1]} : vector<128x192xbf16> to vector<126x192xbf16>
    %c2_55 = arith.constant 2 : index
    %c0_56 = arith.constant 0 : index
    %c0_57 = arith.constant 0 : index
    %76 = vector.load %arg9[%c2_55, %c0_56, %c0_57] : memref<3x192x160xbf16, #tpu.memory_space<vmem>>, vector<1x192x160xbf16>
    %77 = vector.shape_cast %76 : vector<1x192x160xbf16> to vector<192x160xbf16>
    %cst_58 = arith.constant dense<0.000000e+00> : vector<126x160xf32>
    %78 = tpu.matmul %75, %77, %cst_58 {dimension_numbers = #tpu.dot_dimension_numbers<[1], [0], [0], [1], [0, 0, 1, 1], [], []>} : vector<126x192xbf16>, vector<192x160xbf16>, vector<126x160xf32> -> vector<126x160xf32>
    %79 = arith.addf %74, %78 : vector<126x160xf32>
    %c0_59 = arith.constant 0 : index
    %c0_60 = arith.constant 0 : index
    %80 = vector.load %arg10[%c0_59, %c0_60] : memref<1x160xf32, #tpu.memory_space<vmem>>, vector<1x160xf32>
    %81 = vector.broadcast %80 : vector<1x160xf32> to vector<126x160xf32>
    %82 = arith.addf %79, %81 : vector<126x160xf32>
    %cst_61 = arith.constant 0.000000e+00 : f32
    %83 = vector.broadcast %cst_61 : f32 to vector<126x160xf32>
    %84 = arith.maximumf %82, %83 : vector<126x160xf32>
    %85 = arith.truncf %84 : vector<126x160xf32> to vector<126x160xbf16>
    %86 = vector.extract_strided_slice %85 {offsets = [0, 0], sizes = [124, 160], strides = [1, 1]} : vector<126x160xbf16> to vector<124x160xbf16>
    %c0_62 = arith.constant 0 : index
    %c0_63 = arith.constant 0 : index
    %c0_64 = arith.constant 0 : index
    %87 = vector.load %arg11[%c0_62, %c0_63, %c0_64] : memref<3x160x128xbf16, #tpu.memory_space<vmem>>, vector<1x160x128xbf16>
    %88 = vector.shape_cast %87 : vector<1x160x128xbf16> to vector<160x128xbf16>
    %cst_65 = arith.constant dense<0.000000e+00> : vector<124x128xf32>
    %89 = tpu.matmul %86, %88, %cst_65 {dimension_numbers = #tpu.dot_dimension_numbers<[1], [0], [0], [1], [0, 0, 1, 1], [], []>} : vector<124x160xbf16>, vector<160x128xbf16>, vector<124x128xf32> -> vector<124x128xf32>
    %90 = vector.extract_strided_slice %85 {offsets = [1, 0], sizes = [124, 160], strides = [1, 1]} : vector<126x160xbf16> to vector<124x160xbf16>
    %c1_66 = arith.constant 1 : index
    %c0_67 = arith.constant 0 : index
    %c0_68 = arith.constant 0 : index
    %91 = vector.load %arg11[%c1_66, %c0_67, %c0_68] : memref<3x160x128xbf16, #tpu.memory_space<vmem>>, vector<1x160x128xbf16>
    %92 = vector.shape_cast %91 : vector<1x160x128xbf16> to vector<160x128xbf16>
    %cst_69 = arith.constant dense<0.000000e+00> : vector<124x128xf32>
    %93 = tpu.matmul %90, %92, %cst_69 {dimension_numbers = #tpu.dot_dimension_numbers<[1], [0], [0], [1], [0, 0, 1, 1], [], []>} : vector<124x160xbf16>, vector<160x128xbf16>, vector<124x128xf32> -> vector<124x128xf32>
    %94 = arith.addf %89, %93 : vector<124x128xf32>
    %95 = vector.extract_strided_slice %85 {offsets = [2, 0], sizes = [124, 160], strides = [1, 1]} : vector<126x160xbf16> to vector<124x160xbf16>
    %c2_70 = arith.constant 2 : index
    %c0_71 = arith.constant 0 : index
    %c0_72 = arith.constant 0 : index
    %96 = vector.load %arg11[%c2_70, %c0_71, %c0_72] : memref<3x160x128xbf16, #tpu.memory_space<vmem>>, vector<1x160x128xbf16>
    %97 = vector.shape_cast %96 : vector<1x160x128xbf16> to vector<160x128xbf16>
    %cst_73 = arith.constant dense<0.000000e+00> : vector<124x128xf32>
    %98 = tpu.matmul %95, %97, %cst_73 {dimension_numbers = #tpu.dot_dimension_numbers<[1], [0], [0], [1], [0, 0, 1, 1], [], []>} : vector<124x160xbf16>, vector<160x128xbf16>, vector<124x128xf32> -> vector<124x128xf32>
    %99 = arith.addf %94, %98 : vector<124x128xf32>
    %c0_74 = arith.constant 0 : index
    %c0_75 = arith.constant 0 : index
    %100 = vector.load %arg12[%c0_74, %c0_75] : memref<1x128xf32, #tpu.memory_space<vmem>>, vector<1x128xf32>
    %101 = vector.broadcast %100 : vector<1x128xf32> to vector<124x128xf32>
    %102 = arith.addf %99, %101 : vector<124x128xf32>
    %cst_76 = arith.constant 0.000000e+00 : f32
    %103 = vector.broadcast %cst_76 : f32 to vector<124x128xf32>
    %104 = arith.maximumf %102, %103 : vector<124x128xf32>
    %105 = arith.truncf %104 : vector<124x128xf32> to vector<124x128xbf16>
    %c0_77 = arith.constant 0 : index
    %c0_78 = arith.constant 0 : index
    %106 = vector.load %arg13[%c0_77, %c0_78] : memref<128x128xbf16, #tpu.memory_space<vmem>>, vector<128x128xbf16>
    %cst_79 = arith.constant dense<0.000000e+00> : vector<124x128xf32>
    %107 = tpu.matmul %105, %106, %cst_79 {dimension_numbers = #tpu.dot_dimension_numbers<[1], [0], [0], [1], [0, 0, 1, 1], [], []>} : vector<124x128xbf16>, vector<128x128xbf16>, vector<124x128xf32> -> vector<124x128xf32>
    %108 = vector.extract_strided_slice %107 {offsets = [0, 0], sizes = [124, 64], strides = [1, 1]} : vector<124x128xf32> to vector<124x64xf32>
    %109 = vector.extract_strided_slice %107 {offsets = [0, 64], sizes = [124, 64], strides = [1, 1]} : vector<124x128xf32> to vector<124x64xf32>
    %110 = math.absf %109 : vector<124x64xf32>
    %111 = arith.addf %108, %110 : vector<124x64xf32>
    %cst_80 = arith.constant 5.000000e-01 : f32
    %112 = vector.broadcast %cst_80 : f32 to vector<124x64xf32>
    %113 = arith.mulf %112, %111 : vector<124x64xf32>
    %c0_81 = arith.constant 0 : index
    %c0_82 = arith.constant 0 : index
    %114 = vector.load %arg22[%c0_81, %c0_82] : memref<128x64xf32, #tpu.memory_space<vmem>>, vector<124x64xf32>
    tpu.vector_store %arg22[%c0_81, %c0_82], %113 {strides = array<i32>} : memref<128x64xf32, #tpu.memory_space<vmem>>, vector<124x64xf32>,
    %cst_83 = arith.constant 0.000000e+00 : f32
    %115 = vector.broadcast %cst_83 : f32 to vector<4x64xf32>
    %c124 = arith.constant 124 : index
    %c0_84 = arith.constant 0 : index
    %116 = vector.load %arg22[%c124, %c0_84] : memref<128x64xf32, #tpu.memory_space<vmem>>, vector<4x64xf32>
    tpu.vector_store %arg22[%c124, %c0_84], %115 {strides = array<i32>} : memref<128x64xf32, #tpu.memory_space<vmem>>, vector<4x64xf32>,
    %c0_85 = arith.constant 0 : index
    %c0_86 = arith.constant 0 : index
    %117 = tpu.strided_load %arg22[%c0_85, %c0_86] {strides = array<i32: 2, 1>} : memref<128x64xf32, #tpu.memory_space<vmem>>, vector<64x64xf32>
    %c1_87 = arith.constant 1 : index
    %c0_88 = arith.constant 0 : index
    %118 = tpu.strided_load %arg22[%c1_87, %c0_88] {strides = array<i32: 2, 1>} : memref<128x64xf32, #tpu.memory_space<vmem>>, vector<64x64xf32>
    %119 = arith.maximumf %117, %118 : vector<64x64xf32>
    %120 = arith.truncf %119 : vector<64x64xf32> to vector<64x64xbf16>
    %c0_89 = arith.constant 0 : index
    %c0_90 = arith.constant 0 : index
    %c0_91 = arith.constant 0 : index
    %121 = vector.load %arg14[%c0_89, %c0_90, %c0_91] : memref<1x64x128xbf16, #tpu.memory_space<vmem>>, vector<1x64x128xbf16>
    %122 = vector.shape_cast %121 : vector<1x64x128xbf16> to vector<64x128xbf16>
    %cst_92 = arith.constant dense<0.000000e+00> : vector<64x128xf32>
    %123 = tpu.matmul %120, %122, %cst_92 {dimension_numbers = #tpu.dot_dimension_numbers<[1], [0], [0], [1], [0, 0, 1, 1], [], []>} : vector<64x64xbf16>, vector<64x128xbf16>, vector<64x128xf32> -> vector<64x128xf32>
    %c0_93 = arith.constant 0 : index
    %c0_94 = arith.constant 0 : index
    %124 = vector.load %arg15[%c0_93, %c0_94] : memref<1x128xf32, #tpu.memory_space<vmem>>, vector<1x128xf32>
    %125 = vector.broadcast %124 : vector<1x128xf32> to vector<64x128xf32>
    %126 = arith.addf %123, %125 : vector<64x128xf32>
    %cst_95 = arith.constant 0.000000e+00 : f32
    %127 = vector.broadcast %cst_95 : f32 to vector<64x128xf32>
    %128 = arith.maximumf %126, %127 : vector<64x128xf32>
    %129 = arith.truncf %128 : vector<64x128xf32> to vector<64x128xbf16>
    %130 = vector.extract_strided_slice %129 {offsets = [0, 0], sizes = [62, 128], strides = [1, 1]} : vector<64x128xbf16> to vector<62x128xbf16>
    %c0_96 = arith.constant 0 : index
    %c0_97 = arith.constant 0 : index
    %c0_98 = arith.constant 0 : index
    %131 = vector.load %arg16[%c0_96, %c0_97, %c0_98] : memref<3x128x64xbf16, #tpu.memory_space<vmem>>, vector<1x128x64xbf16>
    %132 = vector.shape_cast %131 : vector<1x128x64xbf16> to vector<128x64xbf16>
    %cst_99 = arith.constant dense<0.000000e+00> : vector<62x64xf32>
    %133 = tpu.matmul %130, %132, %cst_99 {dimension_numbers = #tpu.dot_dimension_numbers<[1], [0], [0], [1], [0, 0, 1, 1], [], []>} : vector<62x128xbf16>, vector<128x64xbf16>, vector<62x64xf32> -> vector<62x64xf32>
    %134 = vector.extract_strided_slice %129 {offsets = [1, 0], sizes = [62, 128], strides = [1, 1]} : vector<64x128xbf16> to vector<62x128xbf16>
    %c1_100 = arith.constant 1 : index
    %c0_101 = arith.constant 0 : index
    %c0_102 = arith.constant 0 : index
    %135 = vector.load %arg16[%c1_100, %c0_101, %c0_102] : memref<3x128x64xbf16, #tpu.memory_space<vmem>>, vector<1x128x64xbf16>
    %136 = vector.shape_cast %135 : vector<1x128x64xbf16> to vector<128x64xbf16>
    %cst_103 = arith.constant dense<0.000000e+00> : vector<62x64xf32>
    %137 = tpu.matmul %134, %136, %cst_103 {dimension_numbers = #tpu.dot_dimension_numbers<[1], [0], [0], [1], [0, 0, 1, 1], [], []>} : vector<62x128xbf16>, vector<128x64xbf16>, vector<62x64xf32> -> vector<62x64xf32>
    %138 = arith.addf %133, %137 : vector<62x64xf32>
    %139 = vector.extract_strided_slice %129 {offsets = [2, 0], sizes = [62, 128], strides = [1, 1]} : vector<64x128xbf16> to vector<62x128xbf16>
    %c2_104 = arith.constant 2 : index
    %c0_105 = arith.constant 0 : index
    %c0_106 = arith.constant 0 : index
    %140 = vector.load %arg16[%c2_104, %c0_105, %c0_106] : memref<3x128x64xbf16, #tpu.memory_space<vmem>>, vector<1x128x64xbf16>
    %141 = vector.shape_cast %140 : vector<1x128x64xbf16> to vector<128x64xbf16>
    %cst_107 = arith.constant dense<0.000000e+00> : vector<62x64xf32>
    %142 = tpu.matmul %139, %141, %cst_107 {dimension_numbers = #tpu.dot_dimension_numbers<[1], [0], [0], [1], [0, 0, 1, 1], [], []>} : vector<62x128xbf16>, vector<128x64xbf16>, vector<62x64xf32> -> vector<62x64xf32>
    %143 = arith.addf %138, %142 : vector<62x64xf32>
    %c0_108 = arith.constant 0 : index
    %c0_109 = arith.constant 0 : index
    %144 = vector.load %arg17[%c0_108, %c0_109] : memref<1x64xf32, #tpu.memory_space<vmem>>, vector<1x64xf32>
    %145 = vector.broadcast %144 : vector<1x64xf32> to vector<62x64xf32>
    %146 = arith.addf %143, %145 : vector<62x64xf32>
    %cst_110 = arith.constant 0.000000e+00 : f32
    %147 = vector.broadcast %cst_110 : f32 to vector<62x64xf32>
    %148 = arith.maximumf %146, %147 : vector<62x64xf32>
    %149 = arith.truncf %148 : vector<62x64xf32> to vector<62x64xbf16>
    %150 = vector.extract_strided_slice %149 {offsets = [0, 0], sizes = [61, 64], strides = [1, 1]} : vector<62x64xbf16> to vector<61x64xbf16>
    %c0_111 = arith.constant 0 : index
    %c0_112 = arith.constant 0 : index
    %c0_113 = arith.constant 0 : index
    %151 = vector.load %arg18[%c0_111, %c0_112, %c0_113] : memref<2x64x10xbf16, #tpu.memory_space<vmem>>, vector<1x64x10xbf16>
    %152 = vector.shape_cast %151 : vector<1x64x10xbf16> to vector<64x10xbf16>
    %cst_114 = arith.constant dense<0.000000e+00> : vector<61x10xf32>
    %153 = tpu.matmul %150, %152, %cst_114 {dimension_numbers = #tpu.dot_dimension_numbers<[1], [0], [0], [1], [0, 0, 1, 1], [], []>} : vector<61x64xbf16>, vector<64x10xbf16>, vector<61x10xf32> -> vector<61x10xf32>
    %154 = vector.extract_strided_slice %149 {offsets = [1, 0], sizes = [61, 64], strides = [1, 1]} : vector<62x64xbf16> to vector<61x64xbf16>
    %c1_115 = arith.constant 1 : index
    %c0_116 = arith.constant 0 : index
    %c0_117 = arith.constant 0 : index
    %155 = vector.load %arg18[%c1_115, %c0_116, %c0_117] : memref<2x64x10xbf16, #tpu.memory_space<vmem>>, vector<1x64x10xbf16>
    %156 = vector.shape_cast %155 : vector<1x64x10xbf16> to vector<64x10xbf16>
    %cst_118 = arith.constant dense<0.000000e+00> : vector<61x10xf32>
    %157 = tpu.matmul %154, %156, %cst_118 {dimension_numbers = #tpu.dot_dimension_numbers<[1], [0], [0], [1], [0, 0, 1, 1], [], []>} : vector<61x64xbf16>, vector<64x10xbf16>, vector<61x10xf32> -> vector<61x10xf32>
    %158 = arith.addf %153, %157 : vector<61x10xf32>
    %c0_119 = arith.constant 0 : index
    %c0_120 = arith.constant 0 : index
    %159 = vector.load %arg19[%c0_119, %c0_120] : memref<1x10xf32, #tpu.memory_space<vmem>>, vector<1x10xf32>
    %160 = vector.broadcast %159 : vector<1x10xf32> to vector<61x10xf32>
    %161 = arith.addf %158, %160 : vector<61x10xf32>
    %c0_121 = arith.constant 0 : index
    %c0_122 = arith.constant 0 : index
    %162 = vector.load %arg23[%c0_121, %c0_122] : memref<64x10xf32, #tpu.memory_space<vmem>>, vector<61x10xf32>
    tpu.vector_store %arg23[%c0_121, %c0_122], %161 {strides = array<i32>} : memref<64x10xf32, #tpu.memory_space<vmem>>, vector<61x10xf32>,
    %c0_123 = arith.constant 0 : index
    %c0_124 = arith.constant 0 : index
    %163 = tpu.strided_load %arg23[%c0_123, %c0_124] {strides = array<i32: 8, 1>} : memref<64x10xf32, #tpu.memory_space<vmem>>, vector<8x10xf32>
    %cst_125 = arith.constant dense<0xFF800000> : vector<8xf32>
    %164 = vector.multi_reduction <maximumf>, %163, %cst_125 [1] : vector<8x10xf32> to vector<8xf32>
    %165 = vector.shape_cast %164 : vector<8xf32> to vector<8x1xf32>
    %166 = vector.broadcast %165 : vector<8x1xf32> to vector<8x10xf32>
    %167 = arith.subf %163, %166 : vector<8x10xf32>
    %168 = math.exp %167 : vector<8x10xf32>
    %cst_126 = arith.constant dense<0.000000e+00> : vector<8xf32>
    %169 = vector.multi_reduction <add>, %168, %cst_126 [1] : vector<8x10xf32> to vector<8xf32>
    %170 = vector.shape_cast %169 : vector<8xf32> to vector<8x1xf32>
    %171 = math.log %170 : vector<8x1xf32>
    %172 = vector.broadcast %171 : vector<8x1xf32> to vector<8x10xf32>
    %173 = arith.subf %167, %172 : vector<8x10xf32>
    %c0_127 = arith.constant 0 : index
    %c0_128 = arith.constant 0 : index
    %174 = vector.load %arg20[%c0_127, %c0_128] : memref<8x10xf32, #tpu.memory_space<vmem>>, vector<8x10xf32>
    tpu.vector_store %arg20[%c0_127, %c0_128], %173 {strides = array<i32>} : memref<8x10xf32, #tpu.memory_space<vmem>>, vector<8x10xf32>,
    return
  }
  func.func @transform_0(%arg0: i32) -> (i32, i32) {
    %c0_i32 = arith.constant 0 : i32
    %c0_i32_0 = arith.constant 0 : i32
    return %arg0, %c0_i32 : i32, i32
  }
  func.func @transform_1(%arg0: i32) -> (i32, i32, i32) {
    %c0_i32 = arith.constant 0 : i32
    %c0_i32_0 = arith.constant 0 : i32
    %c0_i32_1 = arith.constant 0 : i32
    %c0_i32_2 = arith.constant 0 : i32
    return %c0_i32, %c0_i32_0, %c0_i32_1 : i32, i32, i32
  }
  func.func @transform_2(%arg0: i32) -> (i32, i32) {
    %c0_i32 = arith.constant 0 : i32
    %c0_i32_0 = arith.constant 0 : i32
    %c0_i32_1 = arith.constant 0 : i32
    return %c0_i32, %c0_i32_0 : i32, i32
  }
  func.func @transform_3(%arg0: i32) -> (i32, i32, i32) {
    %c0_i32 = arith.constant 0 : i32
    %c0_i32_0 = arith.constant 0 : i32
    %c0_i32_1 = arith.constant 0 : i32
    %c0_i32_2 = arith.constant 0 : i32
    return %c0_i32, %c0_i32_0, %c0_i32_1 : i32, i32, i32
  }
  func.func @transform_4(%arg0: i32) -> (i32, i32) {
    %c0_i32 = arith.constant 0 : i32
    %c0_i32_0 = arith.constant 0 : i32
    %c0_i32_1 = arith.constant 0 : i32
    return %c0_i32, %c0_i32_0 : i32, i32
  }
  func.func @transform_5(%arg0: i32) -> (i32, i32) {
    %c0_i32 = arith.constant 0 : i32
    %c0_i32_0 = arith.constant 0 : i32
    %c0_i32_1 = arith.constant 0 : i32
    return %c0_i32, %c0_i32_0 : i32, i32
  }
  func.func @transform_6(%arg0: i32) -> (i32, i32, i32) {
    %c0_i32 = arith.constant 0 : i32
    %c0_i32_0 = arith.constant 0 : i32
    %c0_i32_1 = arith.constant 0 : i32
    %c0_i32_2 = arith.constant 0 : i32
    return %c0_i32, %c0_i32_0, %c0_i32_1 : i32, i32, i32
  }
  func.func @transform_7(%arg0: i32) -> (i32, i32) {
    %c0_i32 = arith.constant 0 : i32
    %c0_i32_0 = arith.constant 0 : i32
    %c0_i32_1 = arith.constant 0 : i32
    return %c0_i32, %c0_i32_0 : i32, i32
  }
  func.func @transform_8(%arg0: i32) -> (i32, i32, i32) {
    %c0_i32 = arith.constant 0 : i32
    %c0_i32_0 = arith.constant 0 : i32
    %c0_i32_1 = arith.constant 0 : i32
    %c0_i32_2 = arith.constant 0 : i32
    return %c0_i32, %c0_i32_0, %c0_i32_1 : i32, i32, i32
  }
  func.func @transform_9(%arg0: i32) -> (i32, i32) {
    %c0_i32 = arith.constant 0 : i32
    %c0_i32_0 = arith.constant 0 : i32
    %c0_i32_1 = arith.constant 0 : i32
    return %c0_i32, %c0_i32_0 : i32, i32
  }
  func.func @transform_10(%arg0: i32) -> (i32, i32, i32) {
    %c0_i32 = arith.constant 0 : i32
    %c0_i32_0 = arith.constant 0 : i32
    %c0_i32_1 = arith.constant 0 : i32
    %c0_i32_2 = arith.constant 0 : i32
    return %c0_i32, %c0_i32_0, %c0_i32_1 : i32, i32, i32
  }
  func.func @transform_11(%arg0: i32) -> (i32, i32) {
    %c0_i32 = arith.constant 0 : i32
    %c0_i32_0 = arith.constant 0 : i32
    %c0_i32_1 = arith.constant 0 : i32
    return %c0_i32, %c0_i32_0 : i32, i32
  }
  func.func @transform_12(%arg0: i32) -> (i32, i32) {
    %c0_i32 = arith.constant 0 : i32
    %c0_i32_0 = arith.constant 0 : i32
    %c0_i32_1 = arith.constant 0 : i32
    return %c0_i32, %c0_i32_0 : i32, i32
  }
  func.func @transform_13(%arg0: i32) -> (i32, i32, i32) {
    %c0_i32 = arith.constant 0 : i32
    %c0_i32_0 = arith.constant 0 : i32
    %c0_i32_1 = arith.constant 0 : i32
    %c0_i32_2 = arith.constant 0 : i32
    return %c0_i32, %c0_i32_0, %c0_i32_1 : i32, i32, i32
  }
  func.func @transform_14(%arg0: i32) -> (i32, i32) {
    %c0_i32 = arith.constant 0 : i32
    %c0_i32_0 = arith.constant 0 : i32
    %c0_i32_1 = arith.constant 0 : i32
    return %c0_i32, %c0_i32_0 : i32, i32
  }
  func.func @transform_15(%arg0: i32) -> (i32, i32, i32) {
    %c0_i32 = arith.constant 0 : i32
    %c0_i32_0 = arith.constant 0 : i32
    %c0_i32_1 = arith.constant 0 : i32
    %c0_i32_2 = arith.constant 0 : i32
    return %c0_i32, %c0_i32_0, %c0_i32_1 : i32, i32, i32
  }
  func.func @transform_16(%arg0: i32) -> (i32, i32) {
    %c0_i32 = arith.constant 0 : i32
    %c0_i32_0 = arith.constant 0 : i32
    %c0_i32_1 = arith.constant 0 : i32
    return %c0_i32, %c0_i32_0 : i32, i32
  }
  func.func @transform_17(%arg0: i32) -> (i32, i32, i32) {
    %c0_i32 = arith.constant 0 : i32
    %c0_i32_0 = arith.constant 0 : i32
    %c0_i32_1 = arith.constant 0 : i32
    %c0_i32_2 = arith.constant 0 : i32
    return %c0_i32, %c0_i32_0, %c0_i32_1 : i32, i32, i32
  }
  func.func @transform_18(%arg0: i32) -> (i32, i32) {
    %c0_i32 = arith.constant 0 : i32
    %c0_i32_0 = arith.constant 0 : i32
    %c0_i32_1 = arith.constant 0 : i32
    return %c0_i32, %c0_i32_0 : i32, i32
  }
  func.func @transform_19(%arg0: i32) -> (i32, i32) {
    %c0_i32 = arith.constant 0 : i32
    %c0_i32_0 = arith.constant 0 : i32
    return %arg0, %c0_i32 : i32, i32
  }
}

</mosaic_0001>

<bundles_post_ra>
// kernel: netinitial_forward.1
= control target key start
LH: loop header
LB: loop body
LE: loop exit
PB: predicated region body
PF: predicated region fallthrough
CT: control target
= control target key end

     0   :  { %s12506_s0 = inlined_call_operand.vmem [shape: f32[512,28], index: 0, kind: input, shape index: {}]   ;;  %s12507_s1 = inlined_call_operand.vmem [shape: bf16[3,28,208], index: 1, kind: input, shape index: {}]   ;;  %s12508_s2 = inlined_call_operand.vmem [shape: f32[1,208], index: 2, kind: input, shape index: {}]   ;;  %s12509_s3 = inlined_call_operand.vmem [shape: bf16[3,208,192], index: 3, kind: input, shape index: {}]   ;;  %s12510_s4 = inlined_call_operand.vmem [shape: f32[1,192], index: 4, kind: input, shape index: {}]   ;;  %s12511_s5 = inlined_call_operand.vmem [shape: bf16[192,192], index: 5, kind: input, shape index: {}]   ;;  %s12512_s6 = inlined_call_operand.vmem [shape: bf16[1,96,192], index: 6, kind: input, shape index: {}]   ;;  %s12513_s7 = inlined_call_operand.vmem [shape: f32[1,192], index: 7, kind: input, shape index: {}]   ;;  %s12514_s8 = inlined_call_operand.vmem [shape: bf16[3,192,160], index: 8, kind: input, shape index: {}]   ;;  %s12515_s9 = inlined_call_operand.vmem [shape: f32[1,160], index: 9, kind: input, shape index: {}]   ;;  %s12516_s10 = inlined_call_operand.vmem [shape: bf16[3,160,128], index: 10, kind: input, shape index: {}]   ;;  %s12517_s11 = inlined_call_operand.vmem [shape: f32[1,128], index: 11, kind: input, shape index: {}]   ;;  %s12518_s12 = inlined_call_operand.vmem [shape: bf16[128,128], index: 12, kind: input, shape index: {}]   ;;  %s12519_s13 = inlined_call_operand.vmem [shape: bf16[1,64,128], index: 13, kind: input, shape index: {}]   ;;  %s12520_s14 = inlined_call_operand.vmem [shape: f32[1,128], index: 14, kind: input, shape index: {}]   ;;  %s12521_s15 = inlined_call_operand.vmem [shape: bf16[3,128,64], index: 15, kind: input, shape index: {}]   ;;  %s12522_s16 = inlined_call_operand.vmem [shape: f32[1,64], index: 16, kind: input, shape index: {}]   ;;  %s12523_s17 = inlined_call_operand.vmem [shape: bf16[2,64,10], index: 17, kind: input, shape index: {}]   ;;  %s12524_s18 = inlined_call_operand.vmem [shape: f32[1,10], index: 18, kind: input, shape index: {}]   ;;  %s12525_s19 = inlined_call_operand.hbm [shape: f32[16,10], index: 19, kind: output, shape index: {}]  }
   0x1   :  { %12533 = sst [smem:[#allocation13_spill]] %s12506_s0 }
   0x2   :  { %12534 = sst [smem:[#allocation14_spill]] %s12507_s1 }
   0x3   :  { %12535 = sst [smem:[#allocation15_spill]] %s12508_s2 }
   0x4   :  { %12536 = sst [smem:[#allocation16_spill]] %s12509_s3 }
   0x5   :  { %12537 = sst [smem:[#allocation17_spill]] %s12510_s4 }
   0x6   :  { %12538 = sst [smem:[#allocation18_spill]] %s12511_s5 }
   0x7   :  { %24 = vsyncpa [#allocation6], 0 }
   0x8   :  { %26 = vsyncpa [#allocation6 + $0x1], 0  ;;  %s9933_s0 = smov 0   ;;  %s9935_s30 = smov 0  }
   0x9   :  { %s9937_s20 = smov 0   ;;  %s9939_s21 = smov 0  }
   0xa LB: > { %12539 = sst [smem:[#allocation8_spill]] %s9814_s0  ;;  %s9954_s1 = sadd.s32 4294967295, %s9826_s21   ;;  %s9826_s21 = sphi %s9939_s21, %s12555_s21   ;;  %s9822_s20 = sphi %s9937_s20, %s12557_s20   ;;  %s9818_s30 = sphi %s9935_s30, %s12559_s30   ;;  %s9814_s0 = sphi %s9933_s0, %s12558_s0  }
   0xb   : > { %12540 = sst [smem:[#allocation9_spill]] %s9822_s20  ;;  %s8108_s22 = sadd.s32 4294967294, %s9826_s21  }
   0xc   : > { %s9958_s2 = sadd.s32 1, %s9826_s21   ;;  %s443_s23 = sadd.s32 1, %s9822_s20 }
   0xd   : > { %12541 = sst [smem:[#allocation10_spill]] %s9958_s2  ;;  %s440_s24 = ssub.s32 %s9826_s21, %s9958_s2 }
   0xe   : > { %p453_p0 = scmp.ne.s32.totalorder %s9822_s20, %s9818_s30  ;;  %p441_p1 = scmp.eq.s32.totalorder %s440_s24, 0 }
   0xf   : > { %p454_p2 = scmp.eq.s32.totalorder %s9954_s1, 1  ;;  %p459_p3 = scmp.ne.s32.totalorder %s9818_s30, %s9814_s0 }
  0x10   : > { %p460_p4 = scmp.eq.s32.totalorder %s8108_s22, 1  ;;  %p8111_p7 = scmp.ge.s32.totalorder %s9826_s21, 1 }
  0x11   : > { %s9969_s25 = scalar_select %p441_p1, %s9822_s20, %s443_s23  }
  0x12   : > { %p9971_p5 = por %p454_p2, %p453_p0  ;;  %p9975_p6 = por %p460_p4, %p459_p3 }
  0x13   : > { %12542 = sst [smem:[#allocation11_spill]] %s9969_s25  ;;  %p541_p8 = scmp.lt.s32.totalorder %s9826_s21, 3 }
  0x14   : > { %s12544_s26 = scalar_select %p9975_p6, 1, 0 }
  0x15   : > { %p542_p9 = pnand %p8111_p7, %p541_p8 }
  0x16   : > { %12545 = sst [smem:[#allocation12_spill]] %s12544_s26  ;;  %s12546_s29 = sld [smem:[#allocation14_spill]] (!%p542_p9)  ;;  %vm856_vm0 = vcmask (!%p542_p9), 1045504   ;;  %v9828_v2 = vmov (!%p542_p9), 0   ;;  %vm661_vm1 = vsmask.f32 (!%p542_p9), 7424 }
  0x17   : > { %545 = sbr.rel (%p542_p9) target bundleno = 3881 (0xf29), region = 96  ;;  %895 = vmatprep.mubr.bf16.mxu0 (!%p542_p9), %v9828_v2  ;;  %s8113_s24 = sshll.u32 (!%p542_p9), %s9954_s1, 5  ;;  %vm807_vm2 = vcmask (!%p542_p9), 228352   ;;  %vm1326_vm3 = vcmask (!%p542_p9), 1046528   ;;  %vm2312_vm4 = vcmask (!%p542_p9), 654336   ;;  %vm3797_vm5 = vcmask (!%p542_p9), 523264  }
  0x18   : > { %p598_p10 = scmp.lt.s32.totalorder (!%p542_p9), %s8113_s24, 63  ;;  %s12547_s23 = sld [smem:[#allocation13_spill]] (!%p542_p9)  ;;  %vm4456_vm6 = vcmask (!%p542_p9), 781312   ;;  %vm4295_vm7 = vcmask (!%p542_p9), 261120   ;;  %vm4424_vm8 = vcmask (!%p542_p9), 785408   ;;  %vm7100_vm9 = vcmask (!%p542_p9), 519168  }
  0x19   : > { %s12548_s20 = sld [smem:[#allocation16_spill]] (!%p542_p9)  ;;  %s12551_s5 = sld [smem:[#allocation18_spill]] (!%p542_p9)  ;;  %vm8009_vm10 = vcmask (!%p542_p9), 80896   ;;  %vm8017_vm11 = vcmask (!%p542_p9), 77824  }
  0x1a   : > { %s12552_s4 = sld [smem:[#allocation17_spill]] (!%p542_p9)  ;;  %s9829_s2 = smov (!%p542_p9), 32  }
  0x1b   : > { %s8763_s26 = sshll.u32 (!%p542_p9), %s9954_s1, 7  ;;  %s9832_s1 = smov (!%p542_p9), [#allocation5]  }
  0x1c   : > { %v9389_v0 = vld [vmem:[%s12546_s29 + $0x24] ss:$8 sps:$4 sm:$0xff] (!%p542_p9)   ;;  %v9391_v1 = vld [vmem:[%s12546_s29 + $0x20] ss:$8 sps:$4 sm:$0xff] (!%p542_p9)  }
  0x1d   : > { %863 = vmatprep.subr.bf16.mxu0 (!%p542_p9), %v9389_v0  ;;  %v9392_v3 = vld [vmem:[%s12546_s29 + $0x34] ss:$8 sps:$4 sm:$0x3f] (!%p542_p9)   ;;  %v9394_v4 = vld [vmem:[%s12546_s29 + $0x30] ss:$8 sps:$4 sm:$0x3f] (!%p542_p9)  }
  0x1e   : > { %864 = vmatpush1.bf16.msra.mxu0 %v9391_v1  ;;  %v858_v5 = vsel %vm856_vm0, %v9394_v4, 0  ;;  %v9397_v6 = vld [vmem:[%s12546_s29 + $0x4] ss:$8 sps:$4 sm:$0xff]   ;;  %s12561_s24 = smov (!%p598_p10, %s8113_s24), 63  ;;  %v9395_v20 = vld [vmem:[%s12546_s29] ss:$8 sps:$4 sm:$0xff]  }
  0x1f   : > { %8123 = vmatprep.subr.msk.bf16.mxu0 %vm856_vm0, %v9392_v3  ;;  %s8114_s22 = sshll.u32 %s12561_s24, 3  ;;  %v9398_v25 = vld [vmem:[%s12546_s29 + $0x14] ss:$8 sps:$4 sm:$0x3f]   ;;  %v9403_v33 = vld [vmem:[%s12546_s29 + $0x44] ss:$8 sps:$4 sm:$0xff]   ;;  %s12549_s25 = smov %s12548_s20 }
  0x20   : > { %s10003_s0 = scalar_lea.vmem %s12547_s23, %s8114_s22  ;;  %v9400_v28 = vld [vmem:[%s12546_s29 + $0x10] ss:$8 sps:$4 sm:$0x3f]   ;;  %s9831_s23 = smov 64  }
  0x21   : > { %v604_v7 = vld [vmem:[%s10003_s0] sm:$0xff]  ;;  %v605_v8 = vld [vmem:[%s10003_s0 + $0x8] sm:$0xff]  ;;  %v606_v9 = vld [vmem:[%s10003_s0 + $0x10] sm:$0xff]  ;;  %v1107_v34 = vsel %vm856_vm0, %v9400_v28, 0 }
  0x22   : > { %866 = vmatpush1.bf16.msra.mxu0 %v858_v5  ;;  %v607_v10 = vld [vmem:[%s10003_s0 + $0x18] sm:$0xff]  ;;  %v10009_v11 = vpack.c.bf16 %v605_v8, %v604_v7  ;;  %v608_v12 = vld [vmem:[%s10003_s0 + $0x20] sm:$0xff]  ;;  %v609_v13 = vld [vmem:[%s10003_s0 + $0x28] sm:$0xff] }
  0x23   : > { %1112 = vmatprep.subr.bf16.mxu0 %v9397_v6  ;;  %v10013_v14 = vpack.c.bf16 %v607_v10, %v606_v9  ;;  %v10017_v17 = vpack.c.bf16 %v609_v13, %v608_v12  ;;  %v610_v26 = vld [vmem:[%s10003_s0 + $0x30] sm:$0xff]  ;;  %v611_v27 = vld [vmem:[%s10003_s0 + $0x38] sm:$0xff]  ;;  %v612_v35 = vld [vmem:[%s10003_s0 + $0x40] sm:$0xff] }
  0x24   : > { %v663_v15 = vshrl.u32 %v10009_v11, 16  ;;  %v665_v16 = vshll.u32 %v10009_v11, 16  ;;  %v10036_v32 = vpack.c.bf16 %v611_v27, %v610_v26  ;;  %v613_v36 = vld [vmem:[%s10003_s0 + $0x48] sm:$0xff]  ;;  %v614_v43 = vld [vmem:[%s10003_s0 + $0x50] sm:$0xff]  ;;  %v615_v44 = vld [vmem:[%s10003_s0 + $0x58] sm:$0xff] }
  0x25   : > { %v670_v18 = vshll.u32 %v10013_v14, 16  ;;  %v674_v23 = vshrl.u32 %v10013_v14, 16  ;;  %v678_v24 = vshll.u32 %v10017_v17, 16  ;;  %v682_v38 = vshrl.u32 %v10017_v17, 16  ;;  %v616_v51 = vld [vmem:[%s10003_s0 + $0x60] sm:$0xff]  ;;  %v617_v52 = vld [vmem:[%s10003_s0 + $0x68] sm:$0xff] }
  0x26   : > { %v667_v19 = vrot.slane %v665_v16, 1  ;;  %v686_v39 = vshll.u32 %v10036_v32, 16  ;;  %v10050_v42 = vpack.c.bf16 %v613_v36, %v612_v35  ;;  %v690_v46 = vshrl.u32 %v10036_v32, 16  ;;  %v618_v59 = vld [vmem:[%s10003_s0 + $0x70] sm:$0xff]  ;;  %v619_v60 = vld [vmem:[%s10003_s0 + $0x78] sm:$0xff]  ;;  %v620_v4 = vld [vmem:[%s10003_s0 + $0x80] sm:$0xff] }
  0x27   : > { %v672_v21 = vrot.slane %v670_v18, 1  ;;  %v680_v31 = vrot.slane %v678_v24, 1  ;;  %v10059_v50 = vpack.c.bf16 %v615_v44, %v614_v43  ;;  %v10068_v58 = vpack.c.bf16 %v617_v52, %v616_v51  ;;  %v621_v5 = vld [vmem:[%s10003_s0 + $0x88] sm:$0xff]  ;;  %v622_v13 = vld [vmem:[%s10003_s0 + $0x90] sm:$0xff]  ;;  %v628_v27 = vld [vmem:[%s10003_s0 + $0xc0] sm:$0xff] }
  0x28   : > { %v668_v22 = vor.u32 %v667_v19, %v663_v15  ;;  %v688_v41 = vrot.slane %v686_v39, 1  ;;  %v694_v47 = vshll.u32 %v10050_v42, 16  ;;  %v698_v54 = vshrl.u32 %v10050_v42, 16  ;;  %v623_v15 = vld [vmem:[%s10003_s0 + $0x98] sm:$0xff]  ;;  %v629_v28 = vld [vmem:[%s10003_s0 + $0xc8] sm:$0xff]  ;;  %v634_v39 = vld [vmem:[%s10003_s0 + $0xf0] sm:$0xff] }
  0x29   : > { %v676_v30 = vor.u32 %v674_v23, %v672_v21  ;;  %v684_v40 = vor.u32 %v682_v38, %v680_v31  ;;  %v702_v55 = vshll.u32 %v10059_v50, 16  ;;  %v706_v62 = vshrl.u32 %v10059_v50, 16  ;;  %v627_v23 = vld [vmem:[%s10003_s0 + $0xb8] sm:$0xff] }
  0x2a   : > { %v673_v29 = vsel %vm661_vm1, %v668_v22, %v672_v21  ;;  %v692_v48 = vor.u32 %v690_v46, %v688_v41  ;;  %v696_v49 = vrot.slane %v694_v47, 1  ;;  %v710_v63 = vshll.u32 %v10068_v58, 16  ;;  %v625_v21 = vld [vmem:[%s10003_s0 + $0xa8] sm:$0xff]  ;;  %v626_v22 = vld [vmem:[%s10003_s0 + $0xb0] sm:$0xff] }
  0x2b   : > { %8124 = vmatmul.mubr.msk.bf16.vlgmr.msra.gmra.mrb[0].mxu0 %vm807_vm2, %v673_v29  ;;  %v681_v37 = vsel %vm661_vm1, %v676_v30, %v680_v31  ;;  %v689_v45 = vsel %vm661_vm1, %v684_v40, %v688_v41  ;;  %v704_v57 = vrot.slane %v702_v55, 1  ;;  %v10077_v3 = vpack.c.bf16 %v619_v60, %v618_v59  ;;  %v630_v29 = vld [vmem:[%s10003_s0 + $0xd0] sm:$0xff]  ;;  %v631_v30 = vld [vmem:[%s10003_s0 + $0xd8] sm:$0xff]  ;;  %v632_v31 = vld [vmem:[%s10003_s0 + $0xe0] sm:$0xff] }
  0x2c   : > { %1113 = vmatpush1.bf16.msra.mxu0 %v9395_v20  ;;  %905 = vmatprep.mubr.bf16.mxu0 %v9828_v2  ;;  %v697_v53 = vsel %vm661_vm1, %v692_v48, %v696_v49  ;;  %v700_v56 = vor.u32 %v698_v54, %v696_v49  ;;  %v712_v1 = vrot.slane %v710_v63, 1  ;;  %v714_v7 = vshrl.u32 %v10068_v58, 16  ;;  %v624_v20 = vld [vmem:[%s10003_s0 + $0xa0] sm:$0xff]  ;;  %v635_v40 = vld [vmem:[%s10003_s0 + $0xf8] sm:$0xff] }
  0x2d   : > { %8144 = vmatprep.subr.msk.bf16.mxu0 %vm856_vm0, %v9398_v25  ;;  %v708_v0 = vor.u32 %v706_v62, %v704_v57  ;;  %v718_v8 = vshll.u32 %v10077_v3, 16  ;;  %v10086_v12 = vpack.c.bf16 %v621_v5, %v620_v4  ;;  %v722_v18 = vshrl.u32 %v10077_v3, 16 }
  0x2e   : > { %v705_v61 = vsel %vm661_vm1, %v700_v56, %v704_v57  ;;  %v716_v9 = vor.u32 %v714_v7, %v712_v1  ;;  %v10099_v26 = vpack.c.bf16 %v623_v15, %v622_v13  ;;  %v10112_v38 = vpack.c.bf16 %v627_v23, %v626_v22 }
  0x2f   : > { %v713_v6 = vsel %vm661_vm1, %v708_v0, %v712_v1  ;;  %v720_v10 = vrot.slane %v718_v8, 1  ;;  %v726_v19 = vshll.u32 %v10086_v12, 16  ;;  %v730_v36 = vshrl.u32 %v10086_v12, 16 }
  0x30   : > { %1115 = vmatpush1.bf16.msra.mxu0 %v1107_v34  ;;  %v10107_v34 = vpack.c.bf16 %v625_v21, %v624_v20  ;;  %v10116_v41 = vpack.c.bf16 %v629_v28, %v628_v27  ;;  %v10119_v43 = vpack.c.bf16 %v631_v30, %v630_v29  ;;  %v750_v48 = vshll.u32 %v10112_v38, 16  ;;  %v9404_v27 = vld [vmem:[%s12546_s29 + $0x54] ss:$8 sps:$4 sm:$0x3f]  }
  0x31   : > { %1430 = vmatprep.subr.bf16.mxu0 %v9403_v33  ;;  %v721_v16 = vsel %vm661_vm1, %v716_v9, %v720_v10  ;;  %v724_v24 = vor.u32 %v722_v18, %v720_v10  ;;  %v728_v25 = vrot.slane %v726_v19, 1  ;;  %v633_v33 = vld [vmem:[%s10003_s0 + $0xe8] sm:$0xff]  ;;  %v10127_v51 = vpack.c.bf16 %v635_v40, %v634_v39  ;;  %v9406_v28 = vld [vmem:[%s12546_s29 + $0x50] ss:$8 sps:$4 sm:$0x3f]   ;;  %s12550_s0 = sld [smem:[#allocation15_spill]] }
  0x32   : > { %v10121_v44 = vpack.c.bf16 %v633_v33, %v632_v31  ;;  %v742_v47 = vshll.u32 %v10107_v34, 16  ;;  %v758_v49 = vshll.u32 %v10116_v41, 16  ;;  %v738_v52 = vshrl.u32 %v10099_v26, 16  ;;  %v9407_v30 = vld [vmem:[%s12548_s20 + $0xd4] ss:$8 sps:$4 sm:$0xff]  }
  0x33   : > { %8125 = vmatmul.mubr.msk.bf16.gmra.mrb[4].mxu0 %vm807_vm2, %v681_v37  ;;  %v729_v35 = vsel %vm661_vm1, %v724_v24, %v728_v25  ;;  %v734_v37 = vshll.u32 %v10099_v26, 16  ;;  %v766_v54 = vshll.u32 %v10119_v43, 16  ;;  %v752_v59 = vrot.slane %v750_v48, 1  ;;  %v9409_v31 = vld [vmem:[%s12549_s25 + $0xd0] ss:$8 sps:$4 sm:$0xff]   ;;  %2361 = vmatprep.subr.bf16.mxu1 %v9407_v30 }
  0x34   : > { %915 = vmatprep.mubr.bf16.mxu0 %v9828_v2  ;;  %v774_v55 = vshll.u32 %v10121_v44, 16  ;;  %v744_v57 = vrot.slane %v742_v47, 1  ;;  %v754_v60 = vshrl.u32 %v10112_v38, 16  ;;  %v762_v62 = vshrl.u32 %v10116_v41, 16  ;;  %v9410_v33 = vld [vmem:[%s12549_s25 + $0xe4] ss:$8 sps:$4 sm:$0xff]   ;;  %2362 = vmatpush1.bf16.msra.mxu1 %v9409_v31 }
  0x35   : > { %v736_v46 = vrot.slane %v734_v37, 1  ;;  %v782_v63 = vshll.u32 %v10127_v51, 16  ;;  %v768_v0 = vrot.slane %v766_v54, 1  ;;  %v770_v1 = vshrl.u32 %v10119_v43, 16  ;;  %v9412_v37 = vld [vmem:[%s12549_s25 + $0xe0] ss:$8 sps:$4 sm:$0xff]   ;;  %2363 = vmatprep.subr.bf16.mxu1 %v9410_v33 }
  0x36   : > { %v776_v4 = vrot.slane %v774_v55, 1  ;;  %v778_v5 = vshrl.u32 %v10121_v44, 16  ;;  %v786_v8 = vshrl.u32 %v10127_v51, 16  ;;  %v756_v15 = vor.u32 %v754_v60, %v752_v59  ;;  %v9413_v39 = vld [vmem:[%s12549_s25 + $0xf4] ss:$8 sps:$4 sm:$0xff]  }
  0x37   : > { %v784_v7 = vrot.slane %v782_v63, 1  ;;  %v772_v20 = vor.u32 %v770_v1, %v768_v0  ;;  %v1425_v29 = vsel %vm856_vm0, %v9406_v28, 0  ;;  %v9419_v47 = vld [vmem:[%s12549_s25 + $0x114] ss:$8 sps:$4 sm:$0xff]   ;;  %v1336_v60 = vrot.slane %v10059_v50, 1 }
  0x38   : > { %v780_v22 = vor.u32 %v778_v5, %v776_v4  ;;  %2364 = vmatpush1.bf16.msra.mxu1 %v9412_v37  ;;  %v9425_v54 = vld [vmem:[%s12549_s25 + $0x134] ss:$8 sps:$4 sm:$0xff]   ;;  %v1340_v63 = vrot.slane %v10077_v3, 1 }
  0x39   : > { %v777_v21 = vsel %vm661_vm1, %v772_v20, %v776_v4  ;;  %v788_v24 = vor.u32 %v786_v8, %v784_v7  ;;  %2365 = vmatprep.subr.bf16.mxu1 %v9413_v39  ;;  %v9431_v8 = vld [vmem:[%s12549_s25 + $0x154] ss:$8 sps:$4 sm:$0xff]  }
  0x3a   : > { %v785_v23 = vsel %vm661_vm1, %v780_v22, %v784_v7  ;;  %v1356_v22 = vrot.slane %v10127_v51, 1 }
  0x3b   : > { %8126 = vmatmul.mubr.msk.bf16.gmra.mrb[8].mxu0 %vm807_vm2, %v689_v45  ;;  %v732_v45 = vor.u32 %v730_v36, %v728_v25  ;;  %v9401_v25 = vld [vmem:[%s12546_s29 + $0x40] ss:$8 sps:$4 sm:$0xff]   ;;  %v1328_v36 = vrot.slane %v10013_v14, 1 }
  0x3c   : > { %925 = vmatprep.mubr.bf16.mxu0 %v9828_v2 }
  0x3d   : > { %v737_v56 = vsel %vm661_vm1, %v732_v45, %v736_v46  ;;  %v1330_v45 = vrot.slane %v10017_v17, 1 }
  0x3f   : > { %v1331_v48 = vsel %vm1326_vm3, %v1328_v36, %v1330_v45 }
  0x43   : > { %8127 = vmatmul.mubr.msk.bf16.gmra.mrb[12].mxu0 %vm807_vm2, %v697_v53  ;;  %v746_v53 = vshrl.u32 %v10107_v34, 16 }
  0x44   : > { %935 = vmatprep.mubr.bf16.mxu0 %v9828_v2 }
  0x45   : > { %v748_v10 = vor.u32 %v746_v53, %v744_v57  ;;  %v9424_v53 = vld [vmem:[%s12549_s25 + $0x120] ss:$8 sps:$4 sm:$0xff]  }
  0x47   : > { %v753_v13 = vsel %vm661_vm1, %v748_v10, %v752_v59  ;;  %v9436_v10 = vld [vmem:[%s12549_s25 + $0x160] ss:$8 sps:$4 sm:$0xff]  }
  0x4b   : > { %8128 = vmatmul.mubr.msk.bf16.gmra.mrb[16].mxu0 %vm807_vm2, %v705_v61  ;;  %v760_v61 = vrot.slane %v758_v49, 1  ;;  %v9421_v49 = vld [vmem:[%s12549_s25 + $0x110] ss:$8 sps:$4 sm:$0xff]  }
  0x4c   : > { %945 = vmatprep.mubr.bf16.mxu0 %v9828_v2 }
  0x4d   : > { %v764_v18 = vor.u32 %v762_v62, %v760_v61  ;;  %v1338_v62 = vrot.slane %v10068_v58, 1 }
  0x4f   : > { %v769_v19 = vsel %vm661_vm1, %v764_v18, %v768_v0  ;;  %v1341_v0 = vsel %vm1326_vm3, %v1338_v62, %v1340_v63  ;;  %v9440_v18 = vld [vmem:[%s12549_s25 + $0x184] ss:$8 sps:$4 sm:$0xff]  }
  0x53   : > { %8129 = vmatmul.mubr.msk.bf16.gmra.mrb[20].mxu0 %vm807_vm2, %v713_v6  ;;  %v740_v6 = vor.u32 %v738_v52, %v736_v46  ;;  %v9418_v46 = vld [vmem:[%s12549_s25 + $0x100] ss:$8 sps:$4 sm:$0xff]   ;;  %v1332_v52 = vrot.slane %v10036_v32, 1 }
  0x54   : > { %955 = vmatprep.mubr.bf16.mxu0 %v9828_v2 }
  0x55   : > { %v745_v9 = vsel %vm661_vm1, %v740_v6, %v744_v57  ;;  %v1333_v55 = vsel %vm1326_vm3, %v1330_v45, %v1332_v52  ;;  %v1334_v57 = vrot.slane %v10050_v42, 1 }
  0x57   : > { %v1335_v59 = vsel %vm1326_vm3, %v1332_v52, %v1334_v57 }
  0x5b   : > { %8130 = vmatmul.mubr.msk.bf16.gmra.mrb[24].mxu0 %vm807_vm2, %v721_v16  ;;  %v761_v16 = vsel %vm661_vm1, %v756_v15, %v760_v61  ;;  %v1337_v61 = vsel %vm1326_vm3, %v1334_v57, %v1336_v60  ;;  %v9437_v15 = vld [vmem:[%s12549_s25 + $0x174] ss:$8 sps:$4 sm:$0xff]  }
  0x5c   : > { %965 = vmatprep.mubr.bf16.mxu0 %v9828_v2 }
  0x63   : > { %8131 = vmatmul.mubr.msk.bf16.gmra.mrb[28].mxu0 %vm807_vm2, %v729_v35  ;;  %v1327_v35 = vrot.slane %v10009_v11, 1 }
  0x64   : > { %975 = vmatprep.mubr.bf16.mxu0 %v9828_v2 }
  0x65   : > { %v1329_v40 = vsel %vm1326_vm3, %v1327_v35, %v1328_v36 }
  0x6b   : > { %8132 = vmatmul.mubr.msk.bf16.gmra.mrb[32].mxu0 %vm807_vm2, %v737_v56  ;;  %v9427_v56 = vld [vmem:[%s12549_s25 + $0x130] ss:$8 sps:$4 sm:$0xff]  }
  0x6c   : > { %985 = vmatprep.mubr.bf16.mxu0 %v9828_v2 }
  0x73   : > { %8133 = vmatmul.mubr.msk.bf16.gmra.mrb[36].mxu0 %vm807_vm2, %v745_v9  ;;  %v9434_v9 = vld [vmem:[%s12549_s25 + $0x164] ss:$8 sps:$4 sm:$0xff]  }
  0x74   : > { %995 = vmatprep.mubr.bf16.mxu0 %v9828_v2 }
  0x7b   : > { %8134 = vmatmul.mubr.msk.bf16.gmra.mrb[40].mxu0 %vm807_vm2, %v753_v13 }
  0x7c   : > { %1005 = vmatprep.mubr.bf16.mxu0 %v9828_v2 }
  0x83   : > { %8135 = vmatmul.mubr.msk.bf16.gmra.mrb[44].mxu0 %vm807_vm2, %v761_v16  ;;  %v1354_v16 = vrot.slane %v10121_v44, 1 }
  0x84   : > { %1015 = vmatprep.mubr.bf16.mxu0 %v9828_v2 }
  0x8b   : > { %8136 = vmatmul.mubr.msk.bf16.gmra.mrb[48].mxu0 %vm807_vm2, %v769_v19  ;;  %v9442_v19 = vld [vmem:[%s12549_s25 + $0x180] ss:$8 sps:$4 sm:$0xff]  }
  0x8c   : > { %1025 = vmatprep.mubr.bf16.mxu0 %v9828_v2 }
  0x93   : > { %8137 = vmatmul.mubr.msk.bf16.gmra.mrb[52].mxu0 %vm807_vm2, %v777_v21  ;;  %v9443_v21 = vld [vmem:[%s12549_s25 + $0x194] ss:$8 sps:$4 sm:$0xff]  }
  0x94   : > { %1035 = vmatprep.mubr.bf16.mxu0 %v9828_v2 }
  0x9b   : > { %8138 = vmatmul.mubr.msk.bf16.gmra.mrb[56].mxu0 %vm807_vm2, %v785_v23  ;;  %v9448_v23 = vld [vmem:[%s12549_s25 + $0x4] ss:$8 sps:$4 sm:$0xff]  }
  0x9c   : > { %1045 = vmatprep.mubr.bf16.mxu0 %v9828_v2 }
  0xa3   : > { %8139 = vmatmul.mubr.msk.bf16.gmra.mrb[60].mxu0 %vm807_vm2, %v788_v24  ;;  %v1357_v24 = vsel %vm1326_vm3, %v1354_v16, %v1356_v22 }
  0xa4   : > { %1144 = vmatprep.mubr.bf16.mxu0 %v9828_v2 }
  0xab   : > { %8145 = vmatmul.mubr.msk.bf16.vlgmr.msra.gmra.mrb[0].mxu0 %vm807_vm2, %v10009_v11  ;;  %v9415_v11 = vld [vmem:[%s12549_s25 + $0xf0] ss:$8 sps:$4 sm:$0xff]  }
  0xac   : > { %1431 = vmatpush1.bf16.msra.mxu0 %v9401_v25  ;;  %1154 = vmatprep.mubr.bf16.mxu0 %v9828_v2  ;;  %v1689_v25 = vlaneseq }
  0xad   : > { %8169 = vmatprep.subr.msk.bf16.mxu0 %vm856_vm0, %v9404_v27  ;;  %2366 = vmatpush1.bf16.msra.mxu1 %v9415_v11 }
  0xae   : > { %v1690_v27 = vshrl.u32 %v1689_v25, 7 }
  0xb0   : > { %1433 = vmatpush1.bf16.msra.mxu0 %v1425_v29  ;;  %v10364_v28 = vsub.s32 0, %v1690_v27  ;;  %v10369_v29 = vsub.s32 1, %v1690_v27 }
  0xb3   : > { %8146 = vmatmul.mubr.msk.bf16.gmra.mrb[4].mxu0 %vm807_vm2, %v10013_v14  ;;  %v9416_v14 = vld [vmem:[%s12549_s25 + $0x104] ss:$8 sps:$4 sm:$0xff]  }
  0xb4   : > { %1164 = vmatprep.mubr.bf16.mxu0 %v9828_v2  ;;  %2367 = vmatprep.subr.bf16.mxu1 %v9416_v14 }
  0xb5   : > { %2368 = vmatpush1.bf16.msra.mxu1 %v9418_v46 }
  0xb6   : > { %2369 = vmatprep.subr.bf16.mxu1 %v9419_v47 }
  0xb9   : > { %2370 = vmatpush1.bf16.msra.mxu1 %v9421_v49 }
  0xbb   : > { %8147 = vmatmul.mubr.msk.bf16.gmra.mrb[8].mxu0 %vm807_vm2, %v10017_v17  ;;  %v9422_v17 = vld [vmem:[%s12549_s25 + $0x124] ss:$8 sps:$4 sm:$0xff]  }
  0xbc   : > { %1174 = vmatprep.mubr.bf16.mxu0 %v9828_v2  ;;  %2371 = vmatprep.subr.bf16.mxu1 %v9422_v17 }
  0xbd   : > { %2372 = vmatpush1.bf16.msra.mxu1 %v9424_v53 }
  0xbe   : > { %2373 = vmatprep.subr.bf16.mxu1 %v9425_v54 }
  0xc1   : > { %2374 = vmatpush1.bf16.msra.mxu1 %v9427_v56 }
  0xc3   : > { %8148 = vmatmul.mubr.msk.bf16.gmra.mrb[12].mxu0 %vm807_vm2, %v10036_v32  ;;  %v9428_v32 = vld [vmem:[%s12549_s25 + $0x144] ss:$8 sps:$4 sm:$0xff]  }
  0xc4   : > { %1184 = vmatprep.mubr.bf16.mxu0 %v9828_v2  ;;  %2375 = vmatprep.subr.bf16.mxu1 %v9428_v32 }
  0xcb   : > { %8149 = vmatmul.mubr.msk.bf16.gmra.mrb[16].mxu0 %vm807_vm2, %v10050_v42  ;;  %v1339_v42 = vsel %vm1326_vm3, %v1336_v60, %v1338_v62 }
  0xcc   : > { %1194 = vmatprep.mubr.bf16.mxu0 %v9828_v2 }
  0xd3   : > { %8150 = vmatmul.mubr.msk.bf16.gmra.mrb[20].mxu0 %vm807_vm2, %v10059_v50  ;;  %v1342_v50 = vrot.slane %v10086_v12, 1 }
  0xd4   : > { %1204 = vmatprep.mubr.bf16.mxu0 %v9828_v2 }
  0xd5   : > { %v1343_v1 = vsel %vm1326_vm3, %v1340_v63, %v1342_v50 }
  0xdb   : > { %8151 = vmatmul.mubr.msk.bf16.gmra.mrb[24].mxu0 %vm807_vm2, %v10068_v58  ;;  %v1344_v58 = vrot.slane %v10099_v26, 1 }
  0xdc   : > { %1214 = vmatprep.mubr.bf16.mxu0 %v9828_v2 }
  0xdd   : > { %v1345_v4 = vsel %vm1326_vm3, %v1342_v50, %v1344_v58 }
  0xe3   : > { %8152 = vmatmul.mubr.msk.bf16.gmra.mrb[28].mxu0 %vm807_vm2, %v10077_v3  ;;  %v1346_v3 = vrot.slane %v10107_v34, 1 }
  0xe4   : > { %1224 = vmatprep.mubr.bf16.mxu0 %v9828_v2 }
  0xe5   : > { %v1347_v5 = vsel %vm1326_vm3, %v1344_v58, %v1346_v3 }
  0xeb   : > { %8153 = vmatmul.mubr.msk.bf16.gmra.mrb[32].mxu0 %vm807_vm2, %v10086_v12  ;;  %v1348_v12 = vrot.slane %v10112_v38, 1 }
  0xec   : > { %1234 = vmatprep.mubr.bf16.mxu0 %v9828_v2 }
  0xed   : > { %v1349_v6 = vsel %vm1326_vm3, %v1346_v3, %v1348_v12 }
  0xf3   : > { %8154 = vmatmul.mubr.msk.bf16.gmra.mrb[36].mxu0 %vm807_vm2, %v10099_v26  ;;  %v1350_v26 = vrot.slane %v10116_v41, 1 }
  0xf4   : > { %1244 = vmatprep.mubr.bf16.mxu0 %v9828_v2 }
  0xf5   : > { %v1351_v7 = vsel %vm1326_vm3, %v1348_v12, %v1350_v26 }
  0xfb   : > { %8155 = vmatmul.mubr.msk.bf16.gmra.mrb[40].mxu0 %vm807_vm2, %v10107_v34  ;;  %v9430_v34 = vld [vmem:[%s12549_s25 + $0x140] ss:$8 sps:$4 sm:$0xff]  }
  0xfc   : > { %1254 = vmatprep.mubr.bf16.mxu0 %v9828_v2  ;;  %2376 = vmatpush1.bf16.msra.mxu1 %v9430_v34 }
  0xfd   : > { %2377 = vmatprep.subr.bf16.mxu1 %v9431_v8 }
 0x103   : > { %8156 = vmatmul.mubr.msk.bf16.gmra.mrb[44].mxu0 %vm807_vm2, %v10112_v38  ;;  %v9433_v38 = vld [vmem:[%s12549_s25 + $0x150] ss:$8 sps:$4 sm:$0xff]  }
 0x104   : > { %1264 = vmatprep.mubr.bf16.mxu0 %v9828_v2  ;;  %2378 = vmatpush1.bf16.msra.mxu1 %v9433_v38 }
 0x105   : > { %2379 = vmatprep.subr.bf16.mxu1 %v9434_v9 }
 0x108   : > { %2380 = vmatpush1.bf16.msra.mxu1 %v9436_v10 }
 0x109   : > { %2381 = vmatprep.subr.bf16.mxu1 %v9437_v15 }
 0x10b   : > { %8157 = vmatmul.mubr.msk.bf16.gmra.mrb[48].mxu0 %vm807_vm2, %v10116_v41  ;;  %v1352_v41 = vrot.slane %v10119_v43, 1 }
 0x10c   : > { %1274 = vmatprep.mubr.bf16.mxu0 %v9828_v2 }
 0x10d   : > { %v1353_v13 = vsel %vm1326_vm3, %v1350_v26, %v1352_v41  ;;  %v1355_v20 = vsel %vm1326_vm3, %v1352_v41, %v1354_v16 }
 0x113   : > { %8158 = vmatmul.mubr.msk.bf16.gmra.mrb[52].mxu0 %vm807_vm2, %v10119_v43  ;;  %v9439_v43 = vld [vmem:[%s12549_s25 + $0x170] ss:$8 sps:$4 sm:$0xff]  }
 0x114   : > { %1284 = vmatprep.mubr.bf16.mxu0 %v9828_v2  ;;  %2382 = vmatpush1.bf16.msra.mxu1 %v9439_v43 }
 0x115   : > { %2383 = vmatprep.subr.bf16.mxu1 %v9440_v18 }
 0x118   : > { %2384 = vmatpush1.bf16.msra.mxu1 %v9442_v19  ;;  %v9446_v19 = vld [vmem:[%s12549_s25] ss:$8 sps:$4 sm:$0xff]  }
 0x119   : > { %2385 = vmatprep.subr.bf16.mxu1 %v9443_v21 }
 0x11b   : > { %8159 = vmatmul.mubr.msk.bf16.gmra.mrb[56].mxu0 %vm807_vm2, %v10121_v44  ;;  %v9445_v44 = vld [vmem:[%s12549_s25 + $0x190] ss:$8 sps:$4 sm:$0xff]  }
 0x11c   : > { %1294 = vmatprep.mubr.bf16.mxu0 %v9828_v2  ;;  %2386 = vmatpush1.bf16.msra.mxu1 %v9445_v44 }
 0x11d   : > { %2716 = vmatprep.subr.bf16.mxu1 %v9448_v23  ;;  %v9451_v23 = vld [vmem:[%s12549_s25 + $0x14] ss:$8 sps:$4 sm:$0xff]  }
 0x123   : > { %8160 = vmatmul.mubr.msk.bf16.gmra.mrb[60].mxu0 %vm807_vm2, %v10127_v51  ;;  %v1687_v51 = vld [vmem:[%s12550_s0] sm:$0x3]  ;;  %s594_s0 = sand.u32 1, %s9818_s30  }
 0x124   : > { %1462 = vmatprep.mubr.bf16.mxu0 %v9828_v2  ;;  %v10372_v30 = vrot.slane %v1687_v51, %v10364_v28  ;;  %v10375_v31 = vrot.slane %v1687_v51, %v10369_v29  ;;  %s8036_s22 = scalar_lea.sflag [#allocation6], %s594_s0 }
 0x12b   : > { %8170 = vmatmul.mubr.msk.bf16.vlgmr.msra.gmra.mrb[0].mxu0 %vm807_vm2, %v1329_v40 }
 0x12c   : > { %1472 = vmatprep.mubr.bf16.mxu0 %v9828_v2 }
 0x133   : > { %8171 = vmatmul.mubr.msk.bf16.gmra.mrb[4].mxu0 %vm807_vm2, %v1331_v48 }
 0x134   : > { %1482 = vmatprep.mubr.bf16.mxu0 %v9828_v2 }
 0x13b   : > { %8172 = vmatmul.mubr.msk.bf16.gmra.mrb[8].mxu0 %vm807_vm2, %v1333_v55 }
 0x13c   : > { %1492 = vmatprep.mubr.bf16.mxu0 %v9828_v2 }
 0x143   : > { %8173 = vmatmul.mubr.msk.bf16.gmra.mrb[12].mxu0 %vm807_vm2, %v1335_v59 }
 0x144   : > { %1502 = vmatprep.mubr.bf16.mxu0 %v9828_v2 }
 0x14b   : > { %8174 = vmatmul.mubr.msk.bf16.gmra.mrb[16].mxu0 %vm807_vm2, %v1337_v61 }
 0x14c   : > { %1512 = vmatprep.mubr.bf16.mxu0 %v9828_v2 }
 0x153   : > { %8175 = vmatmul.mubr.msk.bf16.gmra.mrb[20].mxu0 %vm807_vm2, %v1339_v42 }
 0x154   : > { %1522 = vmatprep.mubr.bf16.mxu0 %v9828_v2 }
 0x15b   : > { %8176 = vmatmul.mubr.msk.bf16.gmra.mrb[24].mxu0 %vm807_vm2, %v1341_v0 }
 0x15c   : > { %1532 = vmatprep.mubr.bf16.mxu0 %v9828_v2 }
 0x163   : > { %8177 = vmatmul.mubr.msk.bf16.gmra.mrb[28].mxu0 %vm807_vm2, %v1343_v1 }
 0x164   : > { %1542 = vmatprep.mubr.bf16.mxu0 %v9828_v2 }
 0x16b   : > { %8178 = vmatmul.mubr.msk.bf16.gmra.mrb[32].mxu0 %vm807_vm2, %v1345_v4 }
 0x16c   : > { %1552 = vmatprep.mubr.bf16.mxu0 %v9828_v2 }
 0x173   : > { %8179 = vmatmul.mubr.msk.bf16.gmra.mrb[36].mxu0 %vm807_vm2, %v1347_v5 }
 0x174   : > { %1562 = vmatprep.mubr.bf16.mxu0 %v9828_v2 }
 0x17b   : > { %8180 = vmatmul.mubr.msk.bf16.gmra.mrb[40].mxu0 %vm807_vm2, %v1349_v6 }
 0x17c   : > { %1572 = vmatprep.mubr.bf16.mxu0 %v9828_v2 }
 0x183   : > { %8181 = vmatmul.mubr.msk.bf16.gmra.mrb[44].mxu0 %vm807_vm2, %v1351_v7 }
 0x184   : > { %1582 = vmatprep.mubr.bf16.mxu0 %v9828_v2 }
 0x18b   : > { %8182 = vmatmul.mubr.msk.bf16.gmra.mrb[48].mxu0 %vm807_vm2, %v1353_v13 }
 0x18c   : > { %1592 = vmatprep.mubr.bf16.mxu0 %v9828_v2 }
 0x193   : > { %8183 = vmatmul.mubr.msk.bf16.gmra.mrb[52].mxu0 %vm807_vm2, %v1355_v20 }
 0x194   : > { %1602 = vmatprep.mubr.bf16.mxu0 %v9828_v2 }
 0x19b   : > { %8184 = vmatmul.mubr.msk.bf16.gmra.mrb[56].mxu0 %vm807_vm2, %v1357_v24 }
 0x19c   : > { %1612 = vmatprep.mubr.bf16.mxu0 %v9828_v2 }
 0x1a3   : > { %8185 = vmatmul.mubr.msk.bf16.gmra.mrb[60].mxu0 %vm807_vm2, %v1356_v22 }
 0x1fe   : > { %v1464_v33 = vpop.f32.mrb[0].mxu0 }
 0x1ff   : > { %v1699_v35 = vadd.f32 %v10372_v30, %v1464_v33  ;;  %v1466_v36 = vpop.f32.mrb[1].mxu0 }
 0x200   : > { %v1700_v37 = vadd.f32 %v10375_v31, %v1466_v36  ;;  %v1468_v39 = vpop.f32.mrb[2].mxu0 }
 0x201   : > { %v1701_v40 = vadd.f32 %v10372_v30, %v1468_v39  ;;  %v1470_v11 = vpop.f32.mrb[3].mxu0  ;;  %v1763_v45 = vmax.f32 %v1699_v35, 0.0 }
 0x202   : > { %v1702_v14 = vadd.f32 %v10375_v31, %v1470_v11  ;;  %v1764_v47 = vmax.f32 %v1700_v37, 0.0  ;;  %v9449_v37 = vld [vmem:[%s12549_s25 + $0x10] ss:$8 sps:$4 sm:$0xff]  }
 0x203   : > { %v1765_v46 = vmax.f32 %v1701_v40, 0.0 }
 0x204   : > { %v1766_v48 = vmax.f32 %v1702_v14, 0.0 }
 0x205   : > { %v10381_v49 = vpack.c.bf16 %v1765_v46, %v1763_v45  ;;  %v9454_v45 = vld [vmem:[%s12549_s25 + $0x24] ss:$8 sps:$4 sm:$0xff]  }
 0x206   : > { %v10383_v17 = vpack.c.bf16 %v1766_v48, %v1764_v47  ;;  %v1474_v52 = vpop.f32.mrb[4].mxu0 }
 0x207   : > { %v1703_v53 = vadd.f32 %v10372_v30, %v1474_v52  ;;  %v1476_v54 = vpop.f32.mrb[5].mxu0  ;;  %v1915_v42 = vshll.u32 %v10381_v49, 16  ;;  %v1913_v9 = vshrl.u32 %v10381_v49, 16 }
 0x208   : > { %v1704_v55 = vadd.f32 %v10375_v31, %v1476_v54  ;;  %v1478_v56 = vpop.f32.mrb[6].mxu0  ;;  %v1927_v60 = vshll.u32 %v10383_v17, 16  ;;  %v1925_v7 = vshrl.u32 %v10383_v17, 16 }
 0x209   : > { %v1705_v32 = vadd.f32 %v10372_v30, %v1478_v56  ;;  %v1480_v57 = vpop.f32.mrb[7].mxu0  ;;  %v1767_v61 = vmax.f32 %v1703_v53, 0.0  ;;  %v1917_v12 = vrot.slane %v1915_v42, 1  ;;  %v9457_v42 = vld [vmem:[%s12549_s25 + $0x34] ss:$8 sps:$4 sm:$0xff]  }
 0x20a   : > { %v1706_v59 = vadd.f32 %v10375_v31, %v1480_v57  ;;  %v1768_v63 = vmax.f32 %v1704_v55, 0.0  ;;  %v1929_v4 = vrot.slane %v1927_v60, 1 }
 0x20b   : > { %v1769_v62 = vmax.f32 %v1705_v32, 0.0  ;;  %v1918_v20 = vor.u32 %v1917_v12, %v1913_v9 }
 0x20c   : > { %v1770_v0 = vmax.f32 %v1706_v59, 0.0  ;;  %v1930_v15 = vor.u32 %v1929_v4, %v1925_v7  ;;  %v9452_v59 = vld [vmem:[%s12549_s25 + $0x20] ss:$8 sps:$4 sm:$0xff]  }
 0x20d   : > { %v10391_v50 = vpack.c.bf16 %v1769_v62, %v1767_v61 }
 0x20e   : > { %v10393_v1 = vpack.c.bf16 %v1770_v0, %v1768_v63  ;;  %v1484_v58 = vpop.f32.mrb[8].mxu0 }
 0x20f   : > { %v1707_v3 = vadd.f32 %v10372_v30, %v1484_v58  ;;  %v1486_v5 = vpop.f32.mrb[9].mxu0  ;;  %v1920_v6 = vshll.u32 %v10391_v50, 16  ;;  %v1936_v48 = vshrl.u32 %v10391_v50, 16 }
 0x210   : > { %v1708_v26 = vadd.f32 %v10375_v31, %v1486_v5  ;;  %v1488_v34 = vpop.f32.mrb[10].mxu0  ;;  %v1932_v8 = vshll.u32 %v10393_v1, 16  ;;  %v1944_v39 = vshrl.u32 %v10393_v1, 16 }
 0x211   : > { %v1709_v38 = vadd.f32 %v10372_v30, %v1488_v34  ;;  %v1490_v41 = vpop.f32.mrb[11].mxu0  ;;  %v1922_v10 = vrot.slane %v1920_v6, 1  ;;  %v1771_v16 = vmax.f32 %v1707_v3, 0.0  ;;  %v9455_v6 = vld [vmem:[%s12549_s25 + $0x30] ss:$8 sps:$4 sm:$0xff]  }
 0x212   : > { %v1710_v13 = vadd.f32 %v10375_v31, %v1490_v41  ;;  %v1934_v43 = vrot.slane %v1932_v8, 1  ;;  %v1772_v21 = vmax.f32 %v1708_v26, 0.0 }
 0x213   : > { %v1773_v18 = vmax.f32 %v1709_v38, 0.0  ;;  %v1923_v25 = vsel %vm661_vm1, %v1918_v20, %v1922_v10  ;;  %v1938_v57 = vor.u32 %v1936_v48, %v1922_v10  ;;  %v9460_v38 = vld [vmem:[%s12549_s25 + $0x44] ss:$8 sps:$4 sm:$0xff]  }
 0x214   : > { %v1774_v44 = vmax.f32 %v1710_v13, 0.0  ;;  %v1935_v22 = vsel %vm661_vm1, %v1930_v15, %v1934_v43  ;;  %v1946_v53 = vor.u32 %v1944_v39, %v1934_v43  ;;  %v9466_v48 = vld [vmem:[%s12549_s25 + $0x64] ss:$8 sps:$4 sm:$0xff]  }
 0x215   : > { %v10410_v24 = vpack.c.bf16 %v1773_v18, %v1771_v16  ;;  %8238 = vmatprep.mubr.msk.bf16.mxu1 %vm2312_vm4, %v1935_v22 }
 0x216   : > { %v10414_v27 = vpack.c.bf16 %v1774_v44, %v1772_v21  ;;  %v1494_v51 = vpop.f32.mrb[12].mxu0  ;;  %2394 = vmatmul.mubr.bf16.vlgmr.msra.gmra.mrb[0].mxu1 %v1923_v25  ;;  %v9458_v21 = vld [vmem:[%s12549_s25 + $0x40] ss:$8 sps:$4 sm:$0xff]   ;;  %v9463_v25 = vld [vmem:[%s12549_s25 + $0x54] ss:$8 sps:$4 sm:$0xff]  }
 0x217   : > { %v1711_v33 = vadd.f32 %v10372_v30, %v1494_v51  ;;  %2717 = vmatpush1.bf16.msra.mxu1 %v9446_v19  ;;  %v1496_v35 = vpop.f32.mrb[13].mxu0  ;;  %v1940_v36 = vshll.u32 %v10410_v24, 16  ;;  %v1952_v10 = vshrl.u32 %v10410_v24, 16 }
 0x218   : > { %v1712_v40 = vadd.f32 %v10375_v31, %v1496_v35  ;;  %v1498_v11 = vpop.f32.mrb[14].mxu0  ;;  %v1948_v14 = vshll.u32 %v10414_v27, 16  ;;  %2718 = vmatprep.subr.bf16.mxu1 %v9451_v23  ;;  %v1960_v7 = vshrl.u32 %v10414_v27, 16 }
 0x219   : > { %v1713_v46 = vadd.f32 %v10372_v30, %v1498_v11  ;;  %v1500_v47 = vpop.f32.mrb[15].mxu0  ;;  %v1942_v52 = vrot.slane %v1940_v36, 1  ;;  %v1775_v56 = vmax.f32 %v1711_v33, 0.0  ;;  %v9461_v11 = vld [vmem:[%s12549_s25 + $0x50] ss:$8 sps:$4 sm:$0xff]  }
 0x21a   : > { %v1714_v54 = vadd.f32 %v10375_v31, %v1500_v47  ;;  %v1950_v55 = vrot.slane %v1948_v14, 1  ;;  %v1776_v60 = vmax.f32 %v1712_v40, 0.0 }
 0x21b   : > { %v1777_v32 = vmax.f32 %v1713_v46, 0.0  ;;  %2719 = vmatpush1.bf16.msra.mxu1 %v9449_v37  ;;  %v1943_v0 = vsel %vm661_vm1, %v1938_v57, %v1942_v52  ;;  %v1954_v20 = vor.u32 %v1952_v10, %v1942_v52 }
 0x21c   : > { %v1778_v61 = vmax.f32 %v1714_v54, 0.0  ;;  %v1951_v62 = vsel %vm661_vm1, %v1946_v53, %v1950_v55  ;;  %2720 = vmatprep.subr.bf16.mxu1 %v9454_v45  ;;  %v1962_v43 = vor.u32 %v1960_v7, %v1950_v55 }
 0x21d   : > { %v10437_v63 = vpack.c.bf16 %v1777_v32, %v1775_v56  ;;  %8239 = vmatprep.mubr.msk.bf16.mxu1 %vm2312_vm4, %v1951_v62  ;;  %v9464_v62 = vld [vmem:[%s12549_s25 + $0x60] ss:$8 sps:$4 sm:$0xff]  }
 0x21e   : > { %v10441_v58 = vpack.c.bf16 %v1778_v61, %v1776_v60  ;;  %v1504_v4 = vpop.f32.mrb[16].mxu0  ;;  %2404 = vmatmul.mubr.bf16.gmra.mrb[4].mxu1 %v1943_v0 }
 0x21f   : > { %v1715_v3 = vadd.f32 %v10372_v30, %v1504_v4  ;;  %v1506_v5 = vpop.f32.mrb[17].mxu0  ;;  %v1956_v12 = vshll.u32 %v10437_v63, 16  ;;  %2721 = vmatpush1.bf16.msra.mxu1 %v9452_v59  ;;  %v1968_v54 = vshrl.u32 %v10437_v63, 16 }
 0x220   : > { %v1716_v26 = vadd.f32 %v10375_v31, %v1506_v5  ;;  %v1508_v34 = vpop.f32.mrb[18].mxu0  ;;  %v1964_v8 = vshll.u32 %v10441_v58, 16  ;;  %2722 = vmatprep.subr.bf16.mxu1 %v9457_v42  ;;  %v1976_v46 = vshrl.u32 %v10441_v58, 16 }
 0x221   : > { %v1717_v41 = vadd.f32 %v10372_v30, %v1508_v34  ;;  %v1510_v9 = vpop.f32.mrb[19].mxu0  ;;  %v1958_v13 = vrot.slane %v1956_v12, 1  ;;  %v1779_v18 = vmax.f32 %v1715_v3, 0.0  ;;  %v9469_v3 = vld [vmem:[%s12549_s25 + $0x74] ss:$8 sps:$4 sm:$0xff]  }
 0x222   : > { %v1718_v15 = vadd.f32 %v10375_v31, %v1510_v9  ;;  %v1966_v16 = vrot.slane %v1964_v8, 1  ;;  %v1780_v44 = vmax.f32 %v1716_v26, 0.0 }
 0x223   : > { %v1781_v19 = vmax.f32 %v1717_v41, 0.0  ;;  %2723 = vmatpush1.bf16.msra.mxu1 %v9455_v6  ;;  %v1959_v33 = vsel %vm661_vm1, %v1954_v20, %v1958_v13  ;;  %v1970_v61 = vor.u32 %v1968_v54, %v1958_v13 }
 0x224   : > { %v1782_v22 = vmax.f32 %v1718_v15, 0.0  ;;  %v1967_v23 = vsel %vm661_vm1, %v1962_v43, %v1966_v16  ;;  %2724 = vmatprep.subr.bf16.mxu1 %v9460_v38  ;;  %v1978_v32 = vor.u32 %v1976_v46, %v1966_v16  ;;  %v9467_v38 = vld [vmem:[%s12549_s25 + $0x70] ss:$8 sps:$4 sm:$0xff]   ;;  %v9472_v15 = vld [vmem:[%s12549_s25 + $0x84] ss:$8 sps:$4 sm:$0xff]  }
 0x225   : > { %v10464_v51 = vpack.c.bf16 %v1781_v19, %v1779_v18  ;;  %8240 = vmatprep.mubr.msk.bf16.mxu1 %vm2312_vm4, %v1967_v23 }
 0x226   : > { %v10468_v35 = vpack.c.bf16 %v1782_v22, %v1780_v44  ;;  %v1514_v36 = vpop.f32.mrb[20].mxu0  ;;  %2414 = vmatmul.mubr.bf16.gmra.mrb[8].mxu1 %v1959_v33  ;;  %v9470_v33 = vld [vmem:[%s12549_s25 + $0x80] ss:$8 sps:$4 sm:$0xff]  }
 0x227   : > { %v1719_v37 = vadd.f32 %v10372_v30, %v1514_v36  ;;  %v1516_v39 = vpop.f32.mrb[21].mxu0  ;;  %v1972_v40 = vshll.u32 %v10464_v51, 16  ;;  %2725 = vmatpush1.bf16.msra.mxu1 %v9458_v21  ;;  %v1984_v18 = vshrl.u32 %v10464_v51, 16 }
 0x228   : > { %v1720_v14 = vadd.f32 %v10375_v31, %v1516_v39  ;;  %v1518_v45 = vpop.f32.mrb[22].mxu0  ;;  %v1980_v47 = vshll.u32 %v10468_v35, 16  ;;  %2726 = vmatprep.subr.bf16.mxu1 %v9463_v25  ;;  %v1992_v10 = vshrl.u32 %v10468_v35, 16 }
 0x229   : > { %v1721_v52 = vadd.f32 %v10372_v30, %v1518_v45  ;;  %v1520_v53 = vpop.f32.mrb[23].mxu0  ;;  %v1974_v55 = vrot.slane %v1972_v40, 1  ;;  %v1783_v59 = vmax.f32 %v1719_v37, 0.0  ;;  %v9475_v40 = vld [vmem:[%s12549_s25 + $0x94] ss:$8 sps:$4 sm:$0xff]  }
 0x22a   : > { %v1722_v56 = vadd.f32 %v10375_v31, %v1520_v53  ;;  %v1982_v57 = vrot.slane %v1980_v47, 1  ;;  %v1784_v42 = vmax.f32 %v1720_v14, 0.0  ;;  %v9473_v53 = vld [vmem:[%s12549_s25 + $0x90] ss:$8 sps:$4 sm:$0xff]  }
 0x22b   : > { %v1785_v60 = vmax.f32 %v1721_v52, 0.0  ;;  %2727 = vmatpush1.bf16.msra.mxu1 %v9461_v11  ;;  %v1975_v12 = vsel %vm661_vm1, %v1970_v61, %v1974_v55  ;;  %v1986_v25 = vor.u32 %v1984_v18, %v1974_v55 }
 0x22c   : > { %v1786_v0 = vmax.f32 %v1722_v56, 0.0  ;;  %v1983_v4 = vsel %vm661_vm1, %v1978_v32, %v1982_v57  ;;  %2728 = vmatprep.subr.bf16.mxu1 %v9466_v48  ;;  %v1994_v21 = vor.u32 %v1992_v10, %v1982_v57  ;;  %v9478_v57 = vld [vmem:[%s12549_s25 + $0xa4] ss:$8 sps:$4 sm:$0xff]  }
 0x22d   : > { %v10491_v5 = vpack.c.bf16 %v1785_v60, %v1783_v59  ;;  %8241 = vmatprep.mubr.msk.bf16.mxu1 %vm2312_vm4, %v1983_v4 }
 0x22e   : > { %v10495_v6 = vpack.c.bf16 %v1786_v0, %v1784_v42  ;;  %v1524_v26 = vpop.f32.mrb[24].mxu0  ;;  %2424 = vmatmul.mubr.bf16.gmra.mrb[12].mxu1 %v1975_v12 }
 0x22f   : > { %v1723_v34 = vadd.f32 %v10372_v30, %v1524_v26  ;;  %v1526_v7 = vpop.f32.mrb[25].mxu0  ;;  %v1988_v8 = vshll.u32 %v10491_v5, 16  ;;  %2729 = vmatpush1.bf16.msra.mxu1 %v9464_v62  ;;  %v2000_v61 = vshrl.u32 %v10491_v5, 16 }
 0x230   : > { %v1724_v41 = vadd.f32 %v10375_v31, %v1526_v7  ;;  %v1528_v9 = vpop.f32.mrb[26].mxu0  ;;  %v1996_v13 = vshll.u32 %v10495_v6, 16  ;;  %2730 = vmatprep.subr.bf16.mxu1 %v9469_v3  ;;  %v2008_v56 = vshrl.u32 %v10495_v6, 16 }
 0x231   : > { %v1725_v43 = vadd.f32 %v10372_v30, %v1528_v9  ;;  %v1530_v16 = vpop.f32.mrb[27].mxu0  ;;  %v1990_v19 = vrot.slane %v1988_v8, 1  ;;  %v1787_v22 = vmax.f32 %v1723_v34, 0.0  ;;  %v9476_v34 = vld [vmem:[%s12549_s25 + $0xa0] ss:$8 sps:$4 sm:$0xff]  }
 0x232   : > { %v1726_v20 = vadd.f32 %v10375_v31, %v1530_v16  ;;  %v1998_v44 = vrot.slane %v1996_v13, 1  ;;  %v1788_v36 = vmax.f32 %v1724_v41, 0.0  ;;  %v9481_v41 = vld [vmem:[%s12549_s25 + $0xb4] ss:$8 sps:$4 sm:$0xff]  }
 0x233   : > { %v1789_v23 = vmax.f32 %v1725_v43, 0.0  ;;  %2731 = vmatpush1.bf16.msra.mxu1 %v9467_v38  ;;  %v1991_v14 = vsel %vm661_vm1, %v1986_v25, %v1990_v19  ;;  %v2002_v26 = vor.u32 %v2000_v61, %v1990_v19  ;;  %v9479_v19 = vld [vmem:[%s12549_s25 + $0xb0] ss:$8 sps:$4 sm:$0xff]  }
 0x234   : > { %v1790_v37 = vmax.f32 %v1726_v20, 0.0  ;;  %v1999_v39 = vsel %vm661_vm1, %v1994_v21, %v1998_v44  ;;  %2732 = vmatprep.subr.bf16.mxu1 %v9472_v15  ;;  %v2010_v0 = vor.u32 %v2008_v56, %v1998_v44  ;;  %v9487_v56 = vld [vmem:[%s12549_s25 + $0x1a4] ss:$8 sps:$4 sm:$0xff]  }
 0x235   : > { %v10518_v11 = vpack.c.bf16 %v1789_v23, %v1787_v22  ;;  %8242 = vmatprep.mubr.msk.bf16.mxu1 %vm2312_vm4, %v1999_v39  ;;  %v9484_v23 = vld [vmem:[%s12549_s25 + $0xc4] ss:$8 sps:$4 sm:$0xff]  }
 0x236   : > { %v10522_v45 = vpack.c.bf16 %v1790_v37, %v1788_v36  ;;  %v1534_v46 = vpop.f32.mrb[28].mxu0  ;;  %2434 = vmatmul.mubr.bf16.gmra.mrb[16].mxu1 %v1991_v14 }
 0x237   : > { %v1727_v47 = vadd.f32 %v10372_v30, %v1534_v46  ;;  %v1536_v48 = vpop.f32.mrb[29].mxu0  ;;  %v2004_v52 = vshll.u32 %v10518_v11, 16  ;;  %2733 = vmatpush1.bf16.msra.mxu1 %v9470_v33  ;;  %v2016_v36 = vshrl.u32 %v10518_v11, 16 }
 0x238   : > { %v1728_v54 = vadd.f32 %v10375_v31, %v1536_v48  ;;  %v1538_v55 = vpop.f32.mrb[30].mxu0  ;;  %v2012_v32 = vshll.u32 %v10522_v45, 16  ;;  %2734 = vmatprep.subr.bf16.mxu1 %v9475_v40  ;;  %v2024_v44 = vshrl.u32 %v10522_v45, 16 }
 0x239   : > { %v1729_v59 = vadd.f32 %v10372_v30, %v1538_v55  ;;  %v1540_v60 = vpop.f32.mrb[31].mxu0  ;;  %v2006_v62 = vrot.slane %v2004_v52, 1  ;;  %v1791_v3 = vmax.f32 %v1727_v47, 0.0  ;;  %v9482_v52 = vld [vmem:[%s12549_s25 + $0xc0] ss:$8 sps:$4 sm:$0xff]  }
 0x23a   : > { %v1730_v42 = vadd.f32 %v10375_v31, %v1540_v60  ;;  %v2014_v4 = vrot.slane %v2012_v32, 1  ;;  %v1792_v7 = vmax.f32 %v1728_v54, 0.0 }
 0x23b   : > { %v1793_v12 = vmax.f32 %v1729_v59, 0.0  ;;  %2735 = vmatpush1.bf16.msra.mxu1 %v9473_v53  ;;  %v2007_v10 = vsel %vm661_vm1, %v2002_v26, %v2006_v62  ;;  %v2018_v48 = vor.u32 %v2016_v36, %v2006_v62 }
 0x23c   : > { %v1794_v8 = vmax.f32 %v1730_v42, 0.0  ;;  %v2015_v38 = vsel %vm661_vm1, %v2010_v0, %v2014_v4  ;;  %2736 = vmatprep.subr.bf16.mxu1 %v9478_v57  ;;  %v2026_v40 = vor.u32 %v2024_v44, %v2014_v4 }
 0x23d   : > { %v10545_v9 = vpack.c.bf16 %v1793_v12, %v1791_v3  ;;  %8243 = vmatprep.mubr.msk.bf16.mxu1 %vm2312_vm4, %v2015_v38 }
 0x23e   : > { %v10549_v13 = vpack.c.bf16 %v1794_v8, %v1792_v7  ;;  %v1544_v15 = vpop.f32.mrb[32].mxu0  ;;  %2444 = vmatmul.mubr.bf16.gmra.mrb[20].mxu1 %v2007_v10 }
 0x23f   : > { %v1731_v43 = vadd.f32 %v10372_v30, %v1544_v15  ;;  %v1546_v16 = vpop.f32.mrb[33].mxu0  ;;  %v2020_v18 = vshll.u32 %v10545_v9, 16  ;;  %2737 = vmatpush1.bf16.msra.mxu1 %v9476_v34  ;;  %v2032_v7 = vshrl.u32 %v10545_v9, 16 }
 0x240   : > { %v1732_v20 = vadd.f32 %v10375_v31, %v1546_v16  ;;  %v1548_v21 = vpop.f32.mrb[34].mxu0  ;;  %v2028_v22 = vshll.u32 %v10549_v13, 16  ;;  %2738 = vmatprep.subr.bf16.mxu1 %v9481_v41  ;;  %v2040_v3 = vshrl.u32 %v10549_v13, 16 }
 0x241   : > { %v1733_v25 = vadd.f32 %v10372_v30, %v1548_v21  ;;  %v1550_v33 = vpop.f32.mrb[35].mxu0  ;;  %v2022_v37 = vrot.slane %v2020_v18, 1  ;;  %v1795_v46 = vmax.f32 %v1731_v43, 0.0 }
 0x242   : > { %v1734_v39 = vadd.f32 %v10375_v31, %v1550_v33  ;;  %v2030_v14 = vrot.slane %v2028_v22, 1  ;;  %v1796_v53 = vmax.f32 %v1732_v20, 0.0 }
 0x243   : > { %v1797_v47 = vmax.f32 %v1733_v25, 0.0  ;;  %2739 = vmatpush1.bf16.msra.mxu1 %v9479_v19  ;;  %v2023_v57 = vsel %vm661_vm1, %v2018_v48, %v2022_v37  ;;  %v2034_v16 = vor.u32 %v2032_v7, %v2022_v37 }
 0x244   : > { %v1798_v54 = vmax.f32 %v1734_v39, 0.0  ;;  %v2031_v55 = vsel %vm661_vm1, %v2026_v40, %v2030_v14  ;;  %2740 = vmatprep.subr.bf16.mxu1 %v9484_v23  ;;  %v2042_v41 = vor.u32 %v2040_v3, %v2030_v14 }
 0x245   : > { %v10572_v32 = vpack.c.bf16 %v1797_v47, %v1795_v46  ;;  %8244 = vmatprep.mubr.msk.bf16.mxu1 %vm2312_vm4, %v2031_v55 }
 0x246   : > { %v10576_v59 = vpack.c.bf16 %v1798_v54, %v1796_v53  ;;  %v1554_v60 = vpop.f32.mrb[36].mxu0  ;;  %2454 = vmatmul.mubr.bf16.gmra.mrb[24].mxu1 %v2023_v57 }
 0x247   : > { %v1735_v61 = vadd.f32 %v10372_v30, %v1554_v60  ;;  %v1556_v62 = vpop.f32.mrb[37].mxu0  ;;  %v2036_v42 = vshll.u32 %v10572_v32, 16  ;;  %2741 = vmatpush1.bf16.msra.mxu1 %v9482_v52  ;;  %v2048_v48 = vshrl.u32 %v10572_v32, 16 }
 0x248   : > { %v1736_v0 = vadd.f32 %v10375_v31, %v1556_v62  ;;  %v1558_v4 = vpop.f32.mrb[38].mxu0  ;;  %v2044_v12 = vshll.u32 %v10576_v59, 16  ;;  %3224 = vmatprep.subr.bf16.mxu1 %v9487_v56  ;;  %v2056_v40 = vshrl.u32 %v10576_v59, 16 }
 0x249   : > { %v1737_v26 = vadd.f32 %v10372_v30, %v1558_v4  ;;  %v1560_v34 = vpop.f32.mrb[39].mxu0  ;;  %v2038_v8 = vrot.slane %v2036_v42, 1  ;;  %v1799_v15 = vmax.f32 %v1735_v61, 0.0 }
 0x24a   : > { %v1738_v38 = vadd.f32 %v10375_v31, %v1560_v34  ;;  %v2046_v10 = vrot.slane %v2044_v12, 1  ;;  %v1800_v18 = vmax.f32 %v1736_v0, 0.0 }
 0x24b   : > { %v1801_v43 = vmax.f32 %v1737_v26, 0.0  ;;  %v2039_v44 = vsel %vm661_vm1, %v2034_v16, %v2038_v8  ;;  %v2050_v60 = vor.u32 %v2048_v48, %v2038_v8 }
 0x24c   : > { %v1802_v19 = vmax.f32 %v1738_v38, 0.0  ;;  %v2047_v20 = vsel %vm661_vm1, %v2042_v41, %v2046_v10  ;;  %v2058_v54 = vor.u32 %v2056_v40, %v2046_v10 }
 0x24d   : > { %v10587_v21 = vpack.c.bf16 %v1801_v43, %v1799_v15  ;;  %8245 = vmatprep.mubr.msk.bf16.mxu1 %vm2312_vm4, %v2047_v20 }
 0x24e   : > { %v10591_v22 = vpack.c.bf16 %v1802_v19, %v1800_v18  ;;  %v1564_v23 = vpop.f32.mrb[40].mxu0  ;;  %2464 = vmatmul.mubr.bf16.gmra.mrb[28].mxu1 %v2039_v44 }
 0x24f   : > { %v1739_v25 = vadd.f32 %v10372_v30, %v1564_v23  ;;  %v1566_v33 = vpop.f32.mrb[41].mxu0  ;;  %v2052_v36 = vshll.u32 %v10587_v21, 16  ;;  %v2064_v16 = vshrl.u32 %v10587_v21, 16 }
 0x250   : > { %v1740_v37 = vadd.f32 %v10375_v31, %v1566_v33  ;;  %v1568_v39 = vpop.f32.mrb[42].mxu0  ;;  %v2060_v14 = vshll.u32 %v10591_v22, 16  ;;  %v2072_v41 = vshrl.u32 %v10591_v22, 16 }
 0x251   : > { %v1741_v46 = vadd.f32 %v10372_v30, %v1568_v39  ;;  %v1570_v47 = vpop.f32.mrb[43].mxu0  ;;  %v2054_v52 = vrot.slane %v2052_v36, 1  ;;  %v1803_v56 = vmax.f32 %v1739_v25, 0.0 }
 0x252   : > { %v1742_v53 = vadd.f32 %v10375_v31, %v1570_v47  ;;  %v2062_v55 = vrot.slane %v2060_v14, 1  ;;  %v1804_v61 = vmax.f32 %v1740_v37, 0.0 }
 0x253   : > { %v1805_v57 = vmax.f32 %v1741_v46, 0.0  ;;  %v2055_v4 = vsel %vm661_vm1, %v2050_v60, %v2054_v52  ;;  %v2066_v33 = vor.u32 %v2064_v16, %v2054_v52 }
 0x254   : > { %v1806_v62 = vmax.f32 %v1742_v53, 0.0  ;;  %v2063_v42 = vsel %vm661_vm1, %v2058_v54, %v2062_v55  ;;  %v2074_v20 = vor.u32 %v2072_v41, %v2062_v55 }
 0x255   : > { %v10602_v0 = vpack.c.bf16 %v1805_v57, %v1803_v56  ;;  %8246 = vmatprep.mubr.msk.bf16.mxu1 %vm2312_vm4, %v2063_v42 }
 0x256   : > { %v10606_v3 = vpack.c.bf16 %v1806_v62, %v1804_v61  ;;  %v1574_v12 = vpop.f32.mrb[44].mxu0  ;;  %2474 = vmatmul.mubr.bf16.gmra.mrb[32].mxu1 %v2055_v4 }
 0x257   : > { %v1743_v26 = vadd.f32 %v10372_v30, %v1574_v12  ;;  %v1576_v34 = vpop.f32.mrb[45].mxu0  ;;  %v2068_v7 = vshll.u32 %v10602_v0, 16  ;;  %v2080_v62 = vshrl.u32 %v10602_v0, 16 }
 0x258   : > { %v1744_v8 = vadd.f32 %v10375_v31, %v1576_v34  ;;  %v1578_v38 = vpop.f32.mrb[46].mxu0  ;;  %v2076_v10 = vshll.u32 %v10606_v3, 16  ;;  %v2088_v56 = vshrl.u32 %v10606_v3, 16 }
 0x259   : > { %v1745_v15 = vadd.f32 %v10372_v30, %v1578_v38  ;;  %v1580_v43 = vpop.f32.mrb[47].mxu0  ;;  %v2070_v18 = vrot.slane %v2068_v7, 1  ;;  %v1807_v23 = vmax.f32 %v1743_v26, 0.0 }
 0x25a   : > { %v1746_v19 = vadd.f32 %v10375_v31, %v1580_v43  ;;  %v2078_v44 = vrot.slane %v2076_v10, 1  ;;  %v1808_v36 = vmax.f32 %v1744_v8, 0.0 }
 0x25b   : > { %v1809_v25 = vmax.f32 %v1745_v15, 0.0  ;;  %v2071_v14 = vsel %vm661_vm1, %v2066_v33, %v2070_v18  ;;  %v2082_v8 = vor.u32 %v2080_v62, %v2070_v18 }
 0x25c   : > { %v1810_v37 = vmax.f32 %v1746_v19, 0.0  ;;  %v2079_v39 = vsel %vm661_vm1, %v2074_v20, %v2078_v44  ;;  %v2090_v12 = vor.u32 %v2088_v56, %v2078_v44 }
 0x25d   : > { %v10617_v40 = vpack.c.bf16 %v1809_v25, %v1807_v23  ;;  %8247 = vmatprep.mubr.msk.bf16.mxu1 %vm2312_vm4, %v2079_v39 }
 0x25e   : > { %v10621_v46 = vpack.c.bf16 %v1810_v37, %v1808_v36  ;;  %v1584_v47 = vpop.f32.mrb[48].mxu0  ;;  %2484 = vmatmul.mubr.bf16.gmra.mrb[36].mxu1 %v2071_v14 }
 0x25f   : > { %v1747_v48 = vadd.f32 %v10372_v30, %v1584_v47  ;;  %v1586_v53 = vpop.f32.mrb[49].mxu0  ;;  %v2084_v54 = vshll.u32 %v10617_v40, 16  ;;  %v2096_v14 = vshrl.u32 %v10617_v40, 16 }
 0x260   : > { %v1748_v52 = vadd.f32 %v10375_v31, %v1586_v53  ;;  %v1588_v55 = vpop.f32.mrb[50].mxu0  ;;  %v2092_v57 = vshll.u32 %v10621_v46, 16  ;;  %v2104_v33 = vshrl.u32 %v10621_v46, 16 }
 0x261   : > { %v1749_v60 = vadd.f32 %v10372_v30, %v1588_v55  ;;  %v1590_v61 = vpop.f32.mrb[51].mxu0  ;;  %v2086_v42 = vrot.slane %v2084_v54, 1  ;;  %v1811_v34 = vmax.f32 %v1747_v48, 0.0 }
 0x262   : > { %v1750_v4 = vadd.f32 %v10375_v31, %v1590_v61  ;;  %v2094_v26 = vrot.slane %v2092_v57, 1  ;;  %v1812_v38 = vmax.f32 %v1748_v52, 0.0 }
 0x263   : > { %v1813_v7 = vmax.f32 %v1749_v60, 0.0  ;;  %v2087_v43 = vsel %vm661_vm1, %v2082_v8, %v2086_v42  ;;  %v2098_v56 = vor.u32 %v2096_v14, %v2086_v42 }
 0x264   : > { %v1814_v41 = vmax.f32 %v1750_v4, 0.0  ;;  %v2095_v10 = vsel %vm661_vm1, %v2090_v12, %v2094_v26  ;;  %v2106_v53 = vor.u32 %v2104_v33, %v2094_v26 }
 0x265   : > { %v10632_v15 = vpack.c.bf16 %v1813_v7, %v1811_v34  ;;  %8248 = vmatprep.mubr.msk.bf16.mxu1 %vm2312_vm4, %v2095_v10 }
 0x266   : > { %v10636_v16 = vpack.c.bf16 %v1814_v41, %v1812_v38  ;;  %v1594_v19 = vpop.f32.mrb[52].mxu0  ;;  %2494 = vmatmul.mubr.bf16.gmra.mrb[40].mxu1 %v2087_v43 }
 0x267   : > { %v1751_v20 = vadd.f32 %v10372_v30, %v1594_v19  ;;  %v1596_v44 = vpop.f32.mrb[53].mxu0  ;;  %v2100_v23 = vshll.u32 %v10632_v15, 16 }
 0x268   : > { %v1752_v18 = vadd.f32 %v10375_v31, %v1596_v44  ;;  %v1598_v25 = vpop.f32.mrb[54].mxu0  ;;  %v2108_v36 = vshll.u32 %v10636_v16, 16  ;;  %v2120_v41 = vshrl.u32 %v10636_v16, 16 }
 0x269   : > { %v1753_v37 = vadd.f32 %v10372_v30, %v1598_v25  ;;  %v1600_v39 = vpop.f32.mrb[55].mxu0  ;;  %v2102_v47 = vrot.slane %v2100_v23, 1  ;;  %v1815_v52 = vmax.f32 %v1751_v20, 0.0  ;;  %v2112_v20 = vshrl.u32 %v10632_v15, 16 }
 0x26a   : > { %v1754_v48 = vadd.f32 %v10375_v31, %v1600_v39  ;;  %v2110_v54 = vrot.slane %v2108_v36, 1  ;;  %v1816_v57 = vmax.f32 %v1752_v18, 0.0 }
 0x26b   : > { %v1817_v55 = vmax.f32 %v1753_v37, 0.0  ;;  %v2103_v4 = vsel %vm661_vm1, %v2098_v56, %v2102_v47  ;;  %v2114_v37 = vor.u32 %v2112_v20, %v2102_v47 }
 0x26c   : > { %v1818_v60 = vmax.f32 %v1754_v48, 0.0  ;;  %v2111_v61 = vsel %vm661_vm1, %v2106_v53, %v2110_v54  ;;  %v2122_v18 = vor.u32 %v2120_v41, %v2110_v54 }
 0x26d   : > { %v10647_v62 = vpack.c.bf16 %v1817_v55, %v1815_v52  ;;  %8249 = vmatprep.mubr.msk.bf16.mxu1 %vm2312_vm4, %v2111_v61 }
 0x26e   : > { %v10651_v12 = vpack.c.bf16 %v1818_v60, %v1816_v57  ;;  %v1604_v34 = vpop.f32.mrb[56].mxu0  ;;  %2504 = vmatmul.mubr.bf16.gmra.mrb[44].mxu1 %v2103_v4 }
 0x26f   : > { %v1755_v26 = vadd.f32 %v10372_v30, %v1604_v34  ;;  %v1606_v7 = vpop.f32.mrb[57].mxu0  ;;  %v2116_v8 = vshll.u32 %v10647_v62, 16 }
 0x270   : > { %v1756_v42 = vadd.f32 %v10375_v31, %v1606_v7  ;;  %v1608_v38 = vpop.f32.mrb[58].mxu0  ;;  %v2124_v10 = vshll.u32 %v10651_v12, 16  ;;  %v2136_v4 = vshrl.u32 %v10651_v12, 16 }
 0x271   : > { %v1757_v43 = vadd.f32 %v10372_v30, %v1608_v38  ;;  %v1610_v19 = vpop.f32.mrb[59].mxu0  ;;  %v2118_v44 = vrot.slane %v2116_v8, 1  ;;  %v1819_v33 = vmax.f32 %v1755_v26, 0.0  ;;  %v2128_v8 = vshrl.u32 %v10647_v62, 16 }
 0x272   : > { %v1758_v23 = vadd.f32 %v10375_v31, %v1610_v19  ;;  %v2126_v25 = vrot.slane %v2124_v10, 1  ;;  %v1820_v39 = vmax.f32 %v1756_v42, 0.0 }
 0x273   : > { %v1821_v36 = vmax.f32 %v1757_v43, 0.0  ;;  %v2119_v52 = vsel %vm661_vm1, %v2114_v37, %v2118_v44  ;;  %v2130_v20 = vor.u32 %v2128_v8, %v2118_v44  ;;  %v9493_v8 = vld [vmem:[%s12549_s25 + $0x1c4] ss:$8 sps:$4 sm:$0xff]  }
 0x274   : > { %v1822_v14 = vmax.f32 %v1758_v23, 0.0  ;;  %v2127_v48 = vsel %vm661_vm1, %v2122_v18, %v2126_v25  ;;  %v2138_v41 = vor.u32 %v2136_v4, %v2126_v25 }
 0x275   : > { %v10662_v53 = vpack.c.bf16 %v1821_v36, %v1819_v33  ;;  %8250 = vmatprep.mubr.msk.bf16.mxu1 %vm2312_vm4, %v2127_v48 }
 0x276   : > { %v10666_v55 = vpack.c.bf16 %v1822_v14, %v1820_v39  ;;  %v1614_v56 = vpop.f32.mrb[60].mxu0  ;;  %2514 = vmatmul.mubr.bf16.gmra.mrb[48].mxu1 %v2119_v52 }
 0x277   : > { %v1759_v54 = vadd.f32 %v10372_v30, %v1614_v56  ;;  %v1616_v57 = vpop.f32.mrb[61].mxu0  ;;  %v2132_v60 = vshll.u32 %v10662_v53, 16  ;;  %v2144_v44 = vshrl.u32 %v10662_v53, 16 }
 0x278   : > { %v1760_v47 = vadd.f32 %v10375_v31, %v1616_v57  ;;  %v1618_v61 = vpop.f32.mrb[62].mxu0  ;;  %v2140_v34 = vshll.u32 %v10666_v55, 16  ;;  %v2152_v25 = vshrl.u32 %v10666_v55, 16 }
 0x279   : > { %v1761_v26 = vadd.f32 %v10372_v30, %v1618_v61  ;;  %v1620_v7 = vpop.f32.mrb[63].mxu0  ;;  %v2134_v42 = vrot.slane %v2132_v60, 1  ;;  %v1823_v43 = vmax.f32 %v1759_v54, 0.0 }
 0x27a   : > { %v1762_v38 = vadd.f32 %v10375_v31, %v1620_v7  ;;  %v2142_v10 = vrot.slane %v2140_v34, 1  ;;  %v1824_v23 = vmax.f32 %v1760_v47, 0.0  ;;  %v9485_v34 = vld [vmem:[%s12549_s25 + $0x1a0] ss:$8 sps:$4 sm:$0xff]   ;;  %v9488_v7 = vld [vmem:[%s12549_s25 + $0x1b0] ss:$8 sps:$4 sm:$0xff]  }
 0x27b   : > { %v1825_v19 = vmax.f32 %v1761_v26, 0.0  ;;  %v2135_v30 = vsel %vm661_vm1, %v2130_v20, %v2134_v42  ;;  %v2146_v54 = vor.u32 %v2144_v44, %v2134_v42  ;;  %v9490_v26 = vld [vmem:[%s12549_s25 + $0x1b4] ss:$8 sps:$4 sm:$0xff]   ;;  %v9491_v42 = vld [vmem:[%s12549_s25 + $0x1c0] ss:$8 sps:$4 sm:$0xff]  }
 0x27c   : > { %v1826_v18 = vmax.f32 %v1762_v38, 0.0  ;;  %v2143_v33 = vsel %vm661_vm1, %v2138_v41, %v2142_v10  ;;  %v2154_v48 = vor.u32 %v2152_v25, %v2142_v10  ;;  %v9496_v38 = vld [vmem:[%s12549_s25 + $0x1d4] ss:$8 sps:$4 sm:$0xff]   ;;  %v9494_v41 = vld [vmem:[%s12549_s25 + $0x1d0] ss:$8 sps:$4 sm:$0xff]  }
 0x27d   : > { %v10677_v36 = vpack.c.bf16 %v1825_v19, %v1823_v43  ;;  %8251 = vmatprep.mubr.msk.bf16.mxu1 %vm2312_vm4, %v2143_v33  ;;  %v9499_v10 = vld [vmem:[%s12549_s25 + $0x1e4] ss:$8 sps:$4 sm:$0xff]   ;;  %v9497_v43 = vld [vmem:[%s12549_s25 + $0x1e0] ss:$8 sps:$4 sm:$0xff]   ;;  %v9502_v19 = vld [vmem:[%s12549_s25 + $0x1f4] ss:$8 sps:$4 sm:$0xff]  }
 0x27e   : > { %v10681_v37 = vpack.c.bf16 %v1826_v18, %v1824_v23  ;;  %2524 = vmatmul.mubr.bf16.gmra.mrb[52].mxu1 %v2135_v30  ;;  %v9500_v20 = vld [vmem:[%s12549_s25 + $0x1f0] ss:$8 sps:$4 sm:$0xff]   ;;  %v9505_v23 = vld [vmem:[%s12549_s25 + $0x204] ss:$8 sps:$4 sm:$0xff]   ;;  %v9503_v18 = vld [vmem:[%s12549_s25 + $0x200] ss:$8 sps:$4 sm:$0xff]  }
 0x27f   : > { %v2148_v31 = vshll.u32 %v10677_v36, 16  ;;  %v2160_v61 = vshrl.u32 %v10677_v36, 16  ;;  %v9508_v33 = vld [vmem:[%s12549_s25 + $0x214] ss:$8 sps:$4 sm:$0xff]   ;;  %v9506_v30 = vld [vmem:[%s12549_s25 + $0x210] ss:$8 sps:$4 sm:$0xff]  }
 0x280   : > { %v2156_v39 = vshll.u32 %v10681_v37, 16  ;;  %v2163_v56 = vshrl.u32 %v10681_v37, 16  ;;  %v9509_v25 = vld [vmem:[%s12549_s25 + $0x220] ss:$8 sps:$4 sm:$0xff]   ;;  %v9512_v44 = vld [vmem:[%s12549_s25 + $0x230] ss:$8 sps:$4 sm:$0xff]  }
 0x281   : > { %v2150_v14 = vrot.slane %v2148_v31, 1  ;;  %v9511_v31 = vld [vmem:[%s12549_s25 + $0x224] ss:$8 sps:$4 sm:$0xff]  }
 0x282   : > { %v2158_v52 = vrot.slane %v2156_v39, 1  ;;  %v9514_v39 = vld [vmem:[%s12549_s25 + $0x234] ss:$8 sps:$4 sm:$0xff]  }
 0x283   : > { %v2151_v47 = vsel %vm661_vm1, %v2146_v54, %v2150_v14  ;;  %v2162_v4 = vor.u32 %v2160_v61, %v2150_v14  ;;  %v9517_v14 = vld [vmem:[%s12549_s25 + $0x244] ss:$8 sps:$4 sm:$0xff]   ;;  %v9527_v61 = vld [vmem:[%s12551_s5 + $0x10] ss:$8 sps:$4 sm:$0xff]  }
 0x284   : > { %v2159_v57 = vsel %vm661_vm1, %v2154_v48, %v2158_v52  ;;  %v2165_v60 = vor.u32 %v2163_v56, %v2158_v52  ;;  %v9515_v48 = vld [vmem:[%s12549_s25 + $0x240] ss:$8 sps:$4 sm:$0xff]   ;;  %v9520_v52 = vld [vmem:[%s12549_s25 + $0x254] ss:$8 sps:$4 sm:$0xff]   ;;  %v9518_v56 = vld [vmem:[%s12549_s25 + $0x250] ss:$8 sps:$4 sm:$0xff]  }
 0x285   : > { %8252 = vmatprep.mubr.msk.bf16.mxu1 %vm2312_vm4, %v2159_v57  ;;  %v9523_v54 = vld [vmem:[%s12549_s25 + $0x264] ss:$8 sps:$4 sm:$0xff]   ;;  %v9521_v57 = vld [vmem:[%s12549_s25 + $0x260] ss:$8 sps:$4 sm:$0xff]  }
 0x286   : > { %2534 = vmatmul.mubr.bf16.gmra.mrb[56].mxu1 %v2151_v47  ;;  %v9526_v47 = vld [vmem:[%s12551_s5 + $0x4] ss:$8 sps:$4 sm:$0xff]  }
 0x287   : > { %8253 = vmatprep.mubr.msk.bf16.mxu1 %vm2312_vm4, %v2165_v60  ;;  %v9524_v60 = vld [vmem:[%s12551_s5] ss:$8 sps:$4 sm:$0xff]   ;;  %3846 = vmatprep.subr.bf16.mxu0 %v9526_v47  ;;  %v2988_v47 = vrot.slane %v10495_v6, 1 }
 0x288   : > { %3847 = vmatpush1.bf16.msra.mxu0 %v9524_v60  ;;  %v9554_v60 = vld [vmem:[%s12551_s5 + $0xa0] ss:$8 sps:$4 sm:$0xff]  }
 0x28e   : > { %2544 = vmatmul.mubr.bf16.gmra.mrb[60].mxu1 %v2162_v4  ;;  %v9529_v4 = vld [vmem:[%s12551_s5 + $0x14] ss:$8 sps:$4 sm:$0xff]  }
 0x28f   : > { %8280 = vmatprep.mubr.msk.bf16.mxu1 %vm2312_vm4, %v10383_v17  ;;  %3848 = vmatprep.subr.bf16.mxu0 %v9529_v4 }
 0x290   : > { %3849 = vmatpush1.bf16.msra.mxu0 %v9527_v61 }
 0x296   : > { %2749 = vmatmul.mubr.bf16.vlgmr.msra.gmra.mrb[0].mxu1 %v10381_v49 }
 0x297   : > { %3225 = vmatpush1.bf16.msra.mxu1 %v9485_v34  ;;  %8281 = vmatprep.mubr.msk.bf16.mxu1 %vm2312_vm4, %v10393_v1  ;;  %v9530_v34 = vld [vmem:[%s12551_s5 + $0x20] ss:$8 sps:$4 sm:$0xff]  }
 0x298   : > { %3226 = vmatprep.subr.bf16.mxu1 %v9490_v26  ;;  %v9532_v26 = vld [vmem:[%s12551_s5 + $0x24] ss:$8 sps:$4 sm:$0xff]  }
 0x299   : > { %3850 = vmatprep.subr.bf16.mxu0 %v9532_v26 }
 0x29a   : > { %3851 = vmatpush1.bf16.msra.mxu0 %v9530_v34  ;;  %v2986_v34 = vrot.slane %v10491_v5, 1 }
 0x29b   : > { %3227 = vmatpush1.bf16.msra.mxu1 %v9488_v7  ;;  %v2972_v7 = vrot.slane %v10393_v1, 1  ;;  %v9538_v1 = vld [vmem:[%s12551_s5 + $0x44] ss:$8 sps:$4 sm:$0xff]  }
 0x29c   : > { %3228 = vmatprep.subr.bf16.mxu1 %v9493_v8  ;;  %v2971_v8 = vrot.slane %v10383_v17, 1  ;;  %v2969_v17 = vrot.slane %v10391_v50, 1 }
 0x29e   : > { %2759 = vmatmul.mubr.bf16.gmra.mrb[4].mxu1 %v10391_v50  ;;  %v9539_v50 = vld [vmem:[%s12551_s5 + $0x50] ss:$8 sps:$4 sm:$0xff]  }
 0x29f   : > { %8282 = vmatprep.mubr.msk.bf16.mxu1 %vm2312_vm4, %v10414_v27  ;;  %3229 = vmatpush1.bf16.msra.mxu1 %v9491_v42  ;;  %v2973_v42 = vsel %vm1326_vm3, %v2971_v8, %v2972_v7  ;;  %v2996_v8 = vrot.slane %v10549_v13, 1 }
 0x2a0   : > { %3230 = vmatprep.subr.bf16.mxu1 %v9496_v38  ;;  %v9533_v38 = vld [vmem:[%s12551_s5 + $0x30] ss:$8 sps:$4 sm:$0xff]  }
 0x2a3   : > { %3231 = vmatpush1.bf16.msra.mxu1 %v9494_v41  ;;  %v9535_v41 = vld [vmem:[%s12551_s5 + $0x34] ss:$8 sps:$4 sm:$0xff]  }
 0x2a4   : > { %3232 = vmatprep.subr.bf16.mxu1 %v9499_v10  ;;  %3852 = vmatprep.subr.bf16.mxu0 %v9535_v41  ;;  %v9536_v10 = vld [vmem:[%s12551_s5 + $0x40] ss:$8 sps:$4 sm:$0xff]  }
 0x2a5   : > { %3853 = vmatpush1.bf16.msra.mxu0 %v9533_v38 }
 0x2a6   : > { %2769 = vmatmul.mubr.bf16.gmra.mrb[8].mxu1 %v10410_v24  ;;  %3854 = vmatprep.subr.bf16.mxu0 %v9538_v1 }
 0x2a7   : > { %8283 = vmatprep.mubr.msk.bf16.mxu1 %vm2312_vm4, %v10441_v58  ;;  %3233 = vmatpush1.bf16.msra.mxu1 %v9497_v43  ;;  %v2976_v43 = vrot.slane %v10414_v27, 1  ;;  %v9544_v27 = vld [vmem:[%s12551_s5 + $0x64] ss:$8 sps:$4 sm:$0xff]  }
 0x2a8   : > { %3234 = vmatprep.subr.bf16.mxu1 %v9502_v19  ;;  %v9541_v19 = vld [vmem:[%s12551_s5 + $0x54] ss:$8 sps:$4 sm:$0xff]  }
 0x2a9   : > { %3855 = vmatpush1.bf16.msra.mxu0 %v9536_v10 }
 0x2aa   : > { %3856 = vmatprep.subr.bf16.mxu0 %v9541_v19 }
 0x2ab   : > { %3235 = vmatpush1.bf16.msra.mxu1 %v9500_v20  ;;  %v2968_v20 = vrot.slane %v10381_v49, 1  ;;  %v9542_v49 = vld [vmem:[%s12551_s5 + $0x60] ss:$8 sps:$4 sm:$0xff]  }
 0x2ac   : > { %3236 = vmatprep.subr.bf16.mxu1 %v9505_v23 }
 0x2ad   : > { %v2970_v23 = vsel %vm1326_vm3, %v2968_v20, %v2969_v17  ;;  %3857 = vmatpush1.bf16.msra.mxu0 %v9539_v50 }
 0x2ae   : > { %2779 = vmatmul.mubr.bf16.gmra.mrb[12].mxu1 %v10437_v63  ;;  %3858 = vmatprep.subr.bf16.mxu0 %v9544_v27  ;;  %v9557_v27 = vld [vmem:[%s12551_s5 + $0xb0] ss:$8 sps:$4 sm:$0xff]  }
 0x2af   : > { %8284 = vmatprep.mubr.msk.bf16.mxu1 %vm2312_vm4, %v10468_v35  ;;  %3237 = vmatpush1.bf16.msra.mxu1 %v9503_v18  ;;  %v2977_v18 = vsel %vm1326_vm3, %v2972_v7, %v2976_v43 }
 0x2b0   : > { %3238 = vmatprep.subr.bf16.mxu1 %v9508_v33  ;;  %v2974_v33 = vrot.slane %v10410_v24, 1 }
 0x2b1   : > { %3859 = vmatpush1.bf16.msra.mxu0 %v9542_v49 }
 0x2b3   : > { %3239 = vmatpush1.bf16.msra.mxu1 %v9506_v30  ;;  %v2980_v30 = vrot.slane %v10441_v58, 1  ;;  %v9550_v58 = vld [vmem:[%s12551_s5 + $0x84] ss:$8 sps:$4 sm:$0xff]  }
 0x2b4   : > { %3240 = vmatprep.subr.bf16.mxu1 %v9511_v31  ;;  %v9547_v31 = vld [vmem:[%s12551_s5 + $0x74] ss:$8 sps:$4 sm:$0xff]  }
 0x2b5   : > { %v2981_v24 = vsel %vm1326_vm3, %v2976_v43, %v2980_v30  ;;  %3860 = vmatprep.subr.bf16.mxu0 %v9547_v31  ;;  %v3022_v31 = vrot.slane %v10662_v53, 1 }
 0x2b6   : > { %2789 = vmatmul.mubr.bf16.gmra.mrb[16].mxu1 %v10464_v51 }
 0x2b7   : > { %8285 = vmatprep.mubr.msk.bf16.mxu1 %vm2312_vm4, %v10495_v6  ;;  %3241 = vmatpush1.bf16.msra.mxu1 %v9509_v25  ;;  %v2975_v25 = vsel %vm1326_vm3, %v2969_v17, %v2974_v33  ;;  %v2990_v6 = vrot.slane %v10518_v11, 1 }
 0x2b8   : > { %3242 = vmatprep.subr.bf16.mxu1 %v9514_v39  ;;  %v9545_v39 = vld [vmem:[%s12551_s5 + $0x70] ss:$8 sps:$4 sm:$0xff]  }
 0x2b9   : > { %3861 = vmatpush1.bf16.msra.mxu0 %v9545_v39 }
 0x2ba   : > { %3862 = vmatprep.subr.bf16.mxu0 %v9550_v58 }
 0x2bb   : > { %3243 = vmatpush1.bf16.msra.mxu1 %v9512_v44  ;;  %v2978_v44 = vrot.slane %v10437_v63, 1 }
 0x2bc   : > { %3244 = vmatprep.subr.bf16.mxu1 %v9517_v14  ;;  %v9548_v14 = vld [vmem:[%s12551_s5 + $0x80] ss:$8 sps:$4 sm:$0xff]  }
 0x2bd   : > { %3863 = vmatpush1.bf16.msra.mxu0 %v9548_v14 }
 0x2be   : > { %2799 = vmatmul.mubr.bf16.gmra.mrb[20].mxu1 %v10491_v5  ;;  %v2994_v5 = vrot.slane %v10545_v9, 1 }
 0x2bf   : > { %8286 = vmatprep.mubr.msk.bf16.mxu1 %vm2312_vm4, %v10522_v45  ;;  %3245 = vmatpush1.bf16.msra.mxu1 %v9515_v48  ;;  %v2984_v48 = vrot.slane %v10468_v35, 1  ;;  %v9556_v35 = vld [vmem:[%s12551_s5 + $0xa4] ss:$8 sps:$4 sm:$0xff]  }
 0x2c0   : > { %3246 = vmatprep.subr.bf16.mxu1 %v9520_v52  ;;  %v9553_v52 = vld [vmem:[%s12551_s5 + $0x94] ss:$8 sps:$4 sm:$0xff]   ;;  %v2995_v41 = vsel %vm1326_vm3, %v2990_v6, %v2994_v5 }
 0x2c1   : > { %v2985_v63 = vsel %vm1326_vm3, %v2980_v30, %v2984_v48  ;;  %3864 = vmatprep.subr.bf16.mxu0 %v9553_v52  ;;  %v2989_v4 = vsel %vm1326_vm3, %v2984_v48, %v2988_v47 }
 0x2c3   : > { %3247 = vmatpush1.bf16.msra.mxu1 %v9518_v56  ;;  %v2979_v56 = vsel %vm1326_vm3, %v2974_v33, %v2978_v44 }
 0x2c4   : > { %3248 = vmatprep.subr.bf16.mxu1 %v9523_v54  ;;  %v9551_v54 = vld [vmem:[%s12551_s5 + $0x90] ss:$8 sps:$4 sm:$0xff]  }
 0x2c5   : > { %3865 = vmatpush1.bf16.msra.mxu0 %v9551_v54 }
 0x2c6   : > { %2809 = vmatmul.mubr.bf16.gmra.mrb[24].mxu1 %v10518_v11  ;;  %3866 = vmatprep.subr.bf16.mxu0 %v9556_v35  ;;  %v2998_v11 = vrot.slane %v10572_v32, 1 }
 0x2c7   : > { %8287 = vmatprep.mubr.msk.bf16.mxu1 %vm2312_vm4, %v10549_v13  ;;  %3249 = vmatpush1.bf16.msra.mxu1 %v9521_v57  ;;  %v2982_v57 = vrot.slane %v10464_v51, 1  ;;  %v2992_v51 = vrot.slane %v10522_v45, 1  ;;  %v3000_v45 = vrot.slane %v10576_v59, 1  ;;  %v3004_v13 = vrot.slane %v10591_v22, 1 }
 0x2c8   : > { %v2999_v17 = vsel %vm1326_vm3, %v2994_v5, %v2998_v11 }
 0x2c9   : > { %v2983_v61 = vsel %vm1326_vm3, %v2978_v44, %v2982_v57  ;;  %3867 = vmatpush1.bf16.msra.mxu0 %v9554_v60  ;;  %v2987_v26 = vsel %vm1326_vm3, %v2982_v57, %v2986_v34  ;;  %v2993_v7 = vsel %vm1326_vm3, %v2988_v47, %v2992_v51  ;;  %v2997_v38 = vsel %vm1326_vm3, %v2992_v51, %v2996_v8 }
 0x2ca   : > { %v3001_v1 = vsel %vm1326_vm3, %v2996_v8, %v3000_v45  ;;  %v3005_v10 = vsel %vm1326_vm3, %v3000_v45, %v3004_v13 }
 0x2ce   : > { %2819 = vmatmul.mubr.bf16.gmra.mrb[28].mxu1 %v10545_v9  ;;  %v3002_v9 = vrot.slane %v10587_v21, 1 }
 0x2cf   : > { %8288 = vmatprep.mubr.msk.bf16.mxu1 %vm2312_vm4, %v10576_v59  ;;  %v3008_v59 = vrot.slane %v10606_v3, 1 }
 0x2d0   : > { %v3003_v43 = vsel %vm1326_vm3, %v2998_v11, %v3002_v9 }
 0x2d1   : > { %v3009_v19 = vsel %vm1326_vm3, %v3004_v13, %v3008_v59 }
 0x2d6   : > { %2829 = vmatmul.mubr.bf16.gmra.mrb[32].mxu1 %v10572_v32  ;;  %v3006_v32 = vrot.slane %v10602_v0, 1 }
 0x2d7   : > { %8289 = vmatprep.mubr.msk.bf16.mxu1 %vm2312_vm4, %v10591_v22  ;;  %v3012_v22 = vrot.slane %v10621_v46, 1 }
 0x2d8   : > { %v3007_v20 = vsel %vm1326_vm3, %v3002_v9, %v3006_v32 }
 0x2de   : > { %2839 = vmatmul.mubr.bf16.gmra.mrb[36].mxu1 %v10587_v21  ;;  %v3010_v21 = vrot.slane %v10617_v40, 1 }
 0x2df   : > { %8290 = vmatprep.mubr.msk.bf16.mxu1 %vm2312_vm4, %v10606_v3  ;;  %v3016_v3 = vrot.slane %v10636_v16, 1 }
 0x2e0   : > { %v3011_v50 = vsel %vm1326_vm3, %v3006_v32, %v3010_v21 }
 0x2e6   : > { %2849 = vmatmul.mubr.bf16.gmra.mrb[40].mxu1 %v10602_v0  ;;  %v3014_v0 = vrot.slane %v10632_v15, 1 }
 0x2e7   : > { %8291 = vmatprep.mubr.msk.bf16.mxu1 %vm2312_vm4, %v10621_v46  ;;  %v3020_v46 = vrot.slane %v10651_v12, 1 }
 0x2e9   : > { %v3021_v33 = vsel %vm1326_vm3, %v3016_v3, %v3020_v46 }
 0x2ee   : > { %2859 = vmatmul.mubr.bf16.gmra.mrb[44].mxu1 %v10617_v40  ;;  %v9559_v40 = vld [vmem:[%s12551_s5 + $0xb4] ss:$8 sps:$4 sm:$0xff]  }
 0x2ef   : > { %8292 = vmatprep.mubr.msk.bf16.mxu1 %vm2312_vm4, %v10636_v16  ;;  %v3015_v16 = vsel %vm1326_vm3, %v3010_v21, %v3014_v0  ;;  %3868 = vmatprep.subr.bf16.mxu0 %v9559_v40 }
 0x2f0   : > { %3869 = vmatpush1.bf16.msra.mxu0 %v9557_v27 }
 0x2f1   : > { %6223 = vmatprep.subr.bf16.mxu0 %v9828_v2 }
 0x2f6   : > { %2869 = vmatmul.mubr.bf16.gmra.mrb[48].mxu1 %v10632_v15  ;;  %v3018_v15 = vrot.slane %v10647_v62, 1 }
 0x2f7   : > { %8293 = vmatprep.mubr.msk.bf16.mxu1 %vm2312_vm4, %v10651_v12  ;;  %v3024_v12 = vrot.slane %v10666_v55, 1 }
 0x2f8   : > { %v3019_v49 = vsel %vm1326_vm3, %v3014_v0, %v3018_v15  ;;  %v3023_v39 = vsel %vm1326_vm3, %v3018_v15, %v3022_v31 }
 0x2f9   : > { %v3025_v30 = vsel %vm1326_vm3, %v3020_v46, %v3024_v12 }
 0x2fe   : > { %2879 = vmatmul.mubr.bf16.gmra.mrb[52].mxu1 %v10647_v62  ;;  %v3026_v62 = vrot.slane %v10677_v36, 1 }
 0x2ff   : > { %8294 = vmatprep.mubr.msk.bf16.mxu1 %vm2312_vm4, %v10666_v55 }
 0x300   : > { %v3027_v55 = vsel %vm1326_vm3, %v3022_v31, %v3026_v62 }
 0x306   : > { %2889 = vmatmul.mubr.bf16.gmra.mrb[56].mxu1 %v10662_v53  ;;  %v3481_v53 = vld [vmem:[%s12552_s4] sm:$0x3]  ;;  %s8112_s4 = sshll.u32 %s594_s0, 3 }
 0x307   : > { %8295 = vmatprep.mubr.msk.bf16.mxu1 %vm2312_vm4, %v10681_v37  ;;  %v10975_v58 = vrot.slane %v3481_v53, %v10369_v29  ;;  %s596_s24 = scalar_lea.vmem [#allocation5], %s8112_s4  ;;  %s9768_s4 = sshll.u32 %s9832_s1, 4  ;;  %s9769_s4 = int_to_ptr.vmem [resolvable:$false] %s9768_s4 }
 0x308   : > { %s8049_s27 = sshll.u32 %s596_s24, 4  ;;  %s9770_s5 = scalar_lea.vmem %s9769_s4, 256  ;;  %s12465_s27 = int_to_ptr.vmem [resolvable:$true] %s8049_s27 }
 0x309   : > { %s9764_s20 = scalar_lea.vmem %s12465_s27, 128  ;;  %p9771_p0 = scmp.lt.s32.totalorder %s12465_s27, %s9769_s4 }
 0x30a   : > { %p9765_p11 = scmp.ne.s32.totalorder %s12465_s27, %s9764_s20  ;;  %p9772_p1 = scmp.lt.s32.totalorder %s9770_s5, %s9764_s20 }
 0x30c   : > { %p9766_p12 = pnand %p9765_p11, %p9971_p5  ;;  %p9773_p2 = por %p9772_p1, %p9771_p0 }
 0x30e   : > { %2899 = vmatmul.mubr.bf16.gmra.mrb[60].mxu1 %v10677_v36  ;;  %p9767_p13 = pneg %p9766_p12 }
 0x30f   : > { %8348 = vmatprep.mubr.msk.bf16.mxu1 %vm2312_vm4, %v2973_v42  ;;  %v2991_v42 = vsel %vm1326_vm3, %v2986_v34, %v2990_v6 }
 0x310   : > { %p9774_p3 = pnand %p9773_p2, %p9767_p13 }
 0x316   : > { %3257 = vmatmul.mubr.bf16.vlgmr.msra.gmra.mrb[0].mxu1 %v2970_v23  ;;  %v3013_v23 = vsel %vm1326_vm3, %v3008_v59, %v3012_v22 }
 0x317   : > { %8349 = vmatprep.mubr.msk.bf16.mxu1 %vm2312_vm4, %v2977_v18  ;;  %v3017_v18 = vsel %vm1326_vm3, %v3012_v22, %v3016_v3 }
 0x31e   : > { %3267 = vmatmul.mubr.bf16.gmra.mrb[4].mxu1 %v2975_v25  ;;  %v3028_v25 = vrot.slane %v10681_v37, 1  ;;  %v10972_v37 = vrot.slane %v3481_v53, %v10364_v28 }
 0x31f   : > { %8350 = vmatprep.mubr.msk.bf16.mxu1 %vm2312_vm4, %v2981_v24 }
 0x320   : > { %v3029_v24 = vsel %vm1326_vm3, %v3024_v12, %v3028_v25 }
 0x326   : > { %3277 = vmatmul.mubr.bf16.gmra.mrb[8].mxu1 %v2979_v56 }
 0x327   : > { %8351 = vmatprep.mubr.msk.bf16.mxu1 %vm2312_vm4, %v2985_v63 }
 0x32e   : > { %3287 = vmatmul.mubr.bf16.gmra.mrb[12].mxu1 %v2983_v61 }
 0x32f   : > { %8352 = vmatprep.mubr.msk.bf16.mxu1 %vm2312_vm4, %v2989_v4 }
 0x336   : > { %3297 = vmatmul.mubr.bf16.gmra.mrb[16].mxu1 %v2987_v26 }
 0x337   : > { %8353 = vmatprep.mubr.msk.bf16.mxu1 %vm2312_vm4, %v2993_v7 }
 0x33e   : > { %3307 = vmatmul.mubr.bf16.gmra.mrb[20].mxu1 %v2991_v42 }
 0x33f   : > { %8354 = vmatprep.mubr.msk.bf16.mxu1 %vm2312_vm4, %v2997_v38 }
 0x346   : > { %3317 = vmatmul.mubr.bf16.gmra.mrb[24].mxu1 %v2995_v41 }
 0x347   : > { %8355 = vmatprep.mubr.msk.bf16.mxu1 %vm2312_vm4, %v3001_v1 }
 0x34e   : > { %3327 = vmatmul.mubr.bf16.gmra.mrb[28].mxu1 %v2999_v17 }
 0x34f   : > { %8356 = vmatprep.mubr.msk.bf16.mxu1 %vm2312_vm4, %v3005_v10 }
 0x356   : > { %3337 = vmatmul.mubr.bf16.gmra.mrb[32].mxu1 %v3003_v43 }
 0x357   : > { %8357 = vmatprep.mubr.msk.bf16.mxu1 %vm2312_vm4, %v3009_v19 }
 0x35e   : > { %3347 = vmatmul.mubr.bf16.gmra.mrb[36].mxu1 %v3007_v20 }
 0x35f   : > { %8358 = vmatprep.mubr.msk.bf16.mxu1 %vm2312_vm4, %v3013_v23 }
 0x366   : > { %3357 = vmatmul.mubr.bf16.gmra.mrb[40].mxu1 %v3011_v50 }
 0x367   : > { %8359 = vmatprep.mubr.msk.bf16.mxu1 %vm2312_vm4, %v3017_v18 }
 0x36e   : > { %3367 = vmatmul.mubr.bf16.gmra.mrb[44].mxu1 %v3015_v16 }
 0x36f   : > { %8360 = vmatprep.mubr.msk.bf16.mxu1 %vm2312_vm4, %v3021_v33 }
 0x376   : > { %3377 = vmatmul.mubr.bf16.gmra.mrb[48].mxu1 %v3019_v49 }
 0x377   : > { %8361 = vmatprep.mubr.msk.bf16.mxu1 %vm2312_vm4, %v3025_v30 }
 0x37e   : > { %3387 = vmatmul.mubr.bf16.gmra.mrb[52].mxu1 %v3023_v39 }
 0x37f   : > { %8362 = vmatprep.mubr.msk.bf16.mxu1 %vm2312_vm4, %v3029_v24 }
 0x386   : > { %3397 = vmatmul.mubr.bf16.gmra.mrb[56].mxu1 %v3027_v55 }
 0x387   : > { %8363 = vmatprep.mubr.msk.bf16.mxu1 %vm2312_vm4, %v3028_v25 }
 0x38e   : > { %3407 = vmatmul.mubr.bf16.gmra.mrb[60].mxu1 %v3026_v62 }
 0x38f   : > { %4686 = vmatprep.mubr.bf16.mxu1 %v9828_v2 }
 0x3e9   : > { %v3258_v44 = vpop.f32.mrb[0].mxu1 }
 0x3ea   : > { %v3493_v36 = vadd.f32 %v10972_v37, %v3258_v44  ;;  %v3260_v14 = vpop.f32.mrb[1].mxu1 }
 0x3eb   : > { %v3494_v48 = vadd.f32 %v10975_v58, %v3260_v14  ;;  %v3262_v52 = vpop.f32.mrb[2].mxu1 }
 0x3ec   : > { %v3495_v56 = vadd.f32 %v10972_v37, %v3262_v52  ;;  %v3264_v54 = vpop.f32.mrb[3].mxu1  ;;  %v3557_v35 = vmax.f32 %v3493_v36, 0.0 }
 0x3ed   : > { %v3496_v63 = vadd.f32 %v10975_v58, %v3264_v54  ;;  %v3558_v60 = vmax.f32 %v3494_v48, 0.0 }
 0x3ee   : > { %v3559_v57 = vmax.f32 %v3495_v56, 0.0 }
 0x3ef   : > { %v3560_v47 = vmax.f32 %v3496_v63, 0.0 }
 0x3f0   : > { %v3621_v61 = vpack.c.bf16 %v3559_v57, %v3557_v35 }
 0x3f1   : > { %v3622_v4 = vpack.c.bf16 %v3560_v47, %v3558_v60  ;;  %v3268_v34 = vpop.f32.mrb[4].mxu1 }
 0x3f2   : > { %v3497_v51 = vadd.f32 %v10972_v37, %v3268_v34  ;;  %v3270_v26 = vpop.f32.mrb[5].mxu1 }
 0x3f3   : > { %v3498_v7 = vadd.f32 %v10975_v58, %v3270_v26  ;;  %v3272_v6 = vpop.f32.mrb[6].mxu1  ;;  %8388 = vmatprep.mubr.msk.bf16.mxu0 %vm3797_vm5, %v3622_v4 }
 0x3f4   : > { %v3499_v8 = vadd.f32 %v10972_v37, %v3272_v6  ;;  %v3274_v42 = vpop.f32.mrb[7].mxu1  ;;  %3879 = vmatmul.mubr.bf16.vlgmr.msra.gmra.mrb[64].mxu0 %v3621_v61  ;;  %v3561_v5 = vmax.f32 %v3497_v51, 0.0 }
 0x3f5   : > { %v3500_v38 = vadd.f32 %v10975_v58, %v3274_v42  ;;  %v3562_v41 = vmax.f32 %v3498_v7, 0.0 }
 0x3f6   : > { %v3563_v45 = vmax.f32 %v3499_v8, 0.0 }
 0x3f7   : > { %v3564_v1 = vmax.f32 %v3500_v38, 0.0 }
 0x3f8   : > { %v3623_v11 = vpack.c.bf16 %v3563_v45, %v3561_v5 }
 0x3f9   : > { %v3624_v13 = vpack.c.bf16 %v3564_v1, %v3562_v41  ;;  %v3278_v17 = vpop.f32.mrb[8].mxu1 }
 0x3fa   : > { %v3501_v10 = vadd.f32 %v10972_v37, %v3278_v17  ;;  %v3280_v9 = vpop.f32.mrb[9].mxu1 }
 0x3fb   : > { %v3502_v59 = vadd.f32 %v10975_v58, %v3280_v9  ;;  %v3282_v43 = vpop.f32.mrb[10].mxu1  ;;  %8389 = vmatprep.mubr.msk.bf16.mxu0 %vm3797_vm5, %v3624_v13 }
 0x3fc   : > { %v3503_v19 = vadd.f32 %v10972_v37, %v3282_v43  ;;  %v3284_v32 = vpop.f32.mrb[11].mxu1  ;;  %3889 = vmatmul.mubr.bf16.gmra.mrb[68].mxu0 %v3623_v11  ;;  %v3565_v20 = vmax.f32 %v3501_v10, 0.0 }
 0x3fd   : > { %v3504_v22 = vadd.f32 %v10975_v58, %v3284_v32  ;;  %v3566_v21 = vmax.f32 %v3502_v59, 0.0 }
 0x3fe   : > { %v3567_v23 = vmax.f32 %v3503_v19, 0.0 }
 0x3ff   : > { %v3568_v3 = vmax.f32 %v3504_v22, 0.0 }
 0x400   : > { %v3625_v50 = vpack.c.bf16 %v3567_v23, %v3565_v20 }
 0x401   : > { %v3626_v18 = vpack.c.bf16 %v3568_v3, %v3566_v21  ;;  %v3288_v0 = vpop.f32.mrb[12].mxu1 }
 0x402   : > { %v3505_v46 = vadd.f32 %v10972_v37, %v3288_v0  ;;  %v3290_v27 = vpop.f32.mrb[13].mxu1 }
 0x403   : > { %v3506_v40 = vadd.f32 %v10975_v58, %v3290_v27  ;;  %v3292_v16 = vpop.f32.mrb[14].mxu1  ;;  %8390 = vmatprep.mubr.msk.bf16.mxu0 %vm3797_vm5, %v3626_v18 }
 0x404   : > { %v3507_v33 = vadd.f32 %v10972_v37, %v3292_v16  ;;  %v3294_v15 = vpop.f32.mrb[15].mxu1  ;;  %3899 = vmatmul.mubr.bf16.gmra.mrb[72].mxu0 %v3625_v50  ;;  %v3569_v49 = vmax.f32 %v3505_v46, 0.0 }
 0x405   : > { %v3508_v12 = vadd.f32 %v10975_v58, %v3294_v15  ;;  %v3570_v31 = vmax.f32 %v3506_v40, 0.0 }
 0x406   : > { %v3571_v30 = vmax.f32 %v3507_v33, 0.0 }
 0x407   : > { %v3572_v25 = vmax.f32 %v3508_v12, 0.0 }
 0x408   : > { %v3627_v39 = vpack.c.bf16 %v3571_v30, %v3569_v49 }
 0x409   : > { %v3628_v24 = vpack.c.bf16 %v3572_v25, %v3570_v31  ;;  %v3298_v62 = vpop.f32.mrb[16].mxu1 }
 0x40a   : > { %v3509_v55 = vadd.f32 %v10972_v37, %v3298_v62  ;;  %v3300_v53 = vpop.f32.mrb[17].mxu1 }
 0x40b   : > { %v3510_v44 = vadd.f32 %v10975_v58, %v3300_v53  ;;  %v3302_v36 = vpop.f32.mrb[18].mxu1  ;;  %8391 = vmatprep.mubr.msk.bf16.mxu0 %vm3797_vm5, %v3628_v24 }
 0x40c   : > { %v3511_v14 = vadd.f32 %v10972_v37, %v3302_v36  ;;  %v3304_v48 = vpop.f32.mrb[19].mxu1  ;;  %3909 = vmatmul.mubr.bf16.gmra.mrb[76].mxu0 %v3627_v39  ;;  %v3573_v56 = vmax.f32 %v3509_v55, 0.0 }
 0x40d   : > { %v3512_v52 = vadd.f32 %v10975_v58, %v3304_v48  ;;  %v3574_v63 = vmax.f32 %v3510_v44, 0.0 }
 0x40e   : > { %v3575_v54 = vmax.f32 %v3511_v14, 0.0 }
 0x40f   : > { %v3576_v35 = vmax.f32 %v3512_v52, 0.0 }
 0x410   : > { %v3629_v57 = vpack.c.bf16 %v3575_v54, %v3573_v56 }
 0x411   : > { %v3630_v60 = vpack.c.bf16 %v3576_v35, %v3574_v63  ;;  %v3308_v47 = vpop.f32.mrb[20].mxu1 }
 0x412   : > { %v3513_v61 = vadd.f32 %v10972_v37, %v3308_v47  ;;  %v3310_v4 = vpop.f32.mrb[21].mxu1 }
 0x413   : > { %v3514_v34 = vadd.f32 %v10975_v58, %v3310_v4  ;;  %v3312_v51 = vpop.f32.mrb[22].mxu1  ;;  %8392 = vmatprep.mubr.msk.bf16.mxu0 %vm3797_vm5, %v3630_v60 }
 0x414   : > { %v3515_v26 = vadd.f32 %v10972_v37, %v3312_v51  ;;  %v3314_v7 = vpop.f32.mrb[23].mxu1  ;;  %3919 = vmatmul.mubr.bf16.gmra.mrb[80].mxu0 %v3629_v57  ;;  %v3577_v8 = vmax.f32 %v3513_v61, 0.0 }
 0x415   : > { %v3516_v6 = vadd.f32 %v10975_v58, %v3314_v7  ;;  %v3578_v38 = vmax.f32 %v3514_v34, 0.0 }
 0x416   : > { %v3579_v42 = vmax.f32 %v3515_v26, 0.0 }
 0x417   : > { %v3580_v5 = vmax.f32 %v3516_v6, 0.0 }
 0x418   : > { %v3631_v45 = vpack.c.bf16 %v3579_v42, %v3577_v8 }
 0x419   : > { %v3632_v41 = vpack.c.bf16 %v3580_v5, %v3578_v38  ;;  %v3318_v1 = vpop.f32.mrb[24].mxu1 }
 0x41a   : > { %v3517_v11 = vadd.f32 %v10972_v37, %v3318_v1  ;;  %v3320_v13 = vpop.f32.mrb[25].mxu1 }
 0x41b   : > { %v3518_v17 = vadd.f32 %v10975_v58, %v3320_v13  ;;  %v3322_v10 = vpop.f32.mrb[26].mxu1  ;;  %8393 = vmatprep.mubr.msk.bf16.mxu0 %vm3797_vm5, %v3632_v41 }
 0x41c   : > { %v3519_v9 = vadd.f32 %v10972_v37, %v3322_v10  ;;  %v3324_v59 = vpop.f32.mrb[27].mxu1  ;;  %3929 = vmatmul.mubr.bf16.gmra.mrb[84].mxu0 %v3631_v45  ;;  %v3581_v19 = vmax.f32 %v3517_v11, 0.0 }
 0x41d   : > { %v3520_v43 = vadd.f32 %v10975_v58, %v3324_v59  ;;  %v3582_v22 = vmax.f32 %v3518_v17, 0.0 }
 0x41e   : > { %v3583_v32 = vmax.f32 %v3519_v9, 0.0 }
 0x41f   : > { %v3584_v20 = vmax.f32 %v3520_v43, 0.0 }
 0x420   : > { %v3633_v23 = vpack.c.bf16 %v3583_v32, %v3581_v19 }
 0x421   : > { %v3634_v21 = vpack.c.bf16 %v3584_v20, %v3582_v22  ;;  %v3328_v3 = vpop.f32.mrb[28].mxu1 }
 0x422   : > { %v3521_v50 = vadd.f32 %v10972_v37, %v3328_v3  ;;  %v3330_v18 = vpop.f32.mrb[29].mxu1 }
 0x423   : > { %v3522_v0 = vadd.f32 %v10975_v58, %v3330_v18  ;;  %v3332_v46 = vpop.f32.mrb[30].mxu1  ;;  %8394 = vmatprep.mubr.msk.bf16.mxu0 %vm3797_vm5, %v3634_v21 }
 0x424   : > { %v3523_v27 = vadd.f32 %v10972_v37, %v3332_v46  ;;  %v3334_v40 = vpop.f32.mrb[31].mxu1  ;;  %3939 = vmatmul.mubr.bf16.gmra.mrb[88].mxu0 %v3633_v23  ;;  %v3585_v33 = vmax.f32 %v3521_v50, 0.0 }
 0x425   : > { %v3524_v16 = vadd.f32 %v10975_v58, %v3334_v40  ;;  %v3586_v12 = vmax.f32 %v3522_v0, 0.0 }
 0x426   : > { %v3587_v15 = vmax.f32 %v3523_v27, 0.0 }
 0x427   : > { %v3588_v49 = vmax.f32 %v3524_v16, 0.0 }
 0x428   : > { %v3635_v30 = vpack.c.bf16 %v3587_v15, %v3585_v33 }
 0x429   : > { %v3636_v31 = vpack.c.bf16 %v3588_v49, %v3586_v12  ;;  %v3338_v25 = vpop.f32.mrb[32].mxu1 }
 0x42a   : > { %v3525_v39 = vadd.f32 %v10972_v37, %v3338_v25  ;;  %v3340_v24 = vpop.f32.mrb[33].mxu1 }
 0x42b   : > { %v3526_v62 = vadd.f32 %v10975_v58, %v3340_v24  ;;  %v3342_v55 = vpop.f32.mrb[34].mxu1  ;;  %8395 = vmatprep.mubr.msk.bf16.mxu0 %vm3797_vm5, %v3636_v31 }
 0x42c   : > { %v3527_v53 = vadd.f32 %v10972_v37, %v3342_v55  ;;  %v3344_v44 = vpop.f32.mrb[35].mxu1  ;;  %3949 = vmatmul.mubr.bf16.gmra.mrb[92].mxu0 %v3635_v30  ;;  %v3589_v14 = vmax.f32 %v3525_v39, 0.0 }
 0x42d   : > { %v3528_v36 = vadd.f32 %v10975_v58, %v3344_v44  ;;  %v3590_v52 = vmax.f32 %v3526_v62, 0.0 }
 0x42e   : > { %v3591_v48 = vmax.f32 %v3527_v53, 0.0 }
 0x42f   : > { %v3592_v56 = vmax.f32 %v3528_v36, 0.0 }
 0x430   : > { %v3637_v54 = vpack.c.bf16 %v3591_v48, %v3589_v14 }
 0x431   : > { %v3638_v63 = vpack.c.bf16 %v3592_v56, %v3590_v52  ;;  %v3348_v35 = vpop.f32.mrb[36].mxu1 }
 0x432   : > { %v3529_v57 = vadd.f32 %v10972_v37, %v3348_v35  ;;  %v3350_v60 = vpop.f32.mrb[37].mxu1 }
 0x433   : > { %v3530_v47 = vadd.f32 %v10975_v58, %v3350_v60  ;;  %v3352_v61 = vpop.f32.mrb[38].mxu1  ;;  %8396 = vmatprep.mubr.msk.bf16.mxu0 %vm3797_vm5, %v3638_v63 }
 0x434   : > { %v3531_v4 = vadd.f32 %v10972_v37, %v3352_v61  ;;  %v3354_v34 = vpop.f32.mrb[39].mxu1  ;;  %3959 = vmatmul.mubr.bf16.gmra.mrb[96].mxu0 %v3637_v54  ;;  %v3593_v26 = vmax.f32 %v3529_v57, 0.0 }
 0x435   : > { %v3532_v51 = vadd.f32 %v10975_v58, %v3354_v34  ;;  %v3594_v6 = vmax.f32 %v3530_v47, 0.0 }
 0x436   : > { %v3595_v7 = vmax.f32 %v3531_v4, 0.0 }
 0x437   : > { %v3596_v8 = vmax.f32 %v3532_v51, 0.0 }
 0x438   : > { %v3639_v42 = vpack.c.bf16 %v3595_v7, %v3593_v26 }
 0x439   : > { %v3640_v38 = vpack.c.bf16 %v3596_v8, %v3594_v6  ;;  %v3358_v5 = vpop.f32.mrb[40].mxu1 }
 0x43a   : > { %v3533_v45 = vadd.f32 %v10972_v37, %v3358_v5  ;;  %v3360_v41 = vpop.f32.mrb[41].mxu1 }
 0x43b   : > { %v3534_v1 = vadd.f32 %v10975_v58, %v3360_v41  ;;  %v3362_v11 = vpop.f32.mrb[42].mxu1  ;;  %8397 = vmatprep.mubr.msk.bf16.mxu0 %vm3797_vm5, %v3640_v38 }
 0x43c   : > { %v3535_v13 = vadd.f32 %v10972_v37, %v3362_v11  ;;  %v3364_v17 = vpop.f32.mrb[43].mxu1  ;;  %3969 = vmatmul.mubr.bf16.gmra.mrb[100].mxu0 %v3639_v42  ;;  %v3597_v9 = vmax.f32 %v3533_v45, 0.0 }
 0x43d   : > { %v3536_v10 = vadd.f32 %v10975_v58, %v3364_v17  ;;  %v3598_v43 = vmax.f32 %v3534_v1, 0.0 }
 0x43e   : > { %v3599_v59 = vmax.f32 %v3535_v13, 0.0 }
 0x43f   : > { %v3600_v19 = vmax.f32 %v3536_v10, 0.0 }
 0x440   : > { %v3641_v32 = vpack.c.bf16 %v3599_v59, %v3597_v9 }
 0x441   : > { %v3642_v22 = vpack.c.bf16 %v3600_v19, %v3598_v43  ;;  %v3368_v20 = vpop.f32.mrb[44].mxu1 }
 0x442   : > { %v3537_v23 = vadd.f32 %v10972_v37, %v3368_v20  ;;  %v3370_v21 = vpop.f32.mrb[45].mxu1 }
 0x443   : > { %v3538_v3 = vadd.f32 %v10975_v58, %v3370_v21  ;;  %v3372_v50 = vpop.f32.mrb[46].mxu1  ;;  %8398 = vmatprep.mubr.msk.bf16.mxu0 %vm3797_vm5, %v3642_v22 }
 0x444   : > { %v3539_v18 = vadd.f32 %v10972_v37, %v3372_v50  ;;  %v3374_v0 = vpop.f32.mrb[47].mxu1  ;;  %3979 = vmatmul.mubr.bf16.gmra.mrb[104].mxu0 %v3641_v32  ;;  %v3601_v27 = vmax.f32 %v3537_v23, 0.0 }
 0x445   : > { %v3540_v46 = vadd.f32 %v10975_v58, %v3374_v0  ;;  %v3602_v16 = vmax.f32 %v3538_v3, 0.0 }
 0x446   : > { %v3603_v40 = vmax.f32 %v3539_v18, 0.0 }
 0x447   : > { %v3604_v33 = vmax.f32 %v3540_v46, 0.0 }
 0x448   : > { %v3643_v15 = vpack.c.bf16 %v3603_v40, %v3601_v27 }
 0x449   : > { %v3644_v12 = vpack.c.bf16 %v3604_v33, %v3602_v16  ;;  %v3378_v49 = vpop.f32.mrb[48].mxu1  ;;  %v9560_v33 = vld [vmem:[%s12512_s6] ss:$8 sps:$4 sm:$0xff]  }
 0x44a   : > { %v3541_v30 = vadd.f32 %v10972_v37, %v3378_v49  ;;  %v3380_v31 = vpop.f32.mrb[49].mxu1  ;;  %v9568_v49 = vld [vmem:[%s12512_s6 + $0x24] ss:$8 sps:$4 sm:$0xff]  }
 0x44b   : > { %v3542_v25 = vadd.f32 %v10975_v58, %v3380_v31  ;;  %v3382_v39 = vpop.f32.mrb[50].mxu1  ;;  %8399 = vmatprep.mubr.msk.bf16.mxu0 %vm3797_vm5, %v3644_v12  ;;  %v9566_v12 = vld [vmem:[%s12512_s6 + $0x20] ss:$8 sps:$4 sm:$0xff]  }
 0x44c   : > { %v3543_v24 = vadd.f32 %v10972_v37, %v3382_v39  ;;  %v3384_v62 = vpop.f32.mrb[51].mxu1  ;;  %3989 = vmatmul.mubr.bf16.gmra.mrb[108].mxu0 %v3643_v15  ;;  %v3605_v53 = vmax.f32 %v3541_v30, 0.0  ;;  %v9565_v15 = vld [vmem:[%s12512_s6 + $0x14] ss:$8 sps:$4 sm:$0xff]  }
 0x44d   : > { %v3544_v55 = vadd.f32 %v10975_v58, %v3384_v62  ;;  %v3606_v36 = vmax.f32 %v3542_v25, 0.0 }
 0x44e   : > { %v3607_v44 = vmax.f32 %v3543_v24, 0.0 }
 0x44f   : > { %v3608_v14 = vmax.f32 %v3544_v55, 0.0 }
 0x450   : > { %v3645_v48 = vpack.c.bf16 %v3607_v44, %v3605_v53 }
 0x451   : > { %v3646_v52 = vpack.c.bf16 %v3608_v14, %v3606_v36  ;;  %v3388_v56 = vpop.f32.mrb[52].mxu1  ;;  %v9571_v36 = vld [vmem:[%s12512_s6 + $0x34] ss:$8 sps:$4 sm:$0xff]  }
 0x452   : > { %v3545_v54 = vadd.f32 %v10972_v37, %v3388_v56  ;;  %v3390_v63 = vpop.f32.mrb[53].mxu1 }
 0x453   : > { %v3546_v35 = vadd.f32 %v10975_v58, %v3390_v63  ;;  %v3392_v57 = vpop.f32.mrb[54].mxu1  ;;  %8400 = vmatprep.mubr.msk.bf16.mxu0 %vm3797_vm5, %v3646_v52  ;;  %v9569_v52 = vld [vmem:[%s12512_s6 + $0x30] ss:$8 sps:$4 sm:$0xff]  }
 0x454   : > { %v3547_v60 = vadd.f32 %v10972_v37, %v3392_v57  ;;  %v3394_v47 = vpop.f32.mrb[55].mxu1  ;;  %3999 = vmatmul.mubr.bf16.gmra.mrb[112].mxu0 %v3645_v48  ;;  %v3609_v4 = vmax.f32 %v3545_v54, 0.0 }
 0x455   : > { %v3548_v61 = vadd.f32 %v10975_v58, %v3394_v47  ;;  %v3610_v51 = vmax.f32 %v3546_v35, 0.0  ;;  %v9574_v35 = vld [vmem:[%s12512_s6 + $0x44] ss:$8 sps:$4 sm:$0xff]  }
 0x456   : > { %v3611_v34 = vmax.f32 %v3547_v60, 0.0  ;;  %v9572_v60 = vld [vmem:[%s12512_s6 + $0x40] ss:$8 sps:$4 sm:$0xff]  }
 0x457   : > { %v3612_v26 = vmax.f32 %v3548_v61, 0.0 }
 0x458   : > { %v3647_v7 = vpack.c.bf16 %v3611_v34, %v3609_v4  ;;  %v9577_v4 = vld [vmem:[%s12512_s6 + $0x54] ss:$8 sps:$4 sm:$0xff]  }
 0x459   : > { %v3648_v6 = vpack.c.bf16 %v3612_v26, %v3610_v51  ;;  %v3398_v8 = vpop.f32.mrb[56].mxu1  ;;  %v9575_v26 = vld [vmem:[%s12512_s6 + $0x50] ss:$8 sps:$4 sm:$0xff]  }
 0x45a   : > { %v3549_v42 = vadd.f32 %v10972_v37, %v3398_v8  ;;  %v3400_v38 = vpop.f32.mrb[57].mxu1 }
 0x45b   : > { %v3550_v5 = vadd.f32 %v10975_v58, %v3400_v38  ;;  %v3402_v45 = vpop.f32.mrb[58].mxu1  ;;  %8401 = vmatprep.mubr.msk.bf16.mxu0 %vm3797_vm5, %v3648_v6 }
 0x45c   : > { %v3551_v41 = vadd.f32 %v10972_v37, %v3402_v45  ;;  %v3404_v1 = vpop.f32.mrb[59].mxu1  ;;  %4009 = vmatmul.mubr.bf16.gmra.mrb[116].mxu0 %v3647_v7  ;;  %v3613_v13 = vmax.f32 %v3549_v42, 0.0 }
 0x45d   : > { %v3552_v11 = vadd.f32 %v10975_v58, %v3404_v1  ;;  %v3614_v10 = vmax.f32 %v3550_v5, 0.0 }
 0x45e   : > { %v3615_v17 = vmax.f32 %v3551_v41, 0.0 }
 0x45f   : > { %v3616_v9 = vmax.f32 %v3552_v11, 0.0 }
 0x460   : > { %v3649_v59 = vpack.c.bf16 %v3615_v17, %v3613_v13 }
 0x461   : > { %v3650_v43 = vpack.c.bf16 %v3616_v9, %v3614_v10  ;;  %v3408_v19 = vpop.f32.mrb[60].mxu1 }
 0x462   : > { %v3553_v32 = vadd.f32 %v10972_v37, %v3408_v19  ;;  %v3410_v22 = vpop.f32.mrb[61].mxu1 }
 0x463   : > { %v3554_v20 = vadd.f32 %v10975_v58, %v3410_v22  ;;  %v3412_v23 = vpop.f32.mrb[62].mxu1  ;;  %8402 = vmatprep.mubr.msk.bf16.mxu0 %vm3797_vm5, %v3650_v43 }
 0x464   : > { %v3555_v21 = vadd.f32 %v10972_v37, %v3412_v23  ;;  %v3414_v3 = vpop.f32.mrb[63].mxu1  ;;  %4019 = vmatmul.mubr.bf16.gmra.mrb[120].mxu0 %v3649_v59  ;;  %v3617_v18 = vmax.f32 %v3553_v32, 0.0  ;;  %v9562_v37 = vld [vmem:[%s12512_s6 + $0x4] ss:$8 sps:$4 sm:$0xff]  }
 0x465   : > { %v3556_v50 = vadd.f32 %v10975_v58, %v3414_v3  ;;  %v3618_v46 = vmax.f32 %v3554_v20, 0.0  ;;  %4654 = vmatprep.subr.bf16.mxu1 %v9562_v37  ;;  %v9563_v58 = vld [vmem:[%s12512_s6 + $0x10] ss:$8 sps:$4 sm:$0xff]  }
 0x466   : > { %v3619_v0 = vmax.f32 %v3555_v21, 0.0  ;;  %4655 = vmatpush1.bf16.msra.mxu1 %v9560_v33 }
 0x467   : > { %v3620_v27 = vmax.f32 %v3556_v50, 0.0  ;;  %4656 = vmatprep.subr.bf16.mxu1 %v9565_v15 }
 0x468   : > { %v3651_v40 = vpack.c.bf16 %v3619_v0, %v3617_v18 }
 0x469   : > { %v3652_v16 = vpack.c.bf16 %v3620_v27, %v3618_v46 }
 0x46a   : > { %4657 = vmatpush1.bf16.msra.mxu1 %v9563_v58 }
 0x46b   : > { %8403 = vmatprep.mubr.msk.bf16.mxu0 %vm3797_vm5, %v3652_v16  ;;  %4658 = vmatprep.subr.bf16.mxu1 %v9568_v49 }
 0x46c   : > { %4029 = vmatmul.mubr.bf16.gmra.mrb[124].mxu0 %v3651_v40 }
 0x46e   : > { %4659 = vmatpush1.bf16.msra.mxu1 %v9566_v12 }
 0x46f   : > { %4660 = vmatprep.subr.bf16.mxu1 %v9571_v36 }
 0x472   : > { %4661 = vmatpush1.bf16.msra.mxu1 %v9569_v52 }
 0x473   : > { %4662 = vmatprep.subr.bf16.mxu1 %v9574_v35 }
 0x476   : > { %4663 = vmatpush1.bf16.msra.mxu1 %v9572_v60 }
 0x477   : > { %4664 = vmatprep.subr.bf16.mxu1 %v9577_v4 }
 0x47a   : > { %4665 = vmatpush1.bf16.msra.mxu1 %v9575_v26 }
 0x4c7   : > { %v11075_v30 = vpop.f32.mrb[64].mxu0 }
 0x4c8   : > { %v3882_v31 = vpop.f32.mrb[65].mxu0  ;;  %v4039_v25 = vand.u32 2147483647, %v11075_v30 }
 0x4c9   : > { %v11078_v39 = vpop.f32.mrb[66].mxu0  ;;  %v4040_v55 = vand.u32 2147483647, %v3882_v31 }
 0x4ca   : > { %4167 = vrot.lane.b32.xlu0 %v4039_v25, %s9829_s2  ;;  %v3886_v24 = vpop.f32.mrb[67].mxu0  ;;  %v4041_v62 = vand.u32 2147483647, %v11078_v39 }
 0x4cb   : > { %v4042_v53 = vand.u32 2147483647, %v3886_v24 }
 0x4cc   : > { %4171 = vrot.lane.b32.xlu1 %v4041_v62, %s9829_s2 }
 0x4ce   : > { %4169 = vrot.lane.b32.xlu0 %v4040_v55, %s9829_s2 }
 0x4cf   : > { %v11084_v44 = vpop.f32.mrb[68].mxu0 }
 0x4d0   : > { %v4043_v14 = vand.u32 2147483647, %v11084_v44  ;;  %4173 = vrot.lane.b32.xlu1 %v4042_v53, %s9829_s2  ;;  %v3892_v48 = vpop.f32.mrb[69].mxu0 }
 0x4d1   : > { %v4044_v56 = vand.u32 2147483647, %v3892_v48  ;;  %v11094_v54 = vpop.f32.mrb[70].mxu0 }
 0x4d2   : > { %4175 = vrot.lane.b32.xlu0 %v4043_v14, %s9829_s2  ;;  %v3896_v63 = vpop.f32.mrb[71].mxu0  ;;  %v4045_v57 = vand.u32 2147483647, %v11094_v54 }
 0x4d3   : > { %v4046_v47 = vand.u32 2147483647, %v3896_v63 }
 0x4d4   : > { %4177 = vrot.lane.b32.xlu1 %v4044_v56, %s9829_s2 }
 0x4d6   : > { %4179 = vrot.lane.b32.xlu0 %v4045_v57, %s9829_s2 }
 0x4d7   : > { %v11106_v61 = vpop.f32.mrb[72].mxu0 }
 0x4d8   : > { %v4047_v34 = vand.u32 2147483647, %v11106_v61  ;;  %4181 = vrot.lane.b32.xlu1 %v4046_v47, %s9829_s2  ;;  %v3902_v51 = vpop.f32.mrb[73].mxu0 }
 0x4d9   : > { %v4048_v7 = vand.u32 2147483647, %v3902_v51  ;;  %v11116_v6 = vpop.f32.mrb[74].mxu0 }
 0x4da   : > { %4183 = vrot.lane.b32.xlu0 %v4047_v34, %s9829_s2  ;;  %v3906_v8 = vpop.f32.mrb[75].mxu0  ;;  %v4049_v42 = vand.u32 2147483647, %v11116_v6 }
 0x4db   : > { %v4050_v38 = vand.u32 2147483647, %v3906_v8 }
 0x4dc   : > { %4185 = vrot.lane.b32.xlu1 %v4048_v7, %s9829_s2 }
 0x4de   : > { %4187 = vrot.lane.b32.xlu0 %v4049_v42, %s9829_s2 }
 0x4df   : > { %v11122_v5 = vpop.f32.mrb[76].mxu0 }
 0x4e0   : > { %v4051_v45 = vand.u32 2147483647, %v11122_v5  ;;  %4189 = vrot.lane.b32.xlu1 %v4050_v38, %s9829_s2  ;;  %v3912_v41 = vpop.f32.mrb[77].mxu0 }
 0x4e1   : > { %v4052_v1 = vand.u32 2147483647, %v3912_v41  ;;  %v11126_v11 = vpop.f32.mrb[78].mxu0 }
 0x4e2   : > { %4191 = vrot.lane.b32.xlu0 %v4051_v45, %s9829_s2  ;;  %v3916_v13 = vpop.f32.mrb[79].mxu0  ;;  %v4053_v17 = vand.u32 2147483647, %v11126_v11 }
 0x4e3   : > { %v4054_v10 = vand.u32 2147483647, %v3916_v13 }
 0x4e4   : > { %4193 = vrot.lane.b32.xlu1 %v4052_v1, %s9829_s2 }
 0x4e6   : > { %4195 = vrot.lane.b32.xlu0 %v4053_v17, %s9829_s2 }
 0x4e7   : > { %v11132_v9 = vpop.f32.mrb[80].mxu0 }
 0x4e8   : > { %v4055_v59 = vand.u32 2147483647, %v11132_v9  ;;  %4197 = vrot.lane.b32.xlu1 %v4054_v10, %s9829_s2  ;;  %v3922_v43 = vpop.f32.mrb[81].mxu0 }
 0x4e9   : > { %v4056_v19 = vand.u32 2147483647, %v3922_v43  ;;  %v11136_v32 = vpop.f32.mrb[82].mxu0 }
 0x4ea   : > { %4199 = vrot.lane.b32.xlu0 %v4055_v59, %s9829_s2  ;;  %v3926_v22 = vpop.f32.mrb[83].mxu0  ;;  %v4057_v20 = vand.u32 2147483647, %v11136_v32 }
 0x4eb   : > { %v4058_v23 = vand.u32 2147483647, %v3926_v22 }
 0x4ec   : > { %4201 = vrot.lane.b32.xlu1 %v4056_v19, %s9829_s2 }
 0x4ee   : > { %4203 = vrot.lane.b32.xlu0 %v4057_v20, %s9829_s2 }
 0x4ef   : > { %v11142_v21 = vpop.f32.mrb[84].mxu0 }
 0x4f0   : > { %v4059_v3 = vand.u32 2147483647, %v11142_v21  ;;  %4205 = vrot.lane.b32.xlu1 %v4058_v23, %s9829_s2  ;;  %v3932_v50 = vpop.f32.mrb[85].mxu0 }
 0x4f1   : > { %v4060_v18 = vand.u32 2147483647, %v3932_v50  ;;  %v11146_v0 = vpop.f32.mrb[86].mxu0 }
 0x4f2   : > { %4207 = vrot.lane.b32.xlu0 %v4059_v3, %s9829_s2  ;;  %v3936_v46 = vpop.f32.mrb[87].mxu0  ;;  %v4061_v27 = vand.u32 2147483647, %v11146_v0 }
 0x4f3   : > { %v4062_v40 = vand.u32 2147483647, %v3936_v46 }
 0x4f4   : > { %4209 = vrot.lane.b32.xlu1 %v4060_v18, %s9829_s2 }
 0x4f6   : > { %4211 = vrot.lane.b32.xlu0 %v4061_v27, %s9829_s2 }
 0x4f7   : > { %v11152_v16 = vpop.f32.mrb[88].mxu0 }
 0x4f8   : > { %v4063_v33 = vand.u32 2147483647, %v11152_v16  ;;  %4213 = vrot.lane.b32.xlu1 %v4062_v40, %s9829_s2  ;;  %v3942_v37 = vpop.f32.mrb[89].mxu0 }
 0x4f9   : > { %v4064_v58 = vand.u32 2147483647, %v3942_v37  ;;  %v11156_v15 = vpop.f32.mrb[90].mxu0 }
 0x4fa   : > { %4215 = vrot.lane.b32.xlu0 %v4063_v33, %s9829_s2  ;;  %v3946_v12 = vpop.f32.mrb[91].mxu0  ;;  %v4065_v49 = vand.u32 2147483647, %v11156_v15 }
 0x4fb   : > { %v4066_v31 = vand.u32 2147483647, %v3946_v12 }
 0x4fc   : > { %4217 = vrot.lane.b32.xlu1 %v4064_v58, %s9829_s2 }
 0x4fe   : > { %4219 = vrot.lane.b32.xlu0 %v4065_v49, %s9829_s2 }
 0x4ff   : > { %v11162_v25 = vpop.f32.mrb[92].mxu0 }
 0x500   : > { %v4067_v24 = vand.u32 2147483647, %v11162_v25  ;;  %4221 = vrot.lane.b32.xlu1 %v4066_v31, %s9829_s2  ;;  %v3952_v62 = vpop.f32.mrb[93].mxu0 }
 0x501   : > { %v4068_v55 = vand.u32 2147483647, %v3952_v62  ;;  %v11166_v53 = vpop.f32.mrb[94].mxu0 }
 0x502   : > { %4223 = vrot.lane.b32.xlu0 %v4067_v24, %s9829_s2  ;;  %v3956_v36 = vpop.f32.mrb[95].mxu0  ;;  %v4069_v14 = vand.u32 2147483647, %v11166_v53 }
 0x503   : > { %v4070_v48 = vand.u32 2147483647, %v3956_v36 }
 0x504   : > { %4225 = vrot.lane.b32.xlu1 %v4068_v55, %s9829_s2 }
 0x506   : > { %4227 = vrot.lane.b32.xlu0 %v4069_v14, %s9829_s2 }
 0x507   : > { %v11172_v52 = vpop.f32.mrb[96].mxu0 }
 0x508   : > { %v4071_v56 = vand.u32 2147483647, %v11172_v52  ;;  %4229 = vrot.lane.b32.xlu1 %v4070_v48, %s9829_s2  ;;  %v3962_v63 = vpop.f32.mrb[97].mxu0 }
 0x509   : > { %v4072_v35 = vand.u32 2147483647, %v3962_v63  ;;  %v11176_v57 = vpop.f32.mrb[98].mxu0 }
 0x50a   : > { %4231 = vrot.lane.b32.xlu0 %v4071_v56, %s9829_s2  ;;  %v3966_v60 = vpop.f32.mrb[99].mxu0  ;;  %v4073_v47 = vand.u32 2147483647, %v11176_v57 }
 0x50b   : > { %v4074_v4 = vand.u32 2147483647, %v3966_v60 }
 0x50c   : > { %4233 = vrot.lane.b32.xlu1 %v4072_v35, %s9829_s2 }
 0x50e   : > { %4235 = vrot.lane.b32.xlu0 %v4073_v47, %s9829_s2 }
 0x50f   : > { %v11182_v34 = vpop.f32.mrb[100].mxu0 }
 0x510   : > { %v4075_v51 = vand.u32 2147483647, %v11182_v34  ;;  %4237 = vrot.lane.b32.xlu1 %v4074_v4, %s9829_s2  ;;  %v3972_v26 = vpop.f32.mrb[101].mxu0 }
 0x511   : > { %v4076_v7 = vand.u32 2147483647, %v3972_v26  ;;  %v11186_v8 = vpop.f32.mrb[102].mxu0 }
 0x512   : > { %4239 = vrot.lane.b32.xlu0 %v4075_v51, %s9829_s2  ;;  %v3976_v42 = vpop.f32.mrb[103].mxu0  ;;  %v4077_v38 = vand.u32 2147483647, %v11186_v8 }
 0x513   : > { %v4078_v45 = vand.u32 2147483647, %v3976_v42 }
 0x514   : > { %4241 = vrot.lane.b32.xlu1 %v4076_v7, %s9829_s2 }
 0x516   : > { %4243 = vrot.lane.b32.xlu0 %v4077_v38, %s9829_s2 }
 0x517   : > { %v11192_v41 = vpop.f32.mrb[104].mxu0 }
 0x518   : > { %v4079_v1 = vand.u32 2147483647, %v11192_v41  ;;  %4245 = vrot.lane.b32.xlu1 %v4078_v45, %s9829_s2  ;;  %v3982_v13 = vpop.f32.mrb[105].mxu0  ;;  %v9830_v45 = vmov 0.0  }
 0x519   : > { %v4080_v17 = vand.u32 2147483647, %v3982_v13  ;;  %v11196_v10 = vpop.f32.mrb[106].mxu0  ;;  %4458 = vst.msk [vmem:[#allocation2 + $0xfc] sm:$0xf] %vm4456_vm6, %v9830_v45 }
 0x51a   : > { %4247 = vrot.lane.b32.xlu0 %v4079_v1, %s9829_s2  ;;  %v3986_v59 = vpop.f32.mrb[107].mxu0  ;;  %v4081_v43 = vand.u32 2147483647, %v11196_v10  ;;  %7102 = vst.msk [vmem:[#allocation3 + $0x7c] sm:$0xf] %vm7100_vm9, %v9830_v45  ;;  %v9728_v45 = vld [vmem:[%s12521_s15 + $0x40] sm:$0xff]  }
 0x51b   : > { %v4082_v19 = vand.u32 2147483647, %v3986_v59 }
 0x51c   : > { %4249 = vrot.lane.b32.xlu1 %v4080_v17, %s9829_s2 }
 0x51e   : > { %4251 = vrot.lane.b32.xlu0 %v4081_v43, %s9829_s2 }
 0x51f   : > { %v11202_v22 = vpop.f32.mrb[108].mxu0 }
 0x520   : > { %v4083_v20 = vand.u32 2147483647, %v11202_v22  ;;  %4253 = vrot.lane.b32.xlu1 %v4082_v19, %s9829_s2  ;;  %v3992_v23 = vpop.f32.mrb[109].mxu0 }
 0x521   : > { %v4084_v3 = vand.u32 2147483647, %v3992_v23  ;;  %v11206_v50 = vpop.f32.mrb[110].mxu0 }
 0x522   : > { %4255 = vrot.lane.b32.xlu0 %v4083_v20, %s9829_s2  ;;  %v3996_v18 = vpop.f32.mrb[111].mxu0  ;;  %v4085_v46 = vand.u32 2147483647, %v11206_v50 }
 0x523   : > { %v4086_v27 = vand.u32 2147483647, %v3996_v18 }
 0x524   : > { %4257 = vrot.lane.b32.xlu1 %v4084_v3, %s9829_s2 }
 0x526   : > { %4259 = vrot.lane.b32.xlu0 %v4085_v46, %s9829_s2 }
 0x527   : > { %v11212_v40 = vpop.f32.mrb[112].mxu0 }
 0x528   : > { %v4087_v33 = vand.u32 2147483647, %v11212_v40  ;;  %4261 = vrot.lane.b32.xlu1 %v4086_v27, %s9829_s2  ;;  %v4002_v37 = vpop.f32.mrb[113].mxu0 }
 0x529   : > { %v4088_v58 = vand.u32 2147483647, %v4002_v37  ;;  %v11216_v12 = vpop.f32.mrb[114].mxu0 }
 0x52a   : > { %4263 = vrot.lane.b32.xlu0 %v4087_v33, %s9829_s2  ;;  %v4006_v49 = vpop.f32.mrb[115].mxu0  ;;  %v4089_v31 = vand.u32 2147483647, %v11216_v12 }
 0x52b   : > { %v4090_v24 = vand.u32 2147483647, %v4006_v49 }
 0x52c   : > { %4265 = vrot.lane.b32.xlu1 %v4088_v58, %s9829_s2 }
 0x52e   : > { %4267 = vrot.lane.b32.xlu0 %v4089_v31, %s9829_s2 }
 0x52f   : > { %v11222_v62 = vpop.f32.mrb[116].mxu0 }
 0x530   : > { %v4091_v55 = vand.u32 2147483647, %v11222_v62  ;;  %4269 = vrot.lane.b32.xlu1 %v4090_v24, %s9829_s2  ;;  %v4012_v36 = vpop.f32.mrb[117].mxu0 }
 0x531   : > { %v4092_v14 = vand.u32 2147483647, %v4012_v36  ;;  %v11226_v48 = vpop.f32.mrb[118].mxu0 }
 0x532   : > { %4271 = vrot.lane.b32.xlu0 %v4091_v55, %s9829_s2  ;;  %v4016_v56 = vpop.f32.mrb[119].mxu0  ;;  %v4093_v63 = vand.u32 2147483647, %v11226_v48 }
 0x533   : > { %v4094_v35 = vand.u32 2147483647, %v4016_v56 }
 0x534   : > { %4273 = vrot.lane.b32.xlu1 %v4092_v14, %s9829_s2 }
 0x536   : > { %4275 = vrot.lane.b32.xlu0 %v4093_v63, %s9829_s2 }
 0x537   : > { %v11232_v60 = vpop.f32.mrb[120].mxu0 }
 0x538   : > { %v4095_v47 = vand.u32 2147483647, %v11232_v60  ;;  %4277 = vrot.lane.b32.xlu1 %v4094_v35, %s9829_s2  ;;  %v4022_v4 = vpop.f32.mrb[121].mxu0 }
 0x539   : > { %v4096_v51 = vand.u32 2147483647, %v4022_v4  ;;  %v11236_v26 = vpop.f32.mrb[122].mxu0 }
 0x53a   : > { %4279 = vrot.lane.b32.xlu0 %v4095_v47, %s9829_s2  ;;  %v4026_v7 = vpop.f32.mrb[123].mxu0  ;;  %v4097_v42 = vand.u32 2147483647, %v11236_v26 }
 0x53b   : > { %v4098_v1 = vand.u32 2147483647, %v4026_v7 }
 0x53c   : > { %v4168_v38 = vpop.permute.xlu0 %4167  ;;  %4281 = vrot.lane.b32.xlu1 %v4096_v51, %s9829_s2  ;;  %v9580_v51 = vld [vmem:[%s12514_s8 + $0xc4] ss:$8 sps:$4 sm:$0xff]  }
 0x53d   : > { %5142 = vmatprep.subr.bf16.mxu1 %v9580_v51 }
 0x53e   : > { %v4172_v13 = vpop.permute.xlu1 %4171  ;;  %4283 = vrot.lane.b32.xlu0 %v4097_v42, %s9829_s2 }
 0x53f   : > { %v11244_v17 = vpop.f32.mrb[124].mxu0 }
 0x540   : > { %v4099_v59 = vand.u32 2147483647, %v11244_v17  ;;  %v4170_v43 = vpop.permute.xlu0 %4169  ;;  %4285 = vrot.lane.b32.xlu1 %v4098_v1, %s9829_s2  ;;  %v4032_v19 = vpop.f32.mrb[125].mxu0 }
 0x541   : > { %v4296_v20 = vsel %vm4295_vm7, %v4168_v38, %v4170_v43  ;;  %v4100_v23 = vand.u32 2147483647, %v4032_v19  ;;  %v11249_v3 = vpop.f32.mrb[126].mxu0 }
 0x542   : > { %v4360_v18 = vadd.f32 %v4296_v20, %v11075_v30  ;;  %v4174_v46 = vpop.permute.xlu1 %4173  ;;  %4287 = vrot.lane.b32.xlu0 %v4099_v59, %s9829_s2  ;;  %v4036_v27 = vpop.f32.mrb[127].mxu0  ;;  %v4101_v58 = vand.u32 2147483647, %v11249_v3 }
 0x543   : > { %v4297_v33 = vsel %vm4295_vm7, %v4172_v13, %v4174_v46  ;;  %v4102_v55 = vand.u32 2147483647, %v4036_v27 }
 0x544   : > { %v4392_v37 = vmul.f32 0.5, %v4360_v18  ;;  %v4361_v49 = vadd.f32 %v4297_v33, %v11078_v39  ;;  %v4176_v31 = vpop.permute.xlu0 %4175  ;;  %4289 = vrot.lane.b32.xlu1 %v4100_v23, %s9829_s2 }
 0x546   : > { %4425 = vst.msk [vmem:[#allocation2] sm:$0xff] %vm4424_vm8, %v4392_v37  ;;  %v4393_v24 = vmul.f32 0.5, %v4361_v49  ;;  %v4178_v30 = vpop.permute.xlu1 %4177  ;;  %4291 = vrot.lane.b32.xlu0 %v4101_v58, %s9829_s2 }
 0x547   : > { %v4298_v36 = vsel %vm4295_vm7, %v4176_v31, %v4178_v30 }
 0x548   : > { %4426 = vst.msk [vmem:[#allocation2 + $0x8] sm:$0xff] %vm4424_vm8, %v4393_v24  ;;  %v4362_v14 = vadd.f32 %v4298_v36, %v11084_v44  ;;  %v4180_v56 = vpop.permute.xlu0 %4179  ;;  %4293 = vrot.lane.b32.xlu1 %v4102_v55, %s9829_s2  ;;  %v9583_v36 = vld [vmem:[%s12514_s8 + $0xd4] ss:$8 sps:$4 sm:$0xff]   ;;  %s12463_s2 = scalar_lea.hbm %s12525_s19, %s8763_s26 }
 0x54a   : > { %v4394_v39 = vmul.f32 0.5, %v4362_v14  ;;  %v4182_v63 = vpop.permute.xlu1 %4181 }
 0x54b   : > { %v4299_v35 = vsel %vm4295_vm7, %v4180_v56, %v4182_v63 }
 0x54c   : > { %4427 = vst.msk [vmem:[#allocation2 + $0x10] sm:$0xff] %vm4424_vm8, %v4394_v39  ;;  %v4363_v47 = vadd.f32 %v4299_v35, %v11094_v54  ;;  %v4184_v4 = vpop.permute.xlu0 %4183  ;;  %v9581_v39 = vld [vmem:[%s12514_s8 + $0xd0] ss:$8 sps:$4 sm:$0xff]  }
 0x54e   : > { %v4395_v7 = vmul.f32 0.5, %v4363_v47  ;;  %v4186_v42 = vpop.permute.xlu1 %4185  ;;  %v9586_v47 = vld [vmem:[%s12514_s8 + $0xe4] ss:$8 sps:$4 sm:$0xff]  }
 0x54f   : > { %v4300_v44 = vsel %vm4295_vm7, %v4184_v4, %v4186_v42  ;;  %v4459_v20 = vld [vmem:[#allocation2] ss:$2 sm:$0xff]  ;;  %v4491_v23 = vld [vmem:[#allocation2 + $0x1] ss:$2 sm:$0xff] }
 0x550   : > { %4428 = vst.msk [vmem:[#allocation2 + $0x18] sm:$0xff] %vm4424_vm8, %v4395_v7  ;;  %v4364_v38 = vadd.f32 %v4300_v44, %v11106_v61  ;;  %v4188_v1 = vpop.permute.xlu0 %4187  ;;  %v4522_v49 = vmax.f32 %v4459_v20, %v4491_v23  ;;  %v9584_v7 = vld [vmem:[%s12514_s8 + $0xe0] ss:$8 sps:$4 sm:$0xff]  }
 0x552   : > { %v4396_v13 = vmul.f32 0.5, %v4364_v38  ;;  %v4190_v59 = vpop.permute.xlu1 %4189  ;;  %v9589_v38 = vld [vmem:[%s12514_s8 + $0xf4] ss:$8 sps:$4 sm:$0xff]  }
 0x553   : > { %v4301_v43 = vsel %vm4295_vm7, %v4188_v1, %v4190_v59 }
 0x554   : > { %4429 = vst.msk [vmem:[#allocation2 + $0x20] sm:$0xff] %vm4424_vm8, %v4396_v13  ;;  %v4365_v54 = vadd.f32 %v4301_v43, %v11116_v6  ;;  %v4192_v19 = vpop.permute.xlu0 %4191  ;;  %v9578_v6 = vld [vmem:[%s12514_s8 + $0xc0] ss:$8 sps:$4 sm:$0xff]  }
 0x556   : > { %v4397_v18 = vmul.f32 0.5, %v4365_v54  ;;  %v4194_v46 = vpop.permute.xlu1 %4193  ;;  %v9587_v54 = vld [vmem:[%s12514_s8 + $0xf0] ss:$8 sps:$4 sm:$0xff]  }
 0x557   : > { %v4302_v27 = vsel %vm4295_vm7, %v4192_v19, %v4194_v46  ;;  %v4461_v33 = vld [vmem:[#allocation2 + $0x10] ss:$2 sm:$0xff]  ;;  %v4493_v37 = vld [vmem:[#allocation2 + $0x11] ss:$2 sm:$0xff] }
 0x558   : > { %4430 = vst.msk [vmem:[#allocation2 + $0x28] sm:$0xff] %vm4424_vm8, %v4397_v18  ;;  %v4366_v61 = vadd.f32 %v4302_v27, %v11122_v5  ;;  %v4196_v58 = vpop.permute.xlu0 %4195  ;;  %v4523_v31 = vmax.f32 %v4461_v33, %v4493_v37 }
 0x55a   : > { %v4398_v24 = vmul.f32 0.5, %v4366_v61  ;;  %v4198_v55 = vpop.permute.xlu1 %4197  ;;  %v4538_v30 = vpack.c.bf16 %v4523_v31, %v4522_v49 }
 0x55b   : > { %v4303_v14 = vsel %vm4295_vm7, %v4196_v58, %v4198_v55 }
 0x55c   : > { %4431 = vst.msk [vmem:[#allocation2 + $0x30] sm:$0xff] %vm4424_vm8, %v4398_v24  ;;  %v4367_v5 = vadd.f32 %v4303_v14, %v11126_v11  ;;  %8416 = vmatmul.mubr.msk.bf16.vlgmr.msra.gmra.mrb[64].mxu1 %vm4424_vm8, %v4538_v30  ;;  %v4200_v56 = vpop.permute.xlu0 %4199 }
 0x55d   : > { %4696 = vmatprep.mubr.bf16.mxu1 %v9828_v2  ;;  %5143 = vmatpush1.bf16.msra.mxu1 %v9578_v6 }
 0x55e   : > { %v4399_v63 = vmul.f32 0.5, %v4367_v5  ;;  %v4202_v35 = vpop.permute.xlu1 %4201  ;;  %5144 = vmatprep.subr.bf16.mxu1 %v9583_v36 }
 0x55f   : > { %v4304_v4 = vsel %vm4295_vm7, %v4200_v56, %v4202_v35  ;;  %v4463_v59 = vld [vmem:[#allocation2 + $0x20] ss:$2 sm:$0xff]  ;;  %v4495_v43 = vld [vmem:[#allocation2 + $0x21] ss:$2 sm:$0xff] }
 0x560   : > { %4432 = vst.msk [vmem:[#allocation2 + $0x38] sm:$0xff] %vm4424_vm8, %v4399_v63  ;;  %v4368_v11 = vadd.f32 %v4304_v4, %v11132_v9  ;;  %v4204_v51 = vpop.permute.xlu0 %4203  ;;  %v4524_v33 = vmax.f32 %v4463_v59, %v4495_v43 }
 0x561   : > { %5145 = vmatpush1.bf16.msra.mxu1 %v9581_v39 }
 0x562   : > { %v4400_v42 = vmul.f32 0.5, %v4368_v11  ;;  %v4206_v44 = vpop.permute.xlu1 %4205  ;;  %5146 = vmatprep.subr.bf16.mxu1 %v9586_v47 }
 0x563   : > { %v4305_v1 = vsel %vm4295_vm7, %v4204_v51, %v4206_v44 }
 0x564   : > { %4433 = vst.msk [vmem:[#allocation2 + $0x40] sm:$0xff] %vm4424_vm8, %v4400_v42  ;;  %v4369_v13 = vadd.f32 %v4305_v1, %v11136_v32  ;;  %v4208_v9 = vpop.permute.xlu0 %4207 }
 0x565   : > { %5147 = vmatpush1.bf16.msra.mxu1 %v9584_v7 }
 0x566   : > { %v4401_v19 = vmul.f32 0.5, %v4369_v13  ;;  %v4210_v20 = vpop.permute.xlu1 %4209  ;;  %5148 = vmatprep.subr.bf16.mxu1 %v9589_v38 }
 0x567   : > { %v4306_v23 = vsel %vm4295_vm7, %v4208_v9, %v4210_v20  ;;  %v4465_v18 = vld [vmem:[#allocation2 + $0x30] ss:$2 sm:$0xff]  ;;  %v4497_v46 = vld [vmem:[#allocation2 + $0x31] ss:$2 sm:$0xff] }
 0x568   : > { %4434 = vst.msk [vmem:[#allocation2 + $0x48] sm:$0xff] %vm4424_vm8, %v4401_v19  ;;  %v4370_v27 = vadd.f32 %v4306_v23, %v11142_v21  ;;  %v4212_v32 = vpop.permute.xlu0 %4211  ;;  %v4525_v37 = vmax.f32 %v4465_v18, %v4497_v46 }
 0x569   : > { %5149 = vmatpush1.bf16.msra.mxu1 %v9587_v54 }
 0x56a   : > { %v4402_v61 = vmul.f32 0.5, %v4370_v27  ;;  %v4214_v58 = vpop.permute.xlu1 %4213  ;;  %v4539_v49 = vpack.c.bf16 %v4525_v37, %v4524_v33 }
 0x56b   : > { %v4307_v31 = vsel %vm4295_vm7, %v4212_v32, %v4214_v58 }
 0x56c   : > { %4435 = vst.msk [vmem:[#allocation2 + $0x50] sm:$0xff] %vm4424_vm8, %v4402_v61  ;;  %v4371_v6 = vadd.f32 %v4307_v31, %v11146_v0  ;;  %8417 = vmatmul.mubr.msk.bf16.gmra.mrb[68].mxu1 %vm4424_vm8, %v4539_v49  ;;  %v4216_v24 = vpop.permute.xlu0 %4215 }
 0x56d   : > { %4706 = vmatprep.mubr.bf16.mxu1 %v9828_v2 }
 0x56e   : > { %v4403_v55 = vmul.f32 0.5, %v4371_v6  ;;  %v4218_v21 = vpop.permute.xlu1 %4217 }
 0x56f   : > { %v4308_v30 = vsel %vm4295_vm7, %v4216_v24, %v4218_v21  ;;  %v4467_v35 = vld [vmem:[#allocation2 + $0x40] ss:$2 sm:$0xff]  ;;  %v4499_v47 = vld [vmem:[#allocation2 + $0x41] ss:$2 sm:$0xff] }
 0x570   : > { %4436 = vst.msk [vmem:[#allocation2 + $0x58] sm:$0xff] %vm4424_vm8, %v4403_v55  ;;  %v4372_v36 = vadd.f32 %v4308_v30, %v11152_v16  ;;  %v4220_v14 = vpop.permute.xlu0 %4219  ;;  %v4526_v38 = vmax.f32 %v4467_v35, %v4499_v47 }
 0x572   : > { %v4404_v5 = vmul.f32 0.5, %v4372_v36  ;;  %v4222_v56 = vpop.permute.xlu1 %4221 }
 0x573   : > { %v4309_v39 = vsel %vm4295_vm7, %v4220_v14, %v4222_v56 }
 0x574   : > { %4437 = vst.msk [vmem:[#allocation2 + $0x60] sm:$0xff] %vm4424_vm8, %v4404_v5  ;;  %v4373_v0 = vadd.f32 %v4309_v39, %v11156_v15  ;;  %v4224_v63 = vpop.permute.xlu0 %4223 }
 0x576   : > { %v4405_v4 = vmul.f32 0.5, %v4373_v0  ;;  %v4226_v11 = vpop.permute.xlu1 %4225 }
 0x577   : > { %v4310_v51 = vsel %vm4295_vm7, %v4224_v63, %v4226_v11  ;;  %v4469_v7 = vld [vmem:[#allocation2 + $0x50] ss:$2 sm:$0xff]  ;;  %v4501_v42 = vld [vmem:[#allocation2 + $0x51] ss:$2 sm:$0xff] }
 0x578   : > { %4438 = vst.msk [vmem:[#allocation2 + $0x68] sm:$0xff] %vm4424_vm8, %v4405_v4  ;;  %v4374_v16 = vadd.f32 %v4310_v51, %v11162_v25  ;;  %v4228_v44 = vpop.permute.xlu0 %4227  ;;  %v4527_v1 = vmax.f32 %v4469_v7, %v4501_v42 }
 0x57a   : > { %v4406_v13 = vmul.f32 0.5, %v4374_v16  ;;  %v4230_v9 = vpop.permute.xlu1 %4229  ;;  %v4540_v59 = vpack.c.bf16 %v4527_v1, %v4526_v38 }
 0x57b   : > { %v4311_v15 = vsel %vm4295_vm7, %v4228_v44, %v4230_v9 }
 0x57c   : > { %4439 = vst.msk [vmem:[#allocation2 + $0x70] sm:$0xff] %vm4424_vm8, %v4406_v13  ;;  %v4375_v43 = vadd.f32 %v4311_v15, %v11166_v53  ;;  %8418 = vmatmul.mubr.msk.bf16.gmra.mrb[72].mxu1 %vm4424_vm8, %v4540_v59  ;;  %v4232_v54 = vpop.permute.xlu0 %4231 }
 0x57d   : > { %4716 = vmatprep.mubr.bf16.mxu1 %v9828_v2 }
 0x57e   : > { %v4407_v19 = vmul.f32 0.5, %v4375_v43  ;;  %v4234_v20 = vpop.permute.xlu1 %4233 }
 0x57f   : > { %v4312_v25 = vsel %vm4295_vm7, %v4232_v54, %v4234_v20  ;;  %v4471_v37 = vld [vmem:[#allocation2 + $0x60] ss:$2 sm:$0xff]  ;;  %v4503_v61 = vld [vmem:[#allocation2 + $0x61] ss:$2 sm:$0xff] }
 0x580   : > { %4440 = vst.msk [vmem:[#allocation2 + $0x78] sm:$0xff] %vm4424_vm8, %v4407_v19  ;;  %v4376_v23 = vadd.f32 %v4312_v25, %v11172_v52  ;;  %v4236_v18 = vpop.permute.xlu0 %4235  ;;  %v4528_v21 = vmax.f32 %v4471_v37, %v4503_v61 }
 0x582   : > { %v4408_v46 = vmul.f32 0.5, %v4376_v23  ;;  %v4238_v27 = vpop.permute.xlu1 %4237 }
 0x583   : > { %v4313_v32 = vsel %vm4295_vm7, %v4236_v18, %v4238_v27 }
 0x584   : > { %4441 = vst.msk [vmem:[#allocation2 + $0x80] sm:$0xff] %vm4424_vm8, %v4408_v46  ;;  %v4377_v53 = vadd.f32 %v4313_v32, %v11176_v57  ;;  %v4240_v33 = vpop.permute.xlu0 %4239 }
 0x586   : > { %v4409_v58 = vmul.f32 0.5, %v4377_v53  ;;  %v4242_v49 = vpop.permute.xlu1 %4241 }
 0x587   : > { %v4314_v31 = vsel %vm4295_vm7, %v4240_v33, %v4242_v49  ;;  %v4473_v6 = vld [vmem:[#allocation2 + $0x70] ss:$2 sm:$0xff]  ;;  %v4505_v24 = vld [vmem:[#allocation2 + $0x71] ss:$2 sm:$0xff] }
 0x588   : > { %4442 = vst.msk [vmem:[#allocation2 + $0x88] sm:$0xff] %vm4424_vm8, %v4409_v58  ;;  %v4378_v52 = vadd.f32 %v4314_v31, %v11182_v34  ;;  %v4244_v55 = vpop.permute.xlu0 %4243  ;;  %v4529_v30 = vmax.f32 %v4473_v6, %v4505_v24 }
 0x58a   : > { %v4410_v36 = vmul.f32 0.5, %v4378_v52  ;;  %v4246_v14 = vpop.permute.xlu1 %4245  ;;  %v4541_v5 = vpack.c.bf16 %v4529_v30, %v4528_v21 }
 0x58b   : > { %v4315_v57 = vsel %vm4295_vm7, %v4244_v55, %v4246_v14 }
 0x58c   : > { %4443 = vst.msk [vmem:[#allocation2 + $0x90] sm:$0xff] %vm4424_vm8, %v4410_v36  ;;  %v4379_v56 = vadd.f32 %v4315_v57, %v11186_v8  ;;  %8419 = vmatmul.mubr.msk.bf16.gmra.mrb[76].mxu1 %vm4424_vm8, %v4541_v5  ;;  %v4248_v39 = vpop.permute.xlu0 %4247 }
 0x58d   : > { %4726 = vmatprep.mubr.bf16.mxu1 %v9828_v2 }
 0x58e   : > { %v4411_v0 = vmul.f32 0.5, %v4379_v56  ;;  %v4250_v63 = vpop.permute.xlu1 %4249 }
 0x58f   : > { %v4316_v34 = vsel %vm4295_vm7, %v4248_v39, %v4250_v63  ;;  %v4475_v42 = vld [vmem:[#allocation2 + $0x80] ss:$2 sm:$0xff]  ;;  %v4507_v16 = vld [vmem:[#allocation2 + $0x81] ss:$2 sm:$0xff] }
 0x590   : > { %4444 = vst.msk [vmem:[#allocation2 + $0x98] sm:$0xff] %vm4424_vm8, %v4411_v0  ;;  %v4380_v35 = vadd.f32 %v4316_v34, %v11192_v41  ;;  %v4252_v47 = vpop.permute.xlu0 %4251  ;;  %v4530_v15 = vmax.f32 %v4475_v42, %v4507_v16 }
 0x592   : > { %v4412_v4 = vmul.f32 0.5, %v4380_v35  ;;  %v4254_v11 = vpop.permute.xlu1 %4253  ;;  %v9590_v35 = vld [vmem:[%s12514_s8 + $0x100] ss:$8 sps:$4 sm:$0xff]  }
 0x593   : > { %v4317_v51 = vsel %vm4295_vm7, %v4252_v47, %v4254_v11 }
 0x594   : > { %4445 = vst.msk [vmem:[#allocation2 + $0xa0] sm:$0xff] %vm4424_vm8, %v4412_v4  ;;  %v4381_v8 = vadd.f32 %v4317_v51, %v11196_v10  ;;  %v4256_v7 = vpop.permute.xlu0 %4255  ;;  %v9595_v51 = vld [vmem:[%s12514_s8 + $0x114] ss:$8 sps:$4 sm:$0xff]  }
 0x596   : > { %v4413_v44 = vmul.f32 0.5, %v4381_v8  ;;  %v4258_v38 = vpop.permute.xlu1 %4257 }
 0x597   : > { %v4318_v1 = vsel %vm4295_vm7, %v4256_v7, %v4258_v38  ;;  %v4477_v13 = vld [vmem:[#allocation2 + $0x90] ss:$2 sm:$0xff]  ;;  %v4509_v9 = vld [vmem:[#allocation2 + $0x91] ss:$2 sm:$0xff] }
 0x598   : > { %4446 = vst.msk [vmem:[#allocation2 + $0xa8] sm:$0xff] %vm4424_vm8, %v4413_v44  ;;  %v4382_v41 = vadd.f32 %v4318_v1, %v11202_v22  ;;  %v4260_v59 = vpop.permute.xlu0 %4259  ;;  %v4531_v43 = vmax.f32 %v4477_v13, %v4509_v9  ;;  %v9593_v7 = vld [vmem:[%s12514_s8 + $0x110] ss:$8 sps:$4 sm:$0xff]   ;;  %v9598_v13 = vld [vmem:[%s12514_s8 + $0x124] ss:$8 sps:$4 sm:$0xff]  }
 0x59a   : > { %v4414_v54 = vmul.f32 0.5, %v4382_v41  ;;  %v4262_v19 = vpop.permute.xlu1 %4261  ;;  %v4542_v20 = vpack.c.bf16 %v4531_v43, %v4530_v15  ;;  %v9596_v15 = vld [vmem:[%s12514_s8 + $0x120] ss:$8 sps:$4 sm:$0xff]  }
 0x59b   : > { %v4319_v10 = vsel %vm4295_vm7, %v4260_v59, %v4262_v19 }
 0x59c   : > { %4447 = vst.msk [vmem:[#allocation2 + $0xb0] sm:$0xff] %vm4424_vm8, %v4414_v54  ;;  %v4383_v25 = vadd.f32 %v4319_v10, %v11206_v50  ;;  %8420 = vmatmul.mubr.msk.bf16.gmra.mrb[80].mxu1 %vm4424_vm8, %v4542_v20  ;;  %v4264_v23 = vpop.permute.xlu0 %4263 }
 0x59d   : > { %4736 = vmatprep.mubr.bf16.mxu1 %v9828_v2 }
 0x59e   : > { %v4415_v18 = vmul.f32 0.5, %v4383_v25  ;;  %v4266_v46 = vpop.permute.xlu1 %4265 }
 0x59f   : > { %v4320_v22 = vsel %vm4295_vm7, %v4264_v23, %v4266_v46  ;;  %v4479_v58 = vld [vmem:[#allocation2 + $0xa0] ss:$2 sm:$0xff]  ;;  %v4511_v49 = vld [vmem:[#allocation2 + $0xa1] ss:$2 sm:$0xff]  ;;  %v9599_v23 = vld [vmem:[%s12514_s8 + $0x130] ss:$8 sps:$4 sm:$0xff]  }
 0x5a0   : > { %4448 = vst.msk [vmem:[#allocation2 + $0xb8] sm:$0xff] %vm4424_vm8, %v4415_v18  ;;  %v4384_v27 = vadd.f32 %v4320_v22, %v11212_v40  ;;  %v4268_v32 = vpop.permute.xlu0 %4267  ;;  %v4532_v30 = vmax.f32 %v4479_v58, %v4511_v49  ;;  %v9601_v18 = vld [vmem:[%s12514_s8 + $0x134] ss:$8 sps:$4 sm:$0xff]   ;;  %v9608_v49 = vld [vmem:[%s12514_s8 + $0x160] ss:$8 sps:$4 sm:$0xff]  }
 0x5a2   : > { %v4416_v53 = vmul.f32 0.5, %v4384_v27  ;;  %v4270_v33 = vpop.permute.xlu1 %4269  ;;  %v9604_v27 = vld [vmem:[%s12514_s8 + $0x144] ss:$8 sps:$4 sm:$0xff]  }
 0x5a3   : > { %v4321_v37 = vsel %vm4295_vm7, %v4268_v32, %v4270_v33  ;;  %v9602_v32 = vld [vmem:[%s12514_s8 + $0x140] ss:$8 sps:$4 sm:$0xff]  }
 0x5a4   : > { %4449 = vst.msk [vmem:[#allocation2 + $0xc0] sm:$0xff] %vm4424_vm8, %v4416_v53  ;;  %v4385_v50 = vadd.f32 %v4321_v37, %v11216_v12  ;;  %v4272_v61 = vpop.permute.xlu0 %4271  ;;  %v9605_v53 = vld [vmem:[%s12514_s8 + $0x150] ss:$8 sps:$4 sm:$0xff]  }
 0x5a6   : > { %v4417_v31 = vmul.f32 0.5, %v4385_v50  ;;  %v4274_v6 = vpop.permute.xlu1 %4273  ;;  %v9610_v50 = vld [vmem:[%s12514_s8 + $0x164] ss:$8 sps:$4 sm:$0xff]  }
 0x5a7   : > { %v4322_v24 = vsel %vm4295_vm7, %v4272_v61, %v4274_v6  ;;  %v4481_v52 = vld [vmem:[#allocation2 + $0xb0] ss:$2 sm:$0xff]  ;;  %v4513_v55 = vld [vmem:[#allocation2 + $0xb1] ss:$2 sm:$0xff] }
 0x5a8   : > { %4450 = vst.msk [vmem:[#allocation2 + $0xc8] sm:$0xff] %vm4424_vm8, %v4417_v31  ;;  %v4386_v40 = vadd.f32 %v4322_v24, %v11222_v62  ;;  %v4276_v21 = vpop.permute.xlu0 %4275  ;;  %v4533_v36 = vmax.f32 %v4481_v52, %v4513_v55  ;;  %v9592_v62 = vld [vmem:[%s12514_s8 + $0x104] ss:$8 sps:$4 sm:$0xff]   ;;  %v9613_v24 = vld [vmem:[%s12514_s8 + $0x174] ss:$8 sps:$4 sm:$0xff]  }
 0x5a9   : > { %5150 = vmatprep.subr.bf16.mxu1 %v9592_v62  ;;  %v9611_v52 = vld [vmem:[%s12514_s8 + $0x170] ss:$8 sps:$4 sm:$0xff]  }
 0x5aa   : > { %v4418_v14 = vmul.f32 0.5, %v4386_v40  ;;  %v4278_v5 = vpop.permute.xlu1 %4277  ;;  %v4543_v57 = vpack.c.bf16 %v4533_v36, %v4532_v30  ;;  %5151 = vmatpush1.bf16.msra.mxu1 %v9590_v35  ;;  %v9616_v40 = vld [vmem:[%s12514_s8 + $0x4] ss:$8 sps:$4 sm:$0xff]  }
 0x5ab   : > { %v4323_v12 = vsel %vm4295_vm7, %v4276_v21, %v4278_v5  ;;  %5152 = vmatprep.subr.bf16.mxu1 %v9595_v51  ;;  %v4558_v21 = vld [vmem:[%s12513_s7] sm:$0x3] }
 0x5ac   : > { %4451 = vst.msk [vmem:[#allocation2 + $0xd0] sm:$0xff] %vm4424_vm8, %v4418_v14  ;;  %v4387_v56 = vadd.f32 %v4323_v12, %v11226_v48  ;;  %8421 = vmatmul.mubr.msk.bf16.gmra.mrb[84].mxu1 %vm4424_vm8, %v4543_v57  ;;  %v4280_v39 = vpop.permute.xlu0 %4279  ;;  %v11445_v30 = vrot.slane %v4558_v21, %v10364_v28  ;;  %v11448_v36 = vrot.slane %v4558_v21, %v10369_v29 }
 0x5ad   : > { %4746 = vmatprep.mubr.bf16.mxu1 %v9828_v2 }
 0x5ae   : > { %v4419_v0 = vmul.f32 0.5, %v4387_v56  ;;  %v4282_v63 = vpop.permute.xlu1 %4281  ;;  %5153 = vmatpush1.bf16.msra.mxu1 %v9593_v7 }
 0x5af   : > { %v4324_v34 = vsel %vm4295_vm7, %v4280_v39, %v4282_v63  ;;  %v4483_v16 = vld [vmem:[#allocation2 + $0xc0] ss:$2 sm:$0xff]  ;;  %v4515_v44 = vld [vmem:[#allocation2 + $0xc1] ss:$2 sm:$0xff]  ;;  %5154 = vmatprep.subr.bf16.mxu1 %v9598_v13 }
 0x5b0   : > { %4452 = vst.msk [vmem:[#allocation2 + $0xd8] sm:$0xff] %vm4424_vm8, %v4419_v0  ;;  %v4388_v48 = vadd.f32 %v4324_v34, %v11232_v60  ;;  %v4284_v47 = vpop.permute.xlu0 %4283  ;;  %v4534_v43 = vmax.f32 %v4483_v16, %v4515_v44 }
 0x5b2   : > { %v4420_v4 = vmul.f32 0.5, %v4388_v48  ;;  %v4286_v11 = vpop.permute.xlu1 %4285  ;;  %5155 = vmatpush1.bf16.msra.mxu1 %v9596_v15 }
 0x5b3   : > { %v4325_v8 = vsel %vm4295_vm7, %v4284_v47, %v4286_v11  ;;  %5156 = vmatprep.subr.bf16.mxu1 %v9601_v18 }
 0x5b4   : > { %4453 = vst.msk [vmem:[#allocation2 + $0xe0] sm:$0xff] %vm4424_vm8, %v4420_v4  ;;  %v4389_v42 = vadd.f32 %v4325_v8, %v11236_v26  ;;  %v4288_v60 = vpop.permute.xlu0 %4287 }
 0x5b6   : > { %v4421_v38 = vmul.f32 0.5, %v4389_v42  ;;  %v4290_v1 = vpop.permute.xlu1 %4289  ;;  %5157 = vmatpush1.bf16.msra.mxu1 %v9599_v23 }
 0x5b7   : > { %v4326_v9 = vsel %vm4295_vm7, %v4288_v60, %v4290_v1  ;;  %v4485_v41 = vld [vmem:[#allocation2 + $0xd0] ss:$2 sm:$0xff]  ;;  %v4517_v59 = vld [vmem:[#allocation2 + $0xd1] ss:$2 sm:$0xff]  ;;  %5158 = vmatprep.subr.bf16.mxu1 %v9604_v27 }
 0x5b8   : > { %4454 = vst.msk [vmem:[#allocation2 + $0xe8] sm:$0xff] %vm4424_vm8, %v4421_v38  ;;  %v4390_v26 = vadd.f32 %v4326_v9, %v11244_v17  ;;  %v4535_v54 = vmax.f32 %v4485_v41, %v4517_v59  ;;  %v4292_v20 = vpop.permute.xlu0 %4291 }
 0x5ba   : > { %v4422_v19 = vmul.f32 0.5, %v4390_v26  ;;  %v4294_v10 = vpop.permute.xlu1 %4293  ;;  %v4544_v25 = vpack.c.bf16 %v4535_v54, %v4534_v43  ;;  %5159 = vmatpush1.bf16.msra.mxu1 %v9602_v32  ;;  %v9619_v32 = vld [vmem:[%s12514_s8 + $0x14] ss:$8 sps:$4 sm:$0xff]  }
 0x5bb   : > { %v4327_v46 = vsel %vm4295_vm7, %v4292_v20, %v4294_v10 }
 0x5bc   : > { %4455 = vst.msk [vmem:[#allocation2 + $0xf0] sm:$0xff] %vm4424_vm8, %v4422_v19  ;;  %v4391_v17 = vadd.f32 %v4327_v46, %v11249_v3  ;;  %8422 = vmatmul.mubr.msk.bf16.gmra.mrb[88].mxu1 %vm4424_vm8, %v4544_v25  ;;  %v9607_v3 = vld [vmem:[%s12514_s8 + $0x154] ss:$8 sps:$4 sm:$0xff]  }
 0x5bd   : > { %4756 = vmatprep.mubr.bf16.mxu1 %v9828_v2  ;;  %5160 = vmatprep.subr.bf16.mxu1 %v9607_v3 }
 0x5be   : > { %v4423_v22 = vmul.f32 0.5, %v4391_v17  ;;  %5161 = vmatpush1.bf16.msra.mxu1 %v9605_v53 }
 0x5bf   : > { %v4487_v33 = vld [vmem:[#allocation2 + $0xe0] ss:$2 sm:$0xff]  ;;  %v4519_v37 = vld [vmem:[#allocation2 + $0xe1] ss:$2 sm:$0xff]  ;;  %5162 = vmatprep.subr.bf16.mxu1 %v9610_v50  ;;  %v9617_v50 = vld [vmem:[%s12514_s8 + $0x10] ss:$8 sps:$4 sm:$0xff]  }
 0x5c0   : > { %4457 = vst.msk [vmem:[#allocation2 + $0xf8] sm:$0xf] %vm4456_vm6, %v4423_v22  ;;  %v4536_v31 = vmax.f32 %v4487_v33, %v4519_v37  ;;  %v9614_v22 = vld [vmem:[%s12514_s8] ss:$8 sps:$4 sm:$0xff]  }
 0x5c2   : > { %5163 = vmatpush1.bf16.msra.mxu1 %v9608_v49  ;;  %v9622_v49 = vld [vmem:[%s12514_s8 + $0x24] ss:$8 sps:$4 sm:$0xff]  }
 0x5c3   : > { %5164 = vmatprep.subr.bf16.mxu1 %v9613_v24 }
 0x5c6   : > { %5165 = vmatpush1.bf16.msra.mxu1 %v9611_v52 }
 0x5c7   : > { %v4489_v61 = vld [vmem:[#allocation2 + $0xf0] ss:$2 sm:$0xff]  ;;  %v4521_v58 = vld [vmem:[#allocation2 + $0xf1] ss:$2 sm:$0xff]  ;;  %5391 = vmatprep.subr.bf16.mxu1 %v9616_v40  ;;  %v9620_v40 = vld [vmem:[%s12514_s8 + $0x20] ss:$8 sps:$4 sm:$0xff]  }
 0x5c8   : > { %v4537_v6 = vmax.f32 %v4489_v61, %v4521_v58 }
 0x5ca   : > { %v4545_v55 = vpack.c.bf16 %v4537_v6, %v4536_v31 }
 0x5cc   : > { %8423 = vmatmul.mubr.msk.bf16.gmra.mrb[92].mxu1 %vm4424_vm8, %v4545_v55 }
 0x62f   : > { %v4688_v14 = vpop.f32.mrb[64].mxu1 }
 0x630   : > { %v4689_v5 = vadd.f32 %v4688_v14, %v11445_v30  ;;  %v4690_v57 = vpop.f32.mrb[65].mxu1 }
 0x631   : > { %v4691_v12 = vadd.f32 %v4690_v57, %v11448_v36  ;;  %v4692_v56 = vpop.f32.mrb[66].mxu1 }
 0x632   : > { %v4693_v39 = vadd.f32 %v4692_v56, %v11445_v30  ;;  %v4694_v0 = vpop.f32.mrb[67].mxu1  ;;  %v4767_v62 = vmax.f32 %v4689_v5, 0.0  ;;  %v9625_v5 = vld [vmem:[%s12514_s8 + $0x34] ss:$8 sps:$4 sm:$0xff]  }
 0x633   : > { %v4695_v63 = vadd.f32 %v4694_v0, %v11448_v36  ;;  %v4768_v35 = vmax.f32 %v4691_v12, 0.0 }
 0x634   : > { %v4769_v34 = vmax.f32 %v4693_v39, 0.0  ;;  %v9623_v39 = vld [vmem:[%s12514_s8 + $0x30] ss:$8 sps:$4 sm:$0xff]  }
 0x635   : > { %v4770_v48 = vmax.f32 %v4695_v63, 0.0 }
 0x636   : > { %v11454_v47 = vpack.c.bf16 %v4769_v34, %v4767_v62  ;;  %v9628_v62 = vld [vmem:[%s12514_s8 + $0x44] ss:$8 sps:$4 sm:$0xff]  }
 0x637   : > { %v11456_v4 = vpack.c.bf16 %v4770_v48, %v4768_v35 }
 0x638   : > { %v4867_v1 = vshll.u32 %v11454_v47, 16  ;;  %v4865_v25 = vshrl.u32 %v11454_v47, 16 }
 0x639   : > { %v4879_v38 = vshll.u32 %v11456_v4, 16  ;;  %v4877_v20 = vshrl.u32 %v11456_v4, 16 }
 0x63a   : > { %v4869_v54 = vrot.slane %v4867_v1, 1  ;;  %v9629_v1 = vld [vmem:[%s12514_s8 + $0x50] ss:$8 sps:$4 sm:$0xff]  }
 0x63b   : > { %v4881_v43 = vrot.slane %v4879_v38, 1 }
 0x63c   : > { %v4870_v17 = vor.u32 %v4869_v54, %v4865_v25 }
 0x63d   : > { %v4882_v18 = vor.u32 %v4881_v43, %v4877_v20 }
 0x63f   : > { %v4698_v11 = vpop.f32.mrb[68].mxu1 }
 0x640   : > { %v4699_v51 = vadd.f32 %v4698_v11, %v11445_v30  ;;  %v4700_v8 = vpop.f32.mrb[69].mxu1 }
 0x641   : > { %v4701_v7 = vadd.f32 %v4700_v8, %v11448_v36  ;;  %v4702_v42 = vpop.f32.mrb[70].mxu1  ;;  %v9626_v8 = vld [vmem:[%s12514_s8 + $0x40] ss:$8 sps:$4 sm:$0xff]  }
 0x642   : > { %v4703_v60 = vadd.f32 %v4702_v42, %v11445_v30  ;;  %v4704_v16 = vpop.f32.mrb[71].mxu1  ;;  %v4771_v13 = vmax.f32 %v4699_v51, 0.0  ;;  %v9631_v42 = vld [vmem:[%s12514_s8 + $0x54] ss:$8 sps:$4 sm:$0xff]  }
 0x643   : > { %v4705_v44 = vadd.f32 %v4704_v16, %v11448_v36  ;;  %v4772_v41 = vmax.f32 %v4701_v7, 0.0 }
 0x644   : > { %v4773_v9 = vmax.f32 %v4703_v60, 0.0 }
 0x645   : > { %v4774_v59 = vmax.f32 %v4705_v44, 0.0 }
 0x646   : > { %v11464_v15 = vpack.c.bf16 %v4773_v9, %v4771_v13 }
 0x647   : > { %v11466_v26 = vpack.c.bf16 %v4774_v59, %v4772_v41  ;;  %v9634_v41 = vld [vmem:[%s12514_s8 + $0x64] ss:$8 sps:$4 sm:$0xff]  }
 0x648   : > { %v4872_v19 = vshll.u32 %v11464_v15, 16  ;;  %v4888_v34 = vshrl.u32 %v11464_v15, 16 }
 0x649   : > { %v4884_v10 = vshll.u32 %v11466_v26, 16  ;;  %v4896_v0 = vshrl.u32 %v11466_v26, 16 }
 0x64a   : > { %v4874_v23 = vrot.slane %v4872_v19, 1 }
 0x64b   : > { %v4886_v46 = vrot.slane %v4884_v10, 1  ;;  %v9632_v10 = vld [vmem:[%s12514_s8 + $0x60] ss:$8 sps:$4 sm:$0xff]  }
 0x64c   : > { %v4875_v3 = vsel %vm661_vm1, %v4870_v17, %v4874_v23  ;;  %v4890_v51 = vor.u32 %v4888_v34, %v4874_v23 }
 0x64d   : > { %v4887_v27 = vsel %vm661_vm1, %v4882_v18, %v4886_v46  ;;  %v4898_v48 = vor.u32 %v4896_v0, %v4886_v46  ;;  %v9637_v18 = vld [vmem:[%s12514_s8 + $0x74] ss:$8 sps:$4 sm:$0xff]  }
 0x64e   : > { %8472 = vmatprep.mubr.msk.bf16.mxu1 %vm3797_vm5, %v4887_v27  ;;  %v9635_v27 = vld [vmem:[%s12514_s8 + $0x70] ss:$8 sps:$4 sm:$0xff]  }
 0x64f   : > { %v4708_v53 = vpop.f32.mrb[72].mxu1  ;;  %5175 = vmatmul.mubr.bf16.vlgmr.msra.gmra.mrb[96].mxu1 %v4875_v3 }
 0x650   : > { %v4709_v33 = vadd.f32 %v4708_v53, %v11445_v30  ;;  %v4710_v37 = vpop.f32.mrb[73].mxu1  ;;  %5392 = vmatpush1.bf16.msra.mxu1 %v9614_v22  ;;  %v9640_v53 = vld [vmem:[%s12514_s8 + $0x84] ss:$8 sps:$4 sm:$0xff]  }
 0x651   : > { %v4711_v61 = vadd.f32 %v4710_v37, %v11448_v36  ;;  %v4712_v58 = vpop.f32.mrb[74].mxu1  ;;  %5393 = vmatprep.subr.bf16.mxu1 %v9619_v32 }
 0x652   : > { %v4713_v31 = vadd.f32 %v4712_v58, %v11445_v30  ;;  %v4714_v6 = vpop.f32.mrb[75].mxu1  ;;  %v4775_v52 = vmax.f32 %v4709_v33, 0.0 }
 0x653   : > { %v4715_v24 = vadd.f32 %v4714_v6, %v11448_v36  ;;  %v4776_v21 = vmax.f32 %v4711_v61, 0.0  ;;  %v9643_v6 = vld [vmem:[%s12514_s8 + $0x94] ss:$8 sps:$4 sm:$0xff]  }
 0x654   : > { %v4777_v55 = vmax.f32 %v4713_v31, 0.0  ;;  %5394 = vmatpush1.bf16.msra.mxu1 %v9617_v50 }
 0x655   : > { %v4778_v14 = vmax.f32 %v4715_v24, 0.0  ;;  %5395 = vmatprep.subr.bf16.mxu1 %v9622_v49  ;;  %v9638_v49 = vld [vmem:[%s12514_s8 + $0x80] ss:$8 sps:$4 sm:$0xff]  }
 0x656   : > { %v11497_v57 = vpack.c.bf16 %v4777_v55, %v4775_v52 }
 0x657   : > { %v11499_v12 = vpack.c.bf16 %v4778_v14, %v4776_v21  ;;  %v9641_v21 = vld [vmem:[%s12514_s8 + $0x90] ss:$8 sps:$4 sm:$0xff]  }
 0x658   : > { %v4892_v56 = vshll.u32 %v11497_v57, 16  ;;  %5396 = vmatpush1.bf16.msra.mxu1 %v9620_v40  ;;  %v4904_v33 = vshrl.u32 %v11497_v57, 16 }
 0x659   : > { %v4900_v63 = vshll.u32 %v11499_v12, 16  ;;  %5397 = vmatprep.subr.bf16.mxu1 %v9625_v5  ;;  %v4912_v32 = vshrl.u32 %v11499_v12, 16 }
 0x65a   : > { %v4894_v35 = vrot.slane %v4892_v56, 1  ;;  %v9646_v56 = vld [vmem:[%s12514_s8 + $0xa4] ss:$8 sps:$4 sm:$0xff]  }
 0x65b   : > { %v4902_v11 = vrot.slane %v4900_v63, 1 }
 0x65c   : > { %5398 = vmatpush1.bf16.msra.mxu1 %v9623_v39  ;;  %v4895_v60 = vsel %vm661_vm1, %v4890_v51, %v4894_v35  ;;  %v4906_v58 = vor.u32 %v4904_v33, %v4894_v35  ;;  %v9644_v35 = vld [vmem:[%s12514_s8 + $0xa0] ss:$8 sps:$4 sm:$0xff]   ;;  %v9649_v51 = vld [vmem:[%s12514_s8 + $0xb4] ss:$8 sps:$4 sm:$0xff]  }
 0x65d   : > { %v4903_v7 = vsel %vm661_vm1, %v4898_v48, %v4902_v11  ;;  %5399 = vmatprep.subr.bf16.mxu1 %v9628_v62  ;;  %v4914_v50 = vor.u32 %v4912_v32, %v4902_v11 }
 0x65e   : > { %8473 = vmatprep.mubr.msk.bf16.mxu1 %vm3797_vm5, %v4903_v7 }
 0x65f   : > { %v4718_v16 = vpop.f32.mrb[76].mxu1  ;;  %5185 = vmatmul.mubr.bf16.gmra.mrb[100].mxu1 %v4895_v60  ;;  %v9647_v60 = vld [vmem:[%s12514_s8 + $0xb0] ss:$8 sps:$4 sm:$0xff]  }
 0x660   : > { %v4719_v44 = vadd.f32 %v4718_v16, %v11445_v30  ;;  %v4720_v38 = vpop.f32.mrb[77].mxu1  ;;  %5400 = vmatpush1.bf16.msra.mxu1 %v9626_v8 }
 0x661   : > { %v4721_v13 = vadd.f32 %v4720_v38, %v11448_v36  ;;  %v4722_v9 = vpop.f32.mrb[78].mxu1  ;;  %5401 = vmatprep.subr.bf16.mxu1 %v9631_v42  ;;  %v9652_v38 = vld [vmem:[%s12514_s8 + $0x184] ss:$8 sps:$4 sm:$0xff]  }
 0x662   : > { %v4723_v59 = vadd.f32 %v4722_v9, %v11445_v30  ;;  %v4724_v43 = vpop.f32.mrb[79].mxu1  ;;  %v4779_v19 = vmax.f32 %v4719_v44, 0.0 }
 0x663   : > { %v4725_v54 = vadd.f32 %v4724_v43, %v11448_v36  ;;  %v4780_v25 = vmax.f32 %v4721_v13, 0.0 }
 0x664   : > { %v4781_v20 = vmax.f32 %v4723_v59, 0.0  ;;  %5402 = vmatpush1.bf16.msra.mxu1 %v9629_v1 }
 0x665   : > { %v4782_v23 = vmax.f32 %v4725_v54, 0.0  ;;  %5403 = vmatprep.subr.bf16.mxu1 %v9634_v41 }
 0x666   : > { %v11536_v46 = vpack.c.bf16 %v4781_v20, %v4779_v19 }
 0x667   : > { %v11538_v17 = vpack.c.bf16 %v4782_v23, %v4780_v25 }
 0x668   : > { %v4908_v22 = vshll.u32 %v11536_v46, 16  ;;  %5404 = vmatpush1.bf16.msra.mxu1 %v9632_v10  ;;  %v4920_v1 = vshrl.u32 %v11536_v46, 16 }
 0x669   : > { %v4916_v3 = vshll.u32 %v11538_v17, 16  ;;  %5405 = vmatprep.subr.bf16.mxu1 %v9637_v18  ;;  %v4928_v16 = vshrl.u32 %v11538_v17, 16 }
 0x66a   : > { %v4910_v37 = vrot.slane %v4908_v22, 1 }
 0x66b   : > { %v4918_v61 = vrot.slane %v4916_v3, 1 }
 0x66c   : > { %5406 = vmatpush1.bf16.msra.mxu1 %v9635_v27  ;;  %v4911_v24 = vsel %vm661_vm1, %v4906_v58, %v4910_v37  ;;  %v4922_v59 = vor.u32 %v4920_v1, %v4910_v37 }
 0x66d   : > { %v4919_v31 = vsel %vm661_vm1, %v4914_v50, %v4918_v61  ;;  %5407 = vmatprep.subr.bf16.mxu1 %v9640_v53  ;;  %v4930_v9 = vor.u32 %v4928_v16, %v4918_v61 }
 0x66e   : > { %8474 = vmatprep.mubr.msk.bf16.mxu1 %vm3797_vm5, %v4919_v31 }
 0x66f   : > { %v4728_v52 = vpop.f32.mrb[80].mxu1  ;;  %5195 = vmatmul.mubr.bf16.gmra.mrb[104].mxu1 %v4911_v24 }
 0x670   : > { %v4729_v55 = vadd.f32 %v4728_v52, %v11445_v30  ;;  %v4730_v40 = vpop.f32.mrb[81].mxu1  ;;  %5408 = vmatpush1.bf16.msra.mxu1 %v9638_v49 }
 0x671   : > { %v4731_v14 = vadd.f32 %v4730_v40, %v11448_v36  ;;  %v4732_v5 = vpop.f32.mrb[82].mxu1  ;;  %5409 = vmatprep.subr.bf16.mxu1 %v9643_v6 }
 0x672   : > { %v4733_v39 = vadd.f32 %v4732_v5, %v11445_v30  ;;  %v4734_v0 = vpop.f32.mrb[83].mxu1  ;;  %v4783_v62 = vmax.f32 %v4729_v55, 0.0 }
 0x673   : > { %v4735_v63 = vadd.f32 %v4734_v0, %v11448_v36  ;;  %v4784_v48 = vmax.f32 %v4731_v14, 0.0 }
 0x674   : > { %v4785_v34 = vmax.f32 %v4733_v39, 0.0  ;;  %5410 = vmatpush1.bf16.msra.mxu1 %v9641_v21 }
 0x675   : > { %v4786_v11 = vmax.f32 %v4735_v63, 0.0  ;;  %5411 = vmatprep.subr.bf16.mxu1 %v9646_v56 }
 0x676   : > { %v11575_v8 = vpack.c.bf16 %v4785_v34, %v4783_v62 }
 0x677   : > { %v11577_v7 = vpack.c.bf16 %v4786_v11, %v4784_v48 }
 0x678   : > { %v4924_v42 = vshll.u32 %v11575_v8, 16  ;;  %5412 = vmatpush1.bf16.msra.mxu1 %v9644_v35  ;;  %v4936_v31 = vshrl.u32 %v11575_v8, 16 }
 0x679   : > { %v4932_v44 = vshll.u32 %v11577_v7, 16  ;;  %5413 = vmatprep.subr.bf16.mxu1 %v9649_v51  ;;  %v4944_v58 = vshrl.u32 %v11577_v7, 16 }
 0x67a   : > { %v4926_v13 = vrot.slane %v4924_v42, 1 }
 0x67b   : > { %v4934_v41 = vrot.slane %v4932_v44, 1 }
 0x67c   : > { %5414 = vmatpush1.bf16.msra.mxu1 %v9647_v60  ;;  %v4927_v54 = vsel %vm661_vm1, %v4922_v59, %v4926_v13  ;;  %v4938_v55 = vor.u32 %v4936_v31, %v4926_v13 }
 0x67d   : > { %v4935_v43 = vsel %vm661_vm1, %v4930_v9, %v4934_v41  ;;  %5727 = vmatprep.subr.bf16.mxu1 %v9652_v38  ;;  %v4946_v24 = vor.u32 %v4944_v58, %v4934_v41 }
 0x67e   : > { %8475 = vmatprep.mubr.msk.bf16.mxu1 %vm3797_vm5, %v4935_v43 }
 0x67f   : > { %v4738_v19 = vpop.f32.mrb[84].mxu1  ;;  %5205 = vmatmul.mubr.bf16.gmra.mrb[108].mxu1 %v4927_v54 }
 0x680   : > { %v4739_v20 = vadd.f32 %v4738_v19, %v11445_v30  ;;  %v4740_v10 = vpop.f32.mrb[85].mxu1 }
 0x681   : > { %v4741_v25 = vadd.f32 %v4740_v10, %v11448_v36  ;;  %v4742_v23 = vpop.f32.mrb[86].mxu1 }
 0x682   : > { %v4743_v18 = vadd.f32 %v4742_v23, %v11445_v30  ;;  %v4744_v22 = vpop.f32.mrb[87].mxu1  ;;  %v4787_v32 = vmax.f32 %v4739_v20, 0.0 }
 0x683   : > { %v4745_v27 = vadd.f32 %v4744_v22, %v11448_v36  ;;  %v4788_v53 = vmax.f32 %v4741_v25, 0.0 }
 0x684   : > { %v4789_v3 = vmax.f32 %v4743_v18, 0.0 }
 0x685   : > { %v4790_v33 = vmax.f32 %v4745_v27, 0.0 }
 0x686   : > { %v11596_v37 = vpack.c.bf16 %v4789_v3, %v4787_v32 }
 0x687   : > { %v11598_v50 = vpack.c.bf16 %v4790_v33, %v4788_v53 }
 0x688   : > { %v4940_v61 = vshll.u32 %v11596_v37, 16  ;;  %v4952_v1 = vshrl.u32 %v11596_v37, 16 }
 0x689   : > { %v4948_v49 = vshll.u32 %v11598_v50, 16  ;;  %v4960_v44 = vshrl.u32 %v11598_v50, 16 }
 0x68a   : > { %v4942_v6 = vrot.slane %v4940_v61, 1 }
 0x68b   : > { %v4950_v52 = vrot.slane %v4948_v49, 1 }
 0x68c   : > { %v4943_v21 = vsel %vm661_vm1, %v4938_v55, %v4942_v6  ;;  %v4954_v59 = vor.u32 %v4952_v1, %v4942_v6  ;;  %v9659_v1 = vld [vmem:[%s12514_s8 + $0x1b0] ss:$8 sps:$4 sm:$0xff]  }
 0x68d   : > { %v4951_v40 = vsel %vm661_vm1, %v4946_v24, %v4950_v52  ;;  %v4962_v9 = vor.u32 %v4960_v44, %v4950_v52  ;;  %v9661_v44 = vld [vmem:[%s12514_s8 + $0x1b4] ss:$8 sps:$4 sm:$0xff]  }
 0x68e   : > { %8476 = vmatprep.mubr.msk.bf16.mxu1 %vm3797_vm5, %v4951_v40 }
 0x68f   : > { %v4748_v14 = vpop.f32.mrb[88].mxu1  ;;  %5215 = vmatmul.mubr.bf16.gmra.mrb[112].mxu1 %v4943_v21 }
 0x690   : > { %v4749_v5 = vadd.f32 %v4748_v14, %v11445_v30  ;;  %v4750_v56 = vpop.f32.mrb[89].mxu1 }
 0x691   : > { %v4751_v39 = vadd.f32 %v4750_v56, %v11448_v36  ;;  %v4752_v0 = vpop.f32.mrb[90].mxu1 }
 0x692   : > { %v4753_v63 = vadd.f32 %v4752_v0, %v11445_v30  ;;  %v4754_v62 = vpop.f32.mrb[91].mxu1  ;;  %v4791_v35 = vmax.f32 %v4749_v5, 0.0  ;;  %v9686_v0 = vld [vmem:[%s12516_s10 + $0x50] sm:$0xff]  }
 0x693   : > { %v4755_v34 = vadd.f32 %v4754_v62, %v11448_v36  ;;  %v4792_v11 = vmax.f32 %v4751_v39, 0.0  ;;  %6224 = vmatpush1.bf16.msra.mxu0 %v9686_v0  ;;  %v9650_v62 = vld [vmem:[%s12514_s8 + $0x180] ss:$8 sps:$4 sm:$0xff]  }
 0x694   : > { %v4793_v48 = vmax.f32 %v4753_v63, 0.0  ;;  %v9687_v63 = vld [vmem:[%s12516_s10 + $0x58] sm:$0xff]   ;;  %6225 = vmatprep.subr.bf16.mxu0 %v9828_v2 }
 0x695   : > { %v4794_v51 = vmax.f32 %v4755_v34, 0.0  ;;  %v9655_v34 = vld [vmem:[%s12514_s8 + $0x194] ss:$8 sps:$4 sm:$0xff]  }
 0x696   : > { %v11611_v42 = vpack.c.bf16 %v4793_v48, %v4791_v35  ;;  %v9688_v35 = vld [vmem:[%s12516_s10 + $0x60] sm:$0xff]   ;;  %v9653_v48 = vld [vmem:[%s12514_s8 + $0x190] ss:$8 sps:$4 sm:$0xff]  }
 0x697   : > { %v11613_v60 = vpack.c.bf16 %v4794_v51, %v4792_v11  ;;  %6226 = vmatpush1.bf16.msra.mxu0 %v9687_v63  ;;  %v9658_v11 = vld [vmem:[%s12514_s8 + $0x1a4] ss:$8 sps:$4 sm:$0xff]  }
 0x698   : > { %v4956_v16 = vshll.u32 %v11611_v42, 16  ;;  %v4968_v24 = vshrl.u32 %v11611_v42, 16  ;;  %6227 = vmatprep.subr.bf16.mxu0 %v9828_v2  ;;  %v9689_v51 = vld [vmem:[%s12516_s10 + $0x68] sm:$0xff]  }
 0x699   : > { %v4964_v38 = vshll.u32 %v11613_v60, 16  ;;  %v4976_v31 = vshrl.u32 %v11613_v60, 16 }
 0x69a   : > { %v4958_v13 = vrot.slane %v4956_v16, 1  ;;  %v9656_v16 = vld [vmem:[%s12514_s8 + $0x1a0] ss:$8 sps:$4 sm:$0xff]  }
 0x69b   : > { %v4966_v41 = vrot.slane %v4964_v38, 1  ;;  %6228 = vmatpush1.bf16.msra.mxu0 %v9688_v35  ;;  %v9690_v38 = vld [vmem:[%s12516_s10 + $0x70] sm:$0xff]  }
 0x69c   : > { %v4959_v54 = vsel %vm661_vm1, %v4954_v59, %v4958_v13  ;;  %v4970_v40 = vor.u32 %v4968_v24, %v4958_v13  ;;  %6229 = vmatprep.subr.bf16.mxu0 %v9828_v2  ;;  %v9664_v13 = vld [vmem:[%s12514_s8 + $0x1c4] ss:$8 sps:$4 sm:$0xff]   ;;  %v9667_v59 = vld [vmem:[%s12514_s8 + $0x1d4] ss:$8 sps:$4 sm:$0xff]   ;;  %v5548_v24 = vrot.slane %v11456_v4, 1 }
 0x69d   : > { %v4967_v43 = vsel %vm661_vm1, %v4962_v9, %v4966_v41  ;;  %v4978_v52 = vor.u32 %v4976_v31, %v4966_v41  ;;  %v9691_v9 = vld [vmem:[%s12516_s10 + $0x78] sm:$0xff]   ;;  %v9662_v41 = vld [vmem:[%s12514_s8 + $0x1c0] ss:$8 sps:$4 sm:$0xff]  }
 0x69e   : > { %8477 = vmatprep.mubr.msk.bf16.mxu1 %vm3797_vm5, %v4967_v43  ;;  %v9692_v43 = vld [vmem:[%s12516_s10 + $0x80] sm:$0xff]   ;;  %v9683_v31 = vld [vmem:[%s12514_s8 + $0x230] ss:$8 sps:$4 sm:$0xff]  }
 0x69f   : > { %v4758_v19 = vpop.f32.mrb[92].mxu1  ;;  %5225 = vmatmul.mubr.bf16.gmra.mrb[116].mxu1 %v4959_v54  ;;  %6230 = vmatpush1.bf16.msra.mxu0 %v9689_v51  ;;  %v9665_v54 = vld [vmem:[%s12514_s8 + $0x1d0] ss:$8 sps:$4 sm:$0xff]  }
 0x6a0   : > { %v4759_v20 = vadd.f32 %v4758_v19, %v11445_v30  ;;  %v4760_v10 = vpop.f32.mrb[93].mxu1  ;;  %6231 = vmatprep.subr.bf16.mxu0 %v9828_v2  ;;  %v9670_v19 = vld [vmem:[%s12514_s8 + $0x1e4] ss:$8 sps:$4 sm:$0xff]  }
 0x6a1   : > { %v4761_v25 = vadd.f32 %v4760_v10, %v11448_v36  ;;  %v4762_v23 = vpop.f32.mrb[94].mxu1  ;;  %v9668_v10 = vld [vmem:[%s12514_s8 + $0x1e0] ss:$8 sps:$4 sm:$0xff]  }
 0x6a2   : > { %v4763_v18 = vadd.f32 %v4762_v23, %v11445_v30  ;;  %v4764_v22 = vpop.f32.mrb[95].mxu1  ;;  %v4795_v32 = vmax.f32 %v4759_v20, 0.0  ;;  %v9693_v20 = vld [vmem:[%s12516_s10 + $0x88] sm:$0xff]   ;;  %v9694_v23 = vld [vmem:[%s12516_s10 + $0x90] sm:$0xff]  }
 0x6a3   : > { %v4765_v27 = vadd.f32 %v4764_v22, %v11448_v36  ;;  %v4796_v53 = vmax.f32 %v4761_v25, 0.0  ;;  %6232 = vmatpush1.bf16.msra.mxu0 %v9690_v38  ;;  %v9673_v25 = vld [vmem:[%s12514_s8 + $0x1f4] ss:$8 sps:$4 sm:$0xff]   ;;  %v9676_v22 = vld [vmem:[%s12514_s8 + $0x204] ss:$8 sps:$4 sm:$0xff]  }
 0x6a4   : > { %v4797_v3 = vmax.f32 %v4763_v18, 0.0  ;;  %6233 = vmatprep.subr.bf16.mxu0 %v9828_v2  ;;  %v9671_v18 = vld [vmem:[%s12514_s8 + $0x1f0] ss:$8 sps:$4 sm:$0xff]  }
 0x6a5   : > { %v4798_v33 = vmax.f32 %v4765_v27, 0.0  ;;  %v9674_v27 = vld [vmem:[%s12514_s8 + $0x200] ss:$8 sps:$4 sm:$0xff]  }
 0x6a6   : > { %v11626_v61 = vpack.c.bf16 %v4797_v3, %v4795_v32  ;;  %v9679_v32 = vld [vmem:[%s12514_s8 + $0x214] ss:$8 sps:$4 sm:$0xff]   ;;  %v9677_v3 = vld [vmem:[%s12514_s8 + $0x210] ss:$8 sps:$4 sm:$0xff]  }
 0x6a7   : > { %v11628_v58 = vpack.c.bf16 %v4798_v33, %v4796_v53  ;;  %6234 = vmatpush1.bf16.msra.mxu0 %v9691_v9  ;;  %v9682_v53 = vld [vmem:[%s12514_s8 + $0x224] ss:$8 sps:$4 sm:$0xff]   ;;  %v9680_v33 = vld [vmem:[%s12514_s8 + $0x220] ss:$8 sps:$4 sm:$0xff]  }
 0x6a8   : > { %v4972_v49 = vshll.u32 %v11626_v61, 16  ;;  %v4984_v56 = vshrl.u32 %v11626_v61, 16  ;;  %6235 = vmatprep.subr.bf16.mxu0 %v9828_v2 }
 0x6a9   : > { %v4980_v6 = vshll.u32 %v11628_v58, 16  ;;  %v4987_v36 = vshrl.u32 %v11628_v58, 16 }
 0x6aa   : > { %v4974_v30 = vrot.slane %v4972_v49, 1  ;;  %v9685_v49 = vld [vmem:[%s12514_s8 + $0x234] ss:$8 sps:$4 sm:$0xff]  }
 0x6ab   : > { %v4982_v55 = vrot.slane %v4980_v6, 1  ;;  %6236 = vmatpush1.bf16.msra.mxu0 %v9692_v43  ;;  %v5549_v6 = vrot.slane %v11466_v26, 1 }
 0x6ac   : > { %v4975_v5 = vsel %vm661_vm1, %v4970_v40, %v4974_v30  ;;  %v4986_v39 = vor.u32 %v4984_v56, %v4974_v30  ;;  %6237 = vmatprep.subr.bf16.mxu0 %v9828_v2 }
 0x6ad   : > { %v4983_v21 = vsel %vm661_vm1, %v4978_v52, %v4982_v55  ;;  %v4989_v14 = vor.u32 %v4987_v36, %v4982_v55  ;;  %v5550_v30 = vsel %vm1326_vm3, %v5548_v24, %v5549_v6  ;;  %v5546_v52 = vrot.slane %v11464_v15, 1 }
 0x6ae   : > { %8478 = vmatprep.mubr.msk.bf16.mxu1 %vm3797_vm5, %v4983_v21  ;;  %v5553_v55 = vrot.slane %v11499_v12, 1  ;;  %v5545_v36 = vrot.slane %v11454_v47, 1 }
 0x6af   : > { %5235 = vmatmul.mubr.bf16.gmra.mrb[120].mxu1 %v4975_v5  ;;  %6238 = vmatpush1.bf16.msra.mxu0 %v9693_v20 }
 0x6b0   : > { %8479 = vmatprep.mubr.msk.bf16.mxu1 %vm3797_vm5, %v4989_v14  ;;  %6239 = vmatprep.subr.bf16.mxu0 %v9828_v2  ;;  %v5547_v40 = vsel %vm1326_vm3, %v5545_v36, %v5546_v52  ;;  %v5554_v21 = vsel %vm1326_vm3, %v5549_v6, %v5553_v55 }
 0x6b3   : > { %6240 = vmatpush1.bf16.msra.mxu0 %v9694_v23 }
 0x6b4   : > { %6241 = vmatprep.subr.bf16.mxu0 %v9828_v2 }
 0x6b7   : > { %5245 = vmatmul.mubr.bf16.gmra.mrb[124].mxu1 %v4986_v39 }
 0x6b8   : > { %8504 = vmatprep.mubr.msk.bf16.mxu1 %vm3797_vm5, %v11456_v4  ;;  %v5551_v4 = vrot.slane %v11497_v57, 1 }
 0x6ba   : > { %v5552_v14 = vsel %vm1326_vm3, %v5546_v52, %v5551_v4 }
 0x6bf   : > { %5424 = vmatmul.mubr.bf16.vlgmr.msra.gmra.mrb[96].mxu1 %v11454_v47  ;;  %v5555_v47 = vrot.slane %v11536_v46, 1 }
 0x6c0   : > { %5728 = vmatpush1.bf16.msra.mxu1 %v9650_v62  ;;  %8505 = vmatprep.mubr.msk.bf16.mxu1 %vm3797_vm5, %v11466_v26  ;;  %v5557_v26 = vrot.slane %v11538_v17, 1 }
 0x6c1   : > { %5729 = vmatprep.subr.bf16.mxu1 %v9655_v34  ;;  %v5556_v5 = vsel %vm1326_vm3, %v5551_v4, %v5555_v47 }
 0x6c4   : > { %5730 = vmatpush1.bf16.msra.mxu1 %v9653_v48 }
 0x6c5   : > { %5731 = vmatprep.subr.bf16.mxu1 %v9658_v11 }
 0x6c7   : > { %5434 = vmatmul.mubr.bf16.gmra.mrb[100].mxu1 %v11464_v15  ;;  %v5558_v15 = vsel %vm1326_vm3, %v5553_v55, %v5557_v26 }
 0x6c8   : > { %8506 = vmatprep.mubr.msk.bf16.mxu1 %vm3797_vm5, %v11499_v12  ;;  %5732 = vmatpush1.bf16.msra.mxu1 %v9656_v16  ;;  %v5561_v12 = vrot.slane %v11577_v7, 1 }
 0x6c9   : > { %5733 = vmatprep.subr.bf16.mxu1 %v9661_v44 }
 0x6ca   : > { %v5562_v56 = vsel %vm1326_vm3, %v5557_v26, %v5561_v12 }
 0x6cc   : > { %5734 = vmatpush1.bf16.msra.mxu1 %v9659_v1 }
 0x6cd   : > { %5735 = vmatprep.subr.bf16.mxu1 %v9664_v13 }
 0x6cf   : > { %5444 = vmatmul.mubr.bf16.gmra.mrb[104].mxu1 %v11497_v57  ;;  %v5559_v57 = vrot.slane %v11575_v8, 1 }
 0x6d0   : > { %8507 = vmatprep.mubr.msk.bf16.mxu1 %vm3797_vm5, %v11538_v17  ;;  %5736 = vmatpush1.bf16.msra.mxu1 %v9662_v41  ;;  %v5565_v17 = vrot.slane %v11598_v50, 1 }
 0x6d1   : > { %5737 = vmatprep.subr.bf16.mxu1 %v9667_v59  ;;  %v5560_v39 = vsel %vm1326_vm3, %v5555_v47, %v5559_v57 }
 0x6d2   : > { %v5566_v0 = vsel %vm1326_vm3, %v5561_v12, %v5565_v17 }
 0x6d4   : > { %5738 = vmatpush1.bf16.msra.mxu1 %v9665_v54 }
 0x6d5   : > { %5739 = vmatprep.subr.bf16.mxu1 %v9670_v19 }
 0x6d7   : > { %5454 = vmatmul.mubr.bf16.gmra.mrb[108].mxu1 %v11536_v46  ;;  %v5563_v46 = vrot.slane %v11596_v37, 1 }
 0x6d8   : > { %8508 = vmatprep.mubr.msk.bf16.mxu1 %vm3797_vm5, %v11577_v7  ;;  %5740 = vmatpush1.bf16.msra.mxu1 %v9668_v10  ;;  %v5569_v7 = vrot.slane %v11613_v60, 1 }
 0x6d9   : > { %5741 = vmatprep.subr.bf16.mxu1 %v9673_v25  ;;  %v5564_v63 = vsel %vm1326_vm3, %v5559_v57, %v5563_v46 }
 0x6da   : > { %v5570_v62 = vsel %vm1326_vm3, %v5565_v17, %v5569_v7 }
 0x6dc   : > { %5742 = vmatpush1.bf16.msra.mxu1 %v9671_v18 }
 0x6dd   : > { %5743 = vmatprep.subr.bf16.mxu1 %v9676_v22 }
 0x6df   : > { %5464 = vmatmul.mubr.bf16.gmra.mrb[112].mxu1 %v11575_v8  ;;  %v5567_v8 = vrot.slane %v11611_v42, 1 }
 0x6e0   : > { %8509 = vmatprep.mubr.msk.bf16.mxu1 %vm3797_vm5, %v11598_v50  ;;  %5744 = vmatpush1.bf16.msra.mxu1 %v9674_v27  ;;  %v5573_v50 = vrot.slane %v11628_v58, 1 }
 0x6e1   : > { %5745 = vmatprep.subr.bf16.mxu1 %v9679_v32  ;;  %v5568_v34 = vsel %vm1326_vm3, %v5563_v46, %v5567_v8 }
 0x6e2   : > { %v5574_v35 = vsel %vm1326_vm3, %v5569_v7, %v5573_v50 }
 0x6e4   : > { %5746 = vmatpush1.bf16.msra.mxu1 %v9677_v3 }
 0x6e5   : > { %5747 = vmatprep.subr.bf16.mxu1 %v9682_v53 }
 0x6e7   : > { %5474 = vmatmul.mubr.bf16.gmra.mrb[116].mxu1 %v11596_v37  ;;  %v5571_v37 = vrot.slane %v11626_v61, 1 }
 0x6e8   : > { %8510 = vmatprep.mubr.msk.bf16.mxu1 %vm3797_vm5, %v11613_v60  ;;  %5748 = vmatpush1.bf16.msra.mxu1 %v9680_v33 }
 0x6e9   : > { %5749 = vmatprep.subr.bf16.mxu1 %v9685_v49  ;;  %v5572_v60 = vsel %vm1326_vm3, %v5567_v8, %v5571_v37 }
 0x6ec   : > { %5750 = vmatpush1.bf16.msra.mxu1 %v9683_v31 }
 0x6ed   : > { %8890 = vmatprep.subr.bf16.mxu1 %v9728_v45 }
 0x6ef   : > { %5484 = vmatmul.mubr.bf16.gmra.mrb[120].mxu1 %v11611_v42  ;;  %v9695_v42 = vld [vmem:[%s12516_s10 + $0x98] sm:$0xff]  }
 0x6f0   : > { %8511 = vmatprep.mubr.msk.bf16.mxu1 %vm3797_vm5, %v11628_v58  ;;  %6242 = vmatpush1.bf16.msra.mxu0 %v9695_v42  ;;  %v5872_v58 = vld [vmem:[%s12515_s9] sm:$0x3] }
 0x6f1   : > { %6396 = vmatprep.subr.bf16.mxu0 %v9828_v2  ;;  %v11815_v48 = vrot.slane %v5872_v58, %v10364_v28 }
 0x6f7   : > { %5494 = vmatmul.mubr.bf16.gmra.mrb[124].mxu1 %v11626_v61  ;;  %v11818_v61 = vrot.slane %v5872_v58, %v10369_v29 }
 0x6f8   : > { %8560 = vmatprep.mubr.msk.bf16.mxu1 %vm3797_vm5, %v5550_v30 }
 0x6ff   : > { %5760 = vmatmul.mubr.bf16.vlgmr.msra.gmra.mrb[96].mxu1 %v5547_v40 }
 0x700   : > { %8561 = vmatprep.mubr.msk.bf16.mxu1 %vm3797_vm5, %v5554_v21  ;;  %8891 = vmatpush3.bf16.msra.mxu1 %v9728_v45 }
 0x707   : > { %5770 = vmatmul.mubr.bf16.gmra.mrb[100].mxu1 %v5552_v14 }
 0x708   : > { %8562 = vmatprep.mubr.msk.bf16.mxu1 %vm3797_vm5, %v5558_v15 }
 0x70f   : > { %5780 = vmatmul.mubr.bf16.gmra.mrb[104].mxu1 %v5556_v5 }
 0x710   : > { %8563 = vmatprep.mubr.msk.bf16.mxu1 %vm3797_vm5, %v5562_v56 }
 0x717   : > { %5790 = vmatmul.mubr.bf16.gmra.mrb[108].mxu1 %v5560_v39 }
 0x718   : > { %8564 = vmatprep.mubr.msk.bf16.mxu1 %vm3797_vm5, %v5566_v0 }
 0x71f   : > { %5800 = vmatmul.mubr.bf16.gmra.mrb[112].mxu1 %v5564_v63  ;;  %v9696_v63 = vld [vmem:[%s12516_s10] sm:$0xff]  }
 0x720   : > { %8565 = vmatprep.mubr.msk.bf16.mxu1 %vm3797_vm5, %v5570_v62 }
 0x727   : > { %5810 = vmatmul.mubr.bf16.gmra.mrb[116].mxu1 %v5568_v34 }
 0x728   : > { %8566 = vmatprep.mubr.msk.bf16.mxu1 %vm3797_vm5, %v5574_v35 }
 0x72f   : > { %5820 = vmatmul.mubr.bf16.gmra.mrb[120].mxu1 %v5572_v60 }
 0x730   : > { %8567 = vmatprep.mubr.msk.bf16.mxu1 %vm3797_vm5, %v5573_v50 }
 0x737   : > { %5830 = vmatmul.mubr.bf16.gmra.mrb[124].mxu1 %v5571_v37 }
 0x7d2   : > { %v5761_v11 = vpop.f32.mrb[96].mxu1 }
 0x7d3   : > { %v5884_v51 = vadd.f32 %v11815_v48, %v5761_v11  ;;  %v5763_v16 = vpop.f32.mrb[97].mxu1  ;;  %v9697_v11 = vld [vmem:[%s12516_s10 + $0x8] sm:$0xff]  }
 0x7d4   : > { %v5885_v44 = vadd.f32 %v11818_v61, %v5763_v16  ;;  %v5765_v38 = vpop.f32.mrb[98].mxu1 }
 0x7d5   : > { %v5886_v1 = vadd.f32 %v11815_v48, %v5765_v38  ;;  %v5767_v13 = vpop.f32.mrb[99].mxu1  ;;  %v5916_v41 = vmax.f32 %v5884_v51, 0.0 }
 0x7d6   : > { %v5887_v9 = vadd.f32 %v11818_v61, %v5767_v13  ;;  %v5917_v43 = vmax.f32 %v5885_v44, 0.0 }
 0x7d7   : > { %v5918_v59 = vmax.f32 %v5886_v1, 0.0 }
 0x7d8   : > { %v5919_v28 = vmax.f32 %v5887_v9, 0.0 }
 0x7d9   : > { %v11824_v54 = vpack.c.bf16 %v5918_v59, %v5916_v41 }
 0x7da   : > { %v11826_v29 = vpack.c.bf16 %v5919_v28, %v5917_v43  ;;  %v5771_v19 = vpop.f32.mrb[100].mxu1 }
 0x7db   : > { %v5888_v20 = vadd.f32 %v11815_v48, %v5771_v19  ;;  %v5773_v10 = vpop.f32.mrb[101].mxu1  ;;  %v6008_v3 = vshll.u32 %v11824_v54, 16  ;;  %v6006_v47 = vshrl.u32 %v11824_v54, 16 }
 0x7dc   : > { %v5889_v25 = vadd.f32 %v11818_v61, %v5773_v10  ;;  %v5775_v23 = vpop.f32.mrb[102].mxu1  ;;  %v6020_v32 = vshll.u32 %v11826_v29, 16  ;;  %v6018_v14 = vshrl.u32 %v11826_v29, 16 }
 0x7dd   : > { %v5890_v18 = vadd.f32 %v11815_v48, %v5775_v23  ;;  %v5777_v22 = vpop.f32.mrb[103].mxu1  ;;  %v5920_v53 = vmax.f32 %v5888_v20, 0.0  ;;  %v6010_v55 = vrot.slane %v6008_v3, 1  ;;  %v9698_v23 = vld [vmem:[%s12516_s10 + $0x10] sm:$0xff]  }
 0x7de   : > { %v5891_v27 = vadd.f32 %v11818_v61, %v5777_v22  ;;  %v5921_v49 = vmax.f32 %v5889_v25, 0.0  ;;  %v6022_v52 = vrot.slane %v6020_v32, 1 }
 0x7df   : > { %v5922_v33 = vmax.f32 %v5890_v18, 0.0  ;;  %v6011_v7 = vor.u32 %v6010_v55, %v6006_v47 }
 0x7e0   : > { %v5923_v31 = vmax.f32 %v5891_v27, 0.0  ;;  %v6023_v17 = vor.u32 %v6022_v52, %v6018_v14  ;;  %v9699_v52 = vld [vmem:[%s12516_s10 + $0x18] sm:$0xff]  }
 0x7e1   : > { %v11834_v6 = vpack.c.bf16 %v5922_v33, %v5920_v53 }
 0x7e2   : > { %v11836_v24 = vpack.c.bf16 %v5923_v31, %v5921_v49  ;;  %v5781_v30 = vpop.f32.mrb[104].mxu1 }
 0x7e3   : > { %v5892_v36 = vadd.f32 %v11815_v48, %v5781_v30  ;;  %v5783_v40 = vpop.f32.mrb[105].mxu1  ;;  %v6013_v21 = vshll.u32 %v11834_v6, 16  ;;  %v6029_v41 = vshrl.u32 %v11834_v6, 16 }
 0x7e4   : > { %v5893_v4 = vadd.f32 %v11818_v61, %v5783_v40  ;;  %v5785_v26 = vpop.f32.mrb[106].mxu1  ;;  %v6025_v15 = vshll.u32 %v11836_v24, 16  ;;  %v6037_v38 = vshrl.u32 %v11836_v24, 16 }
 0x7e5   : > { %v5894_v12 = vadd.f32 %v11815_v48, %v5785_v26  ;;  %v5787_v5 = vpop.f32.mrb[107].mxu1  ;;  %v6015_v56 = vrot.slane %v6013_v21, 1  ;;  %v5924_v0 = vmax.f32 %v5892_v36, 0.0 }
 0x7e6   : > { %v5895_v57 = vadd.f32 %v11818_v61, %v5787_v5  ;;  %v6027_v39 = vrot.slane %v6025_v15, 1  ;;  %v5925_v62 = vmax.f32 %v5893_v4, 0.0 }
 0x7e7   : > { %v5926_v46 = vmax.f32 %v5894_v12, 0.0  ;;  %v6016_v35 = vsel %vm661_vm1, %v6011_v7, %v6015_v56  ;;  %v6031_v25 = vor.u32 %v6029_v41, %v6015_v56 }
 0x7e8   : > { %v5927_v8 = vmax.f32 %v5895_v57, 0.0  ;;  %v6028_v50 = vsel %vm661_vm1, %v6023_v17, %v6027_v39  ;;  %v6039_v28 = vor.u32 %v6037_v38, %v6027_v39  ;;  %v9700_v39 = vld [vmem:[%s12516_s10 + $0x20] sm:$0xff]  }
 0x7e9   : > { %v11850_v34 = vpack.c.bf16 %v5926_v46, %v5924_v0  ;;  %8598 = vmatprep.mubr.msk.bf16.mxu0 %vm4295_vm7, %v6028_v50 }
 0x7ea   : > { %v11854_v37 = vpack.c.bf16 %v5927_v8, %v5925_v62  ;;  %v5791_v60 = vpop.f32.mrb[108].mxu1  ;;  %6256 = vmatmul.mubr.bf16.vlgmr.msra.gmra.mrb[128].mxu0 %v6016_v35 }
 0x7eb   : > { %v5896_v42 = vadd.f32 %v11815_v48, %v5791_v60  ;;  %6397 = vmatpush1.bf16.msra.mxu0 %v9696_v63  ;;  %v5793_v58 = vpop.f32.mrb[109].mxu1  ;;  %v6033_v51 = vshll.u32 %v11850_v34, 16  ;;  %v6045_v14 = vshrl.u32 %v11850_v34, 16 }
 0x7ec   : > { %v5897_v16 = vadd.f32 %v11818_v61, %v5793_v58  ;;  %v5795_v44 = vpop.f32.mrb[110].mxu1  ;;  %6398 = vmatprep.subr.bf16.mxu0 %v9828_v2  ;;  %v6041_v1 = vshll.u32 %v11854_v37, 16  ;;  %v6053_v40 = vshrl.u32 %v11854_v37, 16  ;;  %v9701_v58 = vld [vmem:[%s12516_s10 + $0x28] sm:$0xff]  }
 0x7ed   : > { %v5898_v13 = vadd.f32 %v11815_v48, %v5795_v44  ;;  %v5797_v9 = vpop.f32.mrb[111].mxu1  ;;  %v6035_v59 = vrot.slane %v6033_v51, 1  ;;  %v5928_v20 = vmax.f32 %v5896_v42, 0.0 }
 0x7ee   : > { %v5899_v43 = vadd.f32 %v11818_v61, %v5797_v9  ;;  %v6043_v19 = vrot.slane %v6041_v1, 1  ;;  %v5929_v18 = vmax.f32 %v5897_v16, 0.0 }
 0x7ef   : > { %v5930_v10 = vmax.f32 %v5898_v13, 0.0  ;;  %6399 = vmatpush1.bf16.msra.mxu0 %v9697_v11  ;;  %v6036_v3 = vsel %vm661_vm1, %v6031_v25, %v6035_v59  ;;  %v6047_v17 = vor.u32 %v6045_v14, %v6035_v59 }
 0x7f0   : > { %v5931_v22 = vmax.f32 %v5899_v43, 0.0  ;;  %v6044_v27 = vsel %vm661_vm1, %v6039_v28, %v6043_v19  ;;  %6400 = vmatprep.subr.bf16.mxu0 %v9828_v2  ;;  %v6055_v12 = vor.u32 %v6053_v40, %v6043_v19 }
 0x7f1   : > { %v11873_v32 = vpack.c.bf16 %v5930_v10, %v5928_v20  ;;  %8599 = vmatprep.mubr.msk.bf16.mxu0 %vm4295_vm7, %v6044_v27  ;;  %v9702_v10 = vld [vmem:[%s12516_s10 + $0x30] sm:$0xff]  }
 0x7f2   : > { %v11877_v53 = vpack.c.bf16 %v5931_v22, %v5929_v18  ;;  %v5801_v33 = vpop.f32.mrb[112].mxu1  ;;  %6264 = vmatmul.mubr.bf16.gmra.mrb[132].mxu0 %v6036_v3 }
 0x7f3   : > { %v5900_v49 = vadd.f32 %v11815_v48, %v5801_v33  ;;  %v5803_v31 = vpop.f32.mrb[113].mxu1  ;;  %6401 = vmatpush1.bf16.msra.mxu0 %v9698_v23  ;;  %v6049_v30 = vshll.u32 %v11873_v32, 16  ;;  %v6061_v13 = vshrl.u32 %v11873_v32, 16 }
 0x7f4   : > { %v5901_v55 = vadd.f32 %v11818_v61, %v5803_v31  ;;  %v5805_v36 = vpop.f32.mrb[114].mxu1  ;;  %v6057_v21 = vshll.u32 %v11877_v53, 16  ;;  %6402 = vmatprep.subr.bf16.mxu0 %v9828_v2  ;;  %v6069_v16 = vshrl.u32 %v11877_v53, 16 }
 0x7f5   : > { %v5902_v4 = vadd.f32 %v11815_v48, %v5805_v36  ;;  %v5807_v26 = vpop.f32.mrb[115].mxu1  ;;  %v6051_v15 = vrot.slane %v6049_v30, 1  ;;  %v5932_v56 = vmax.f32 %v5900_v49, 0.0 }
 0x7f6   : > { %v5903_v47 = vadd.f32 %v11818_v61, %v5807_v26  ;;  %v6059_v5 = vrot.slane %v6057_v21, 1  ;;  %v5933_v0 = vmax.f32 %v5901_v55, 0.0 }
 0x7f7   : > { %v5934_v57 = vmax.f32 %v5902_v4, 0.0  ;;  %6403 = vmatpush1.bf16.msra.mxu0 %v9699_v52  ;;  %v6052_v62 = vsel %vm661_vm1, %v6047_v17, %v6051_v15  ;;  %v6063_v20 = vor.u32 %v6061_v13, %v6051_v15  ;;  %v9703_v52 = vld [vmem:[%s12516_s10 + $0x38] sm:$0xff]  }
 0x7f8   : > { %v5935_v46 = vmax.f32 %v5903_v47, 0.0  ;;  %v6060_v7 = vsel %vm661_vm1, %v6055_v12, %v6059_v5  ;;  %6404 = vmatprep.subr.bf16.mxu0 %v9828_v2  ;;  %v6071_v59 = vor.u32 %v6069_v16, %v6059_v5 }
 0x7f9   : > { %v11896_v63 = vpack.c.bf16 %v5934_v57, %v5932_v56  ;;  %8600 = vmatprep.mubr.msk.bf16.mxu0 %vm4295_vm7, %v6060_v7 }
 0x7fa   : > { %v11900_v8 = vpack.c.bf16 %v5935_v46, %v5933_v0  ;;  %v5811_v50 = vpop.f32.mrb[116].mxu1  ;;  %6272 = vmatmul.mubr.bf16.gmra.mrb[136].mxu0 %v6052_v62 }
 0x7fb   : > { %v5904_v35 = vadd.f32 %v11815_v48, %v5811_v50  ;;  %v5813_v60 = vpop.f32.mrb[117].mxu1  ;;  %v6065_v42 = vshll.u32 %v11896_v63, 16  ;;  %6405 = vmatpush1.bf16.msra.mxu0 %v9700_v39  ;;  %v6077_v14 = vshrl.u32 %v11896_v63, 16  ;;  %v9704_v39 = vld [vmem:[%s12516_s10 + $0x40] sm:$0xff]  }
 0x7fc   : > { %v5905_v11 = vadd.f32 %v11818_v61, %v5813_v60  ;;  %v5815_v51 = vpop.f32.mrb[118].mxu1  ;;  %v6073_v44 = vshll.u32 %v11900_v8, 16  ;;  %6406 = vmatprep.subr.bf16.mxu0 %v9828_v2  ;;  %v6085_v40 = vshrl.u32 %v11900_v8, 16 }
 0x7fd   : > { %v5906_v38 = vadd.f32 %v11815_v48, %v5815_v51  ;;  %v5817_v1 = vpop.f32.mrb[119].mxu1  ;;  %v6067_v9 = vrot.slane %v6065_v42, 1  ;;  %v5936_v28 = vmax.f32 %v5904_v35, 0.0  ;;  %v9705_v51 = vld [vmem:[%s12516_s10 + $0x48] sm:$0xff]  }
 0x7fe   : > { %v5907_v41 = vadd.f32 %v11818_v61, %v5817_v1  ;;  %v6075_v43 = vrot.slane %v6073_v44, 1  ;;  %v5937_v25 = vmax.f32 %v5905_v11, 0.0 }
 0x7ff   : > { %v5938_v19 = vmax.f32 %v5906_v38, 0.0  ;;  %6407 = vmatpush1.bf16.msra.mxu0 %v9701_v58  ;;  %v6068_v27 = vsel %vm661_vm1, %v6063_v20, %v6067_v9  ;;  %v6079_v17 = vor.u32 %v6077_v14, %v6067_v9 }
 0x800   : > { %v5939_v23 = vmax.f32 %v5907_v41, 0.0  ;;  %v6076_v18 = vsel %vm661_vm1, %v6071_v59, %v6075_v43  ;;  %6408 = vmatprep.subr.bf16.mxu0 %v9828_v2  ;;  %v6087_v12 = vor.u32 %v6085_v40, %v6075_v43 }
 0x801   : > { %v11919_v22 = vpack.c.bf16 %v5938_v19, %v5936_v28  ;;  %8601 = vmatprep.mubr.msk.bf16.mxu0 %vm4295_vm7, %v6076_v18 }
 0x802   : > { %v11923_v3 = vpack.c.bf16 %v5939_v23, %v5937_v25  ;;  %v5821_v33 = vpop.f32.mrb[120].mxu1  ;;  %6280 = vmatmul.mubr.bf16.gmra.mrb[140].mxu0 %v6068_v27 }
 0x803   : > { %v5908_v49 = vadd.f32 %v11815_v48, %v5821_v33  ;;  %v5823_v31 = vpop.f32.mrb[121].mxu1  ;;  %v6081_v30 = vshll.u32 %v11919_v22, 16  ;;  %6409 = vmatpush1.bf16.msra.mxu0 %v9702_v10  ;;  %v6093_v41 = vshrl.u32 %v11919_v22, 16 }
 0x804   : > { %v5909_v55 = vadd.f32 %v11818_v61, %v5823_v31  ;;  %v5825_v36 = vpop.f32.mrb[122].mxu1  ;;  %v6089_v21 = vshll.u32 %v11923_v3, 16  ;;  %6410 = vmatprep.subr.bf16.mxu0 %v9828_v2  ;;  %v6101_v38 = vshrl.u32 %v11923_v3, 16 }
 0x805   : > { %v5910_v4 = vadd.f32 %v11815_v48, %v5825_v36  ;;  %v5827_v26 = vpop.f32.mrb[123].mxu1  ;;  %v6083_v15 = vrot.slane %v6081_v30, 1  ;;  %v5940_v56 = vmax.f32 %v5908_v49, 0.0 }
 0x806   : > { %v5911_v47 = vadd.f32 %v11818_v61, %v5827_v26  ;;  %v6091_v5 = vrot.slane %v6089_v21, 1  ;;  %v5941_v0 = vmax.f32 %v5909_v55, 0.0 }
 0x807   : > { %v5942_v57 = vmax.f32 %v5910_v4, 0.0  ;;  %6411 = vmatpush1.bf16.msra.mxu0 %v9703_v52  ;;  %v6084_v50 = vsel %vm661_vm1, %v6079_v17, %v6083_v15  ;;  %v6095_v25 = vor.u32 %v6093_v41, %v6083_v15  ;;  %v9709_v17 = vld [vmem:[%s12516_s10 + $0xb8] sm:$0xff]  }
 0x808   : > { %v5943_v46 = vmax.f32 %v5911_v47, 0.0  ;;  %v6092_v7 = vsel %vm661_vm1, %v6087_v12, %v6091_v5  ;;  %6412 = vmatprep.subr.bf16.mxu0 %v9828_v2  ;;  %v6103_v28 = vor.u32 %v6101_v38, %v6091_v5  ;;  %v9706_v5 = vld [vmem:[%s12516_s10 + $0xa0] sm:$0xff]  }
 0x809   : > { %v11942_v62 = vpack.c.bf16 %v5942_v57, %v5940_v56  ;;  %8602 = vmatprep.mubr.msk.bf16.mxu0 %vm4295_vm7, %v6092_v7  ;;  %v9707_v56 = vld [vmem:[%s12516_s10 + $0xa8] sm:$0xff]   ;;  %v9708_v57 = vld [vmem:[%s12516_s10 + $0xb0] sm:$0xff]   ;;  %v9713_v7 = vld [vmem:[%s12516_s10 + $0xd8] sm:$0xff]  }
 0x80a   : > { %v11946_v35 = vpack.c.bf16 %v5943_v46, %v5941_v0  ;;  %v5831_v60 = vpop.f32.mrb[124].mxu1  ;;  %6288 = vmatmul.mubr.bf16.gmra.mrb[144].mxu0 %v6084_v50  ;;  %v9711_v0 = vld [vmem:[%s12516_s10 + $0xc8] sm:$0xff]   ;;  %v9712_v46 = vld [vmem:[%s12516_s10 + $0xd0] sm:$0xff]   ;;  %v9714_v50 = vld [vmem:[%s12516_s10 + $0xe0] sm:$0xff]  }
 0x80b   : > { %v5912_v42 = vadd.f32 %v11815_v48, %v5831_v60  ;;  %v5833_v58 = vpop.f32.mrb[125].mxu1  ;;  %v6097_v11 = vshll.u32 %v11942_v62, 16  ;;  %6413 = vmatpush1.bf16.msra.mxu0 %v9704_v39  ;;  %v6109_v52 = vshrl.u32 %v11942_v62, 16  ;;  %v9710_v39 = vld [vmem:[%s12516_s10 + $0xc0] sm:$0xff]   ;;  %v9715_v60 = vld [vmem:[%s12516_s10 + $0xe8] sm:$0xff]  }
 0x80c   : > { %v5913_v16 = vadd.f32 %v11818_v61, %v5833_v58  ;;  %v5835_v44 = vpop.f32.mrb[126].mxu1  ;;  %v6105_v1 = vshll.u32 %v11946_v35, 16  ;;  %6414 = vmatprep.subr.bf16.mxu0 %v9828_v2  ;;  %v6117_v31 = vshrl.u32 %v11946_v35, 16  ;;  %v6533_v58 = vrot.slane %v11826_v29, 1 }
 0x80d   : > { %v5914_v13 = vadd.f32 %v11815_v48, %v5835_v44  ;;  %v5837_v9 = vpop.f32.mrb[127].mxu1  ;;  %v6099_v59 = vrot.slane %v6097_v11, 1  ;;  %v5944_v20 = vmax.f32 %v5912_v42, 0.0  ;;  %v6534_v42 = vrot.slane %v11836_v24, 1 }
 0x80e   : > { %v5915_v43 = vadd.f32 %v11818_v61, %v5837_v9  ;;  %v6107_v19 = vrot.slane %v6105_v1, 1  ;;  %v5945_v23 = vmax.f32 %v5913_v16, 0.0  ;;  %v6530_v16 = vrot.slane %v11824_v54, 1 }
 0x80f   : > { %v5946_v10 = vmax.f32 %v5914_v13, 0.0  ;;  %6415 = vmatpush1.bf16.msra.mxu0 %v9705_v51  ;;  %v6100_v48 = vsel %vm661_vm1, %v6095_v25, %v6099_v59  ;;  %v6111_v4 = vor.u32 %v6109_v52, %v6099_v59  ;;  %v6535_v11 = vsel %vm1326_vm3, %v6533_v58, %v6534_v42  ;;  %v9718_v25 = vld [vmem:[%s12518_s12 + $0x10] sm:$0xff]  }
 0x810   : > { %v5947_v18 = vmax.f32 %v5915_v43, 0.0  ;;  %v6108_v27 = vsel %vm661_vm1, %v6103_v28, %v6107_v19  ;;  %6652 = vmatprep.subr.bf16.mxu0 %v9828_v2  ;;  %v6119_v36 = vor.u32 %v6117_v31, %v6107_v19  ;;  %v6538_v51 = vrot.slane %v11854_v37, 1 }
 0x811   : > { %v11962_v33 = vpack.c.bf16 %v5946_v10, %v5944_v20  ;;  %8603 = vmatprep.mubr.msk.bf16.mxu0 %vm4295_vm7, %v6108_v27  ;;  %v9717_v10 = vld [vmem:[%s12518_s12 + $0x8] sm:$0xff]  }
 0x812   : > { %v11966_v49 = vpack.c.bf16 %v5947_v18, %v5945_v23  ;;  %6296 = vmatmul.mubr.bf16.gmra.mrb[148].mxu0 %v6100_v48  ;;  %v6539_v38 = vsel %vm1326_vm3, %v6534_v42, %v6538_v51  ;;  %v9719_v23 = vld [vmem:[%s12518_s12 + $0x18] sm:$0xff]  }
 0x813   : > { %v6113_v61 = vshll.u32 %v11962_v33, 16  ;;  %v6125_v47 = vshrl.u32 %v11962_v33, 16 }
 0x814   : > { %v6121_v30 = vshll.u32 %v11966_v49, 16  ;;  %v6128_v21 = vshrl.u32 %v11966_v49, 16 }
 0x815   : > { %v6115_v55 = vrot.slane %v6113_v61, 1  ;;  %v9721_v61 = vld [vmem:[%s12518_s12 + $0x28] sm:$0xff]  }
 0x816   : > { %v6123_v40 = vrot.slane %v6121_v30, 1 }
 0x817   : > { %v6116_v15 = vsel %vm661_vm1, %v6111_v4, %v6115_v55  ;;  %v6127_v12 = vor.u32 %v6125_v47, %v6115_v55 }
 0x818   : > { %v6124_v26 = vsel %vm661_vm1, %v6119_v36, %v6123_v40  ;;  %v6130_v14 = vor.u32 %v6128_v21, %v6123_v40  ;;  %v9722_v36 = vld [vmem:[%s12518_s12 + $0x30] sm:$0xff]   ;;  %v9723_v40 = vld [vmem:[%s12518_s12 + $0x38] sm:$0xff]  }
 0x819   : > { %8604 = vmatprep.mubr.msk.bf16.mxu0 %vm4295_vm7, %v6124_v26 }
 0x81a   : > { %6304 = vmatmul.mubr.bf16.gmra.mrb[152].mxu0 %v6116_v15 }
 0x81b   : > { %8605 = vmatprep.mubr.msk.bf16.mxu0 %vm4295_vm7, %v6130_v14 }
 0x822   : > { %6312 = vmatmul.mubr.bf16.gmra.mrb[156].mxu0 %v6127_v12 }
 0x823   : > { %8616 = vmatprep.mubr.msk.bf16.mxu0 %vm4295_vm7, %v11826_v29  ;;  %v6536_v29 = vrot.slane %v11850_v34, 1 }
 0x82a   : > { %6429 = vmatmul.mubr.bf16.vlgmr.msra.gmra.mrb[160].mxu0 %v11824_v54  ;;  %v6540_v54 = vrot.slane %v11873_v32, 1 }
 0x82b   : > { %6653 = vmatpush1.bf16.msra.mxu0 %v9706_v5  ;;  %8617 = vmatprep.mubr.msk.bf16.mxu0 %vm4295_vm7, %v11836_v24  ;;  %v6542_v24 = vrot.slane %v11877_v53, 1 }
 0x82c   : > { %6654 = vmatprep.subr.bf16.mxu0 %v9828_v2  ;;  %v6541_v13 = vsel %vm1326_vm3, %v6536_v29, %v6540_v54 }
 0x82f   : > { %6655 = vmatpush1.bf16.msra.mxu0 %v9707_v56 }
 0x830   : > { %6656 = vmatprep.subr.bf16.mxu0 %v9828_v2 }
 0x832   : > { %6437 = vmatmul.mubr.bf16.gmra.mrb[164].mxu0 %v11834_v6 }
 0x833   : > { %8618 = vmatprep.mubr.msk.bf16.mxu0 %vm4295_vm7, %v11854_v37  ;;  %6657 = vmatpush1.bf16.msra.mxu0 %v9708_v57  ;;  %v6546_v37 = vrot.slane %v11900_v8, 1 }
 0x834   : > { %6658 = vmatprep.subr.bf16.mxu0 %v9828_v2 }
 0x835   : > { %v6547_v9 = vsel %vm1326_vm3, %v6542_v24, %v6546_v37 }
 0x837   : > { %6659 = vmatpush1.bf16.msra.mxu0 %v9709_v17 }
 0x838   : > { %6660 = vmatprep.subr.bf16.mxu0 %v9828_v2 }
 0x83a   : > { %6445 = vmatmul.mubr.bf16.gmra.mrb[168].mxu0 %v11850_v34  ;;  %v6544_v34 = vrot.slane %v11896_v63, 1 }
 0x83b   : > { %8619 = vmatprep.mubr.msk.bf16.mxu0 %vm4295_vm7, %v11877_v53  ;;  %6661 = vmatpush1.bf16.msra.mxu0 %v9710_v39  ;;  %v6550_v53 = vrot.slane %v11923_v3, 1 }
 0x83c   : > { %6662 = vmatprep.subr.bf16.mxu0 %v9828_v2  ;;  %v6545_v41 = vsel %vm1326_vm3, %v6540_v54, %v6544_v34 }
 0x83d   : > { %v6551_v59 = vsel %vm1326_vm3, %v6546_v37, %v6550_v53 }
 0x83f   : > { %6663 = vmatpush1.bf16.msra.mxu0 %v9711_v0 }
 0x840   : > { %6664 = vmatprep.subr.bf16.mxu0 %v9828_v2 }
 0x842   : > { %6453 = vmatmul.mubr.bf16.gmra.mrb[172].mxu0 %v11873_v32  ;;  %v6548_v32 = vrot.slane %v11919_v22, 1 }
 0x843   : > { %8620 = vmatprep.mubr.msk.bf16.mxu0 %vm4295_vm7, %v11900_v8  ;;  %6665 = vmatpush1.bf16.msra.mxu0 %v9712_v46  ;;  %v6554_v8 = vrot.slane %v11946_v35, 1 }
 0x844   : > { %6666 = vmatprep.subr.bf16.mxu0 %v9828_v2  ;;  %v6549_v43 = vsel %vm1326_vm3, %v6544_v34, %v6548_v32 }
 0x845   : > { %v6555_v28 = vsel %vm1326_vm3, %v6550_v53, %v6554_v8 }
 0x847   : > { %6667 = vmatpush1.bf16.msra.mxu0 %v9713_v7 }
 0x848   : > { %6668 = vmatprep.subr.bf16.mxu0 %v9828_v2 }
 0x84a   : > { %6461 = vmatmul.mubr.bf16.gmra.mrb[176].mxu0 %v11896_v63  ;;  %v6552_v63 = vrot.slane %v11942_v62, 1 }
 0x84b   : > { %8621 = vmatprep.mubr.msk.bf16.mxu0 %vm4295_vm7, %v11923_v3  ;;  %6669 = vmatpush1.bf16.msra.mxu0 %v9714_v50  ;;  %v6558_v3 = vrot.slane %v11966_v49, 1 }
 0x84c   : > { %6670 = vmatprep.subr.bf16.mxu0 %v9828_v2  ;;  %v6531_v2 = vrot.slane %v11834_v6, 1  ;;  %v6543_v6 = vsel %vm1326_vm3, %v6538_v51, %v6542_v24  ;;  %v6553_v19 = vsel %vm1326_vm3, %v6548_v32, %v6552_v63 }
 0x84d   : > { %v6559_v20 = vsel %vm1326_vm3, %v6554_v8, %v6558_v3 }
 0x84e   : > { %v6532_v44 = vsel %vm1326_vm3, %v6530_v16, %v6531_v2  ;;  %v6537_v1 = vsel %vm1326_vm3, %v6531_v2, %v6536_v29 }
 0x84f   : > { %6671 = vmatpush1.bf16.msra.mxu0 %v9715_v60 }
 0x852   : > { %6469 = vmatmul.mubr.bf16.gmra.mrb[180].mxu0 %v11919_v22  ;;  %v6556_v22 = vrot.slane %v11962_v33, 1 }
 0x853   : > { %8622 = vmatprep.mubr.msk.bf16.mxu0 %vm4295_vm7, %v11946_v35 }
 0x854   : > { %v6557_v35 = vsel %vm1326_vm3, %v6552_v63, %v6556_v22 }
 0x85a   : > { %6477 = vmatmul.mubr.bf16.gmra.mrb[184].mxu0 %v11942_v62  ;;  %v9716_v62 = vld [vmem:[%s12518_s12] sm:$0xff]  }
 0x85b   : > { %8623 = vmatprep.mubr.msk.bf16.mxu0 %vm4295_vm7, %v11966_v49  ;;  %8842 = vmatprep.subr.bf16.mxu0 %v9716_v62  ;;  %v9720_v49 = vld [vmem:[%s12518_s12 + $0x20] sm:$0xff]  }
 0x862   : > { %6485 = vmatmul.mubr.bf16.gmra.mrb[188].mxu0 %v11962_v33 }
 0x863   : > { %8654 = vmatprep.mubr.msk.bf16.mxu0 %vm4295_vm7, %v6535_v11 }
 0x86a   : > { %6685 = vmatmul.mubr.bf16.vlgmr.msra.gmra.mrb[192].mxu0 %v6532_v44 }
 0x86b   : > { %8655 = vmatprep.mubr.msk.bf16.mxu0 %vm4295_vm7, %v6539_v38  ;;  %8843 = vmatpush3.bf16.msra.mxu0 %v9716_v62 }
 0x86c   : > { %8844 = vmatprep.subr.bf16.mxu0 %v9717_v10 }
 0x86f   : > { %8845 = vmatpush3.bf16.msra.mxu0 %v9717_v10 }
 0x870   : > { %8846 = vmatprep.subr.bf16.mxu0 %v9718_v25 }
 0x872   : > { %6693 = vmatmul.mubr.bf16.gmra.mrb[196].mxu0 %v6537_v1 }
 0x873   : > { %8656 = vmatprep.mubr.msk.bf16.mxu0 %vm4295_vm7, %v6543_v6  ;;  %8847 = vmatpush3.bf16.msra.mxu0 %v9718_v25 }
 0x874   : > { %8848 = vmatprep.subr.bf16.mxu0 %v9719_v23 }
 0x877   : > { %8849 = vmatpush3.bf16.msra.mxu0 %v9719_v23 }
 0x878   : > { %8850 = vmatprep.subr.bf16.mxu0 %v9720_v49 }
 0x87a   : > { %6701 = vmatmul.mubr.bf16.gmra.mrb[200].mxu0 %v6541_v13 }
 0x87b   : > { %8657 = vmatprep.mubr.msk.bf16.mxu0 %vm4295_vm7, %v6547_v9  ;;  %8851 = vmatpush3.bf16.msra.mxu0 %v9720_v49 }
 0x87c   : > { %8852 = vmatprep.subr.bf16.mxu0 %v9721_v61 }
 0x87f   : > { %8853 = vmatpush3.bf16.msra.mxu0 %v9721_v61 }
 0x880   : > { %8854 = vmatprep.subr.bf16.mxu0 %v9722_v36 }
 0x882   : > { %6709 = vmatmul.mubr.bf16.gmra.mrb[204].mxu0 %v6545_v41 }
 0x883   : > { %8658 = vmatprep.mubr.msk.bf16.mxu0 %vm4295_vm7, %v6551_v59  ;;  %8855 = vmatpush3.bf16.msra.mxu0 %v9722_v36 }
 0x884   : > { %8856 = vmatprep.subr.bf16.mxu0 %v9723_v40 }
 0x887   : > { %8857 = vmatpush3.bf16.msra.mxu0 %v9723_v40 }
 0x88a   : > { %6717 = vmatmul.mubr.bf16.gmra.mrb[208].mxu0 %v6549_v43 }
 0x88b   : > { %8659 = vmatprep.mubr.msk.bf16.mxu0 %vm4295_vm7, %v6555_v28 }
 0x892   : > { %6725 = vmatmul.mubr.bf16.gmra.mrb[212].mxu0 %v6553_v19 }
 0x893   : > { %8660 = vmatprep.mubr.msk.bf16.mxu0 %vm4295_vm7, %v6559_v20 }
 0x89a   : > { %6733 = vmatmul.mubr.bf16.gmra.mrb[216].mxu0 %v6557_v35 }
 0x89b   : > { %8661 = vmatprep.mubr.msk.bf16.mxu0 %vm4295_vm7, %v6558_v3 }
 0x8a2   : > { %6741 = vmatmul.mubr.bf16.gmra.mrb[220].mxu0 %v6556_v22 }
 0x8bd   : > { %v6257_v18 = vpop.f32.mrb[128].mxu0 }
 0x8be   : > { %v6259_v27 = vpop.f32.mrb[129].mxu0 }
 0x8bf   : > { %v6260_v33 = vpop.f32.mrb[130].mxu0 }
 0x8c0   : > { %v6262_v48 = vpop.f32.mrb[131].mxu0 }
 0x8c5   : > { %v6265_v31 = vpop.f32.mrb[132].mxu0 }
 0x8c6   : > { %v6267_v30 = vpop.f32.mrb[133].mxu0 }
 0x8c7   : > { %v6268_v52 = vpop.f32.mrb[134].mxu0 }
 0x8c8   : > { %v6270_v55 = vpop.f32.mrb[135].mxu0 }
 0x8cd   : > { %v6273_v21 = vpop.f32.mrb[136].mxu0 }
 0x8ce   : > { %v6275_v4 = vpop.f32.mrb[137].mxu0 }
 0x8cf   : > { %v6276_v26 = vpop.f32.mrb[138].mxu0 }
 0x8d0   : > { %v6278_v14 = vpop.f32.mrb[139].mxu0 }
 0x8d5   : > { %v6281_v15 = vpop.f32.mrb[140].mxu0 }
 0x8d6   : > { %v6283_v47 = vpop.f32.mrb[141].mxu0 }
 0x8d7   : > { %v6284_v12 = vpop.f32.mrb[142].mxu0 }
 0x8d8   : > { %v6286_v5 = vpop.f32.mrb[143].mxu0 }
 0x8dd   : > { %v6289_v56 = vpop.f32.mrb[144].mxu0 }
 0x8de   : > { %v6291_v57 = vpop.f32.mrb[145].mxu0 }
 0x8df   : > { %v6292_v17 = vpop.f32.mrb[146].mxu0 }
 0x8e0   : > { %v6294_v39 = vpop.f32.mrb[147].mxu0 }
 0x8e5   : > { %v6297_v0 = vpop.f32.mrb[148].mxu0 }
 0x8e6   : > { %v6299_v46 = vpop.f32.mrb[149].mxu0 }
 0x8e7   : > { %v6300_v7 = vpop.f32.mrb[150].mxu0 }
 0x8e8   : > { %v6302_v50 = vpop.f32.mrb[151].mxu0 }
 0x8ed   : > { %v6305_v60 = vpop.f32.mrb[152].mxu0 }
 0x8ee   : > { %v6307_v42 = vpop.f32.mrb[153].mxu0 }
 0x8ef   : > { %v6308_v58 = vpop.f32.mrb[154].mxu0 }
 0x8f0   : > { %v6310_v11 = vpop.f32.mrb[155].mxu0 }
 0x8f5   : > { %v6313_v2 = vpop.f32.mrb[156].mxu0 }
 0x8f6   : > { %v6315_v51 = vpop.f32.mrb[157].mxu0 }
 0x8f7   : > { %v6316_v16 = vpop.f32.mrb[158].mxu0 }
 0x8f8   : > { %v6318_v44 = vpop.f32.mrb[159].mxu0 }
 0x8fd   : > { %v6430_v38 = vpop.f32.mrb[160].mxu0 }
 0x8fe   : > { %v6431_v29 = vadd.f32 %v6430_v38, %v6257_v18  ;;  %v6432_v24 = vpop.f32.mrb[161].mxu0 }
 0x8ff   : > { %v6433_v1 = vpop.f32.mrb[162].mxu0 }
 0x900   : > { %v6434_v6 = vadd.f32 %v6433_v1, %v6260_v33  ;;  %v6435_v54 = vpop.f32.mrb[163].mxu0 }
 0x905   : > { %v6438_v37 = vpop.f32.mrb[164].mxu0 }
 0x906   : > { %v6439_v13 = vadd.f32 %v6438_v37, %v6265_v31  ;;  %v6440_v9 = vpop.f32.mrb[165].mxu0 }
 0x907   : > { %v6441_v34 = vpop.f32.mrb[166].mxu0 }
 0x908   : > { %v6442_v53 = vadd.f32 %v6441_v34, %v6268_v52  ;;  %v6443_v41 = vpop.f32.mrb[167].mxu0 }
 0x90d   : > { %v6446_v59 = vpop.f32.mrb[168].mxu0 }
 0x90e   : > { %v6447_v32 = vadd.f32 %v6446_v59, %v6273_v21  ;;  %v6448_v8 = vpop.f32.mrb[169].mxu0 }
 0x90f   : > { %v6449_v43 = vpop.f32.mrb[170].mxu0 }
 0x910   : > { %v6450_v28 = vadd.f32 %v6449_v43, %v6276_v26  ;;  %v6451_v63 = vpop.f32.mrb[171].mxu0 }
 0x915   : > { %v6454_v3 = vpop.f32.mrb[172].mxu0 }
 0x916   : > { %v12103_v19 = vadd.f32 %v6454_v3, %v6281_v15  ;;  %v6456_v20 = vpop.f32.mrb[173].mxu0 }
 0x917   : > { %v6457_v22 = vpop.f32.mrb[174].mxu0 }
 0x918   : > { %v12105_v35 = vadd.f32 %v6457_v22, %v6284_v12  ;;  %v6459_v62 = vpop.f32.mrb[175].mxu0 }
 0x91d   : > { %v6462_v10 = vpop.f32.mrb[176].mxu0 }
 0x91e   : > { %v12107_v25 = vadd.f32 %v6462_v10, %v6289_v56  ;;  %v6464_v23 = vpop.f32.mrb[177].mxu0 }
 0x91f   : > { %v6465_v18 = vpop.f32.mrb[178].mxu0 }
 0x920   : > { %v12109_v27 = vadd.f32 %v6465_v18, %v6292_v17  ;;  %v6467_v33 = vpop.f32.mrb[179].mxu0  ;;  %v12126_v17 = vld [vmem:[%s12517_s11] ss:$0 sm:$0xff] }
 0x925   : > { %v6470_v48 = vpop.f32.mrb[180].mxu0 }
 0x926   : > { %v12111_v49 = vadd.f32 %v6470_v48, %v6297_v0  ;;  %v6472_v61 = vpop.f32.mrb[181].mxu0 }
 0x927   : > { %v6473_v31 = vpop.f32.mrb[182].mxu0 }
 0x928   : > { %v12113_v30 = vadd.f32 %v6473_v31, %v6300_v7  ;;  %v6475_v52 = vpop.f32.mrb[183].mxu0 }
 0x92d   : > { %v6478_v55 = vpop.f32.mrb[184].mxu0 }
 0x92e   : > { %v12115_v36 = vadd.f32 %v6478_v55, %v6305_v60  ;;  %v6480_v40 = vpop.f32.mrb[185].mxu0 }
 0x92f   : > { %v6481_v21 = vpop.f32.mrb[186].mxu0 }
 0x930   : > { %v12117_v4 = vadd.f32 %v6481_v21, %v6308_v58  ;;  %v6483_v26 = vpop.f32.mrb[187].mxu0 }
 0x935   : > { %v6486_v14 = vpop.f32.mrb[188].mxu0 }
 0x936   : > { %v12119_v15 = vadd.f32 %v6486_v14, %v6313_v2  ;;  %v6488_v47 = vpop.f32.mrb[189].mxu0 }
 0x937   : > { %v6489_v12 = vpop.f32.mrb[190].mxu0 }
 0x938   : > { %v12121_v5 = vadd.f32 %v6489_v12, %v6316_v16  ;;  %v6491_v56 = vpop.f32.mrb[191].mxu0 }
 0x93d   : > { %v6686_v57 = vpop.f32.mrb[192].mxu0 }
 0x93e   : > { %v6749_v39 = vadd.f32 %v6686_v57, %v6431_v29  ;;  %v6688_v0 = vpop.f32.mrb[193].mxu0 }
 0x93f   : > { %v6689_v46 = vpop.f32.mrb[194].mxu0 }
 0x940   : > { %v6772_v7 = vadd.f32 %v12126_v17, %v6749_v39  ;;  %v6750_v50 = vadd.f32 %v6689_v46, %v6434_v6  ;;  %v6691_v60 = vpop.f32.mrb[195].mxu0 }
 0x942   : > { %v6773_v42 = vadd.f32 %v12126_v17, %v6750_v50  ;;  %v6788_v58 = vmax.f32 %v6772_v7, 0.0 }
 0x944   : > { %v6789_v11 = vmax.f32 %v6773_v42, 0.0 }
 0x945   : > { %v6694_v2 = vpop.f32.mrb[196].mxu0 }
 0x946   : > { %v6751_v51 = vadd.f32 %v6694_v2, %v6439_v13  ;;  %v6696_v16 = vpop.f32.mrb[197].mxu0  ;;  %v6804_v44 = vpack.c.bf16 %v6789_v11, %v6788_v58 }
 0x947   : > { %v6697_v38 = vpop.f32.mrb[198].mxu0 }
 0x948   : > { %v6774_v24 = vadd.f32 %v12126_v17, %v6751_v51  ;;  %v6752_v1 = vadd.f32 %v6697_v38, %v6442_v53  ;;  %v6699_v54 = vpop.f32.mrb[199].mxu0  ;;  %8858 = vmatprep.mubr.bf16.mxu0 %v6804_v44 }
 0x94a   : > { %v6775_v29 = vadd.f32 %v12126_v17, %v6752_v1  ;;  %v6790_v37 = vmax.f32 %v6774_v24, 0.0 }
 0x94c   : > { %v6791_v9 = vmax.f32 %v6775_v29, 0.0 }
 0x94d   : > { %v6702_v6 = vpop.f32.mrb[200].mxu0 }
 0x94e   : > { %v6805_v34 = vpack.c.bf16 %v6791_v9, %v6790_v37  ;;  %v6753_v41 = vadd.f32 %v6702_v6, %v6447_v32  ;;  %v6704_v59 = vpop.f32.mrb[201].mxu0 }
 0x94f   : > { %v6705_v8 = vpop.f32.mrb[202].mxu0 }
 0x950   : > { %v6776_v43 = vadd.f32 %v12126_v17, %v6753_v41  ;;  %v6754_v13 = vadd.f32 %v6705_v8, %v6450_v28  ;;  %v6707_v63 = vpop.f32.mrb[203].mxu0  ;;  %8859 = vmatmul.mubr.bf16.vlgmr.msra.gmra.mrb[224].mxu0 %v6805_v34 }
 0x952   : > { %v6777_v3 = vadd.f32 %v12126_v17, %v6754_v13  ;;  %v6792_v20 = vmax.f32 %v6776_v43, 0.0 }
 0x954   : > { %v6793_v53 = vmax.f32 %v6777_v3, 0.0 }
 0x955   : > { %v6710_v22 = vpop.f32.mrb[204].mxu0 }
 0x956   : > { %v6755_v62 = vadd.f32 %v6710_v22, %v12103_v19  ;;  %v6712_v10 = vpop.f32.mrb[205].mxu0  ;;  %v6806_v23 = vpack.c.bf16 %v6793_v53, %v6792_v20 }
 0x957   : > { %v6713_v18 = vpop.f32.mrb[206].mxu0 }
 0x958   : > { %v6778_v33 = vadd.f32 %v12126_v17, %v6755_v62  ;;  %v6756_v32 = vadd.f32 %v6713_v18, %v12105_v35  ;;  %v6715_v48 = vpop.f32.mrb[207].mxu0  ;;  %8862 = vmatprep.mubr.bf16.mxu0 %v6806_v23  ;;  %v9724_v62 = vld [vmem:[%s12519_s13] sm:$0xff]   ;;  %v9725_v23 = vld [vmem:[%s12519_s13 + $0x8] sm:$0xff]   ;;  %v9726_v18 = vld [vmem:[%s12519_s13 + $0x10] sm:$0xff]  }
 0x959   : > { %8874 = vmatprep.subr.bf16.mxu0 %v9724_v62 }
 0x95a   : > { %v6779_v28 = vadd.f32 %v12126_v17, %v6756_v32  ;;  %v6794_v61 = vmax.f32 %v6778_v33, 0.0  ;;  %8875 = vmatpush3.bf16.msra.mxu0 %v9724_v62 }
 0x95b   : > { %8876 = vmatprep.subr.bf16.mxu0 %v9725_v23 }
 0x95c   : > { %v6795_v31 = vmax.f32 %v6779_v28, 0.0 }
 0x95d   : > { %v6718_v52 = vpop.f32.mrb[208].mxu0 }
 0x95e   : > { %v6757_v55 = vadd.f32 %v6718_v52, %v12107_v25  ;;  %v6720_v40 = vpop.f32.mrb[209].mxu0  ;;  %v6807_v21 = vpack.c.bf16 %v6795_v31, %v6794_v61  ;;  %8877 = vmatpush3.bf16.msra.mxu0 %v9725_v23 }
 0x95f   : > { %v6721_v26 = vpop.f32.mrb[210].mxu0  ;;  %8878 = vmatprep.subr.bf16.mxu0 %v9726_v18 }
 0x960   : > { %v6780_v19 = vadd.f32 %v12126_v17, %v6757_v55  ;;  %v6758_v14 = vadd.f32 %v6721_v26, %v12109_v27  ;;  %v6723_v47 = vpop.f32.mrb[211].mxu0  ;;  %8863 = vmatmul.mubr.bf16.gmra.mrb[228].mxu0 %v6807_v21  ;;  %v9727_v55 = vld [vmem:[%s12519_s13 + $0x18] sm:$0xff]  }
 0x962   : > { %v6781_v35 = vadd.f32 %v12126_v17, %v6758_v14  ;;  %v6796_v12 = vmax.f32 %v6780_v19, 0.0  ;;  %8879 = vmatpush3.bf16.msra.mxu0 %v9726_v18 }
 0x963   : > { %8880 = vmatprep.subr.bf16.mxu0 %v9727_v55 }
 0x964   : > { %v6797_v56 = vmax.f32 %v6781_v35, 0.0 }
 0x965   : > { %v6726_v57 = vpop.f32.mrb[212].mxu0 }
 0x966   : > { %v6759_v39 = vadd.f32 %v6726_v57, %v12111_v49  ;;  %v6728_v0 = vpop.f32.mrb[213].mxu0  ;;  %v6808_v46 = vpack.c.bf16 %v6797_v56, %v6796_v12  ;;  %8881 = vmatpush3.bf16.msra.mxu0 %v9727_v55 }
 0x967   : > { %v6729_v7 = vpop.f32.mrb[214].mxu0 }
 0x968   : > { %v6782_v25 = vadd.f32 %v12126_v17, %v6759_v39  ;;  %v6760_v50 = vadd.f32 %v6729_v7, %v12113_v30  ;;  %v6731_v60 = vpop.f32.mrb[215].mxu0  ;;  %8866 = vmatprep.mubr.bf16.mxu0 %v6808_v46 }
 0x969   : > { %v9729_v60 = vld [vmem:[%s12521_s15 + $0x48] sm:$0xff]  }
 0x96a   : > { %v6783_v27 = vadd.f32 %v12126_v17, %v6760_v50  ;;  %v6798_v42 = vmax.f32 %v6782_v25, 0.0  ;;  %8892 = vmatprep.subr.bf16.mxu1 %v9729_v60 }
 0x96b   : > { %8893 = vmatpush3.bf16.msra.mxu1 %v9729_v60 }
 0x96c   : > { %v6799_v58 = vmax.f32 %v6783_v27, 0.0  ;;  %v9730_v27 = vld [vmem:[%s12521_s15 + $0x50] sm:$0xff]  }
 0x96d   : > { %v6734_v11 = vpop.f32.mrb[216].mxu0  ;;  %8894 = vmatprep.subr.bf16.mxu1 %v9730_v27 }
 0x96e   : > { %v6761_v2 = vadd.f32 %v6734_v11, %v12115_v36  ;;  %v6736_v51 = vpop.f32.mrb[217].mxu0  ;;  %v6809_v16 = vpack.c.bf16 %v6799_v58, %v6798_v42 }
 0x96f   : > { %v6737_v44 = vpop.f32.mrb[218].mxu0  ;;  %8895 = vmatpush3.bf16.msra.mxu1 %v9730_v27 }
 0x970   : > { %v6784_v49 = vadd.f32 %v12126_v17, %v6761_v2  ;;  %v6762_v38 = vadd.f32 %v6737_v44, %v12117_v4  ;;  %v6739_v24 = vpop.f32.mrb[219].mxu0  ;;  %8867 = vmatmul.mubr.bf16.gmra.mrb[232].mxu0 %v6809_v16 }
 0x972   : > { %v6785_v30 = vadd.f32 %v12126_v17, %v6762_v38  ;;  %v6800_v1 = vmax.f32 %v6784_v49, 0.0 }
 0x974   : > { %v6801_v54 = vmax.f32 %v6785_v30, 0.0 }
 0x975   : > { %v6742_v29 = vpop.f32.mrb[220].mxu0 }
 0x976   : > { %v6763_v37 = vadd.f32 %v6742_v29, %v12119_v15  ;;  %v6744_v9 = vpop.f32.mrb[221].mxu0  ;;  %v6810_v6 = vpack.c.bf16 %v6801_v54, %v6800_v1 }
 0x977   : > { %v6745_v34 = vpop.f32.mrb[222].mxu0 }
 0x978   : > { %v6786_v36 = vadd.f32 %v12126_v17, %v6763_v37  ;;  %v6764_v41 = vadd.f32 %v6745_v34, %v12121_v5  ;;  %v6747_v59 = vpop.f32.mrb[223].mxu0  ;;  %8870 = vmatprep.mubr.bf16.mxu0 %v6810_v6 }
 0x97a   : > { %v6787_v4 = vadd.f32 %v12126_v17, %v6764_v41  ;;  %v6802_v8 = vmax.f32 %v6786_v36, 0.0 }
 0x97c   : > { %v6803_v43 = vmax.f32 %v6787_v4, 0.0 }
 0x97e   : > { %v6811_v13 = vpack.c.bf16 %v6803_v43, %v6802_v8 }
 0x980   : > { %8871 = vmatmul.mubr.bf16.gmra.mrb[236].mxu0 %v6811_v13 }
 0xa23   : > { %v12154_v63 = vpop.f32.mrb[224].mxu0 }
 0xa24   : > { %v6975_v3 = vand.u32 2147483647, %v12154_v63  ;;  %v12157_v15 = vpop.f32.mrb[225].mxu0 }
 0xa25   : > { %v12159_v20 = vpop.f32.mrb[226].mxu0  ;;  %v6973_v17 = vand.u32 2147483647, %v12157_v15 }
 0xa26   : > { %v6976_v53 = vand.u32 2147483647, %v12159_v20  ;;  %7009 = vrot.lane.b32.xlu0 %v6975_v3, %s9831_s23  ;;  %v12163_v5 = vpop.f32.mrb[227].mxu0 }
 0xa27   : > { %v6974_v22 = vand.u32 2147483647, %v12163_v5 }
 0xa28   : > { %7011 = vrot.lane.b32.xlu1 %v6976_v53, %s9831_s23 }
 0xa2a   : > { %7005 = vrot.lane.b32.xlu0 %v6973_v17, %s9831_s23 }
 0xa2c   : > { %7007 = vrot.lane.b32.xlu1 %v6974_v22, %s9831_s23 }
 0xa33   : > { %v12173_v10 = vpop.f32.mrb[228].mxu0 }
 0xa34   : > { %v6979_v33 = vand.u32 2147483647, %v12173_v10  ;;  %v12182_v32 = vpop.f32.mrb[229].mxu0 }
 0xa35   : > { %v12184_v48 = vpop.f32.mrb[230].mxu0  ;;  %v6977_v31 = vand.u32 2147483647, %v12182_v32 }
 0xa36   : > { %v6980_v28 = vand.u32 2147483647, %v12184_v48  ;;  %7017 = vrot.lane.b32.xlu0 %v6979_v33, %s9831_s23  ;;  %v12188_v61 = vpop.f32.mrb[231].mxu0 }
 0xa37   : > { %v6978_v52 = vand.u32 2147483647, %v12188_v61 }
 0xa38   : > { %7019 = vrot.lane.b32.xlu1 %v6980_v28, %s9831_s23 }
 0xa3a   : > { %7013 = vrot.lane.b32.xlu0 %v6977_v31, %s9831_s23 }
 0xa3c   : > { %7015 = vrot.lane.b32.xlu1 %v6978_v52, %s9831_s23 }
 0xa43   : > { %v12198_v40 = vpop.f32.mrb[232].mxu0 }
 0xa44   : > { %v6983_v21 = vand.u32 2147483647, %v12198_v40  ;;  %v12201_v26 = vpop.f32.mrb[233].mxu0 }
 0xa45   : > { %v12203_v19 = vpop.f32.mrb[234].mxu0  ;;  %v6981_v35 = vand.u32 2147483647, %v12201_v26 }
 0xa46   : > { %v6984_v14 = vand.u32 2147483647, %v12203_v19  ;;  %7025 = vrot.lane.b32.xlu0 %v6983_v21, %s9831_s23  ;;  %v12207_v47 = vpop.f32.mrb[235].mxu0 }
 0xa47   : > { %v6982_v12 = vand.u32 2147483647, %v12207_v47 }
 0xa48   : > { %7027 = vrot.lane.b32.xlu1 %v6984_v14, %s9831_s23 }
 0xa4a   : > { %7021 = vrot.lane.b32.xlu0 %v6981_v35, %s9831_s23 }
 0xa4c   : > { %7023 = vrot.lane.b32.xlu1 %v6982_v12, %s9831_s23 }
 0xa53   : > { %v12214_v56 = vpop.f32.mrb[236].mxu0 }
 0xa54   : > { %v12218_v57 = vpop.f32.mrb[237].mxu0  ;;  %v6987_v25 = vand.u32 2147483647, %v12214_v56 }
 0xa55   : > { %v6985_v39 = vand.u32 2147483647, %v12218_v57  ;;  %v12221_v0 = vpop.f32.mrb[238].mxu0 }
 0xa56   : > { %v12223_v46 = vpop.f32.mrb[239].mxu0  ;;  %v6988_v50 = vand.u32 2147483647, %v12221_v0 }
 0xa57   : > { %v6986_v7 = vand.u32 2147483647, %v12223_v46  ;;  %7029 = vrot.lane.b32.xlu0 %v6985_v39, %s9831_s23 }
 0xa59   : > { %7031 = vrot.lane.b32.xlu1 %v6986_v7, %s9831_s23 }
 0xa5b   : > { %7033 = vrot.lane.b32.xlu0 %v6987_v25, %s9831_s23 }
 0xa5d   : > { %7035 = vrot.lane.b32.xlu1 %v6988_v50, %s9831_s23 }
 0xa98   : > { %v7010_v42 = vpop.permute.xlu0 %7009 }
 0xa99   : > { %v7055_v58 = vadd.f32 %v12154_v63, %v7010_v42 }
 0xa9a   : > { %v7012_v11 = vpop.permute.xlu1 %7011 }
 0xa9b   : > { %v7071_v2 = vmul.f32 0.5, %v7055_v58  ;;  %v7056_v51 = vadd.f32 %v12159_v20, %v7012_v11 }
 0xa9c   : > { %v7006_v16 = vpop.permute.xlu0 %7005 }
 0xa9d   : > { %7087 = vst.msk [vmem:[#allocation3 + $0x10] sm:$0xff] %vm3797_vm5, %v7071_v2  ;;  %v7072_v44 = vmul.f32 0.5, %v7056_v51  ;;  %v7053_v49 = vadd.f32 %v7006_v16, %v12157_v15 }
 0xa9e   : > { %v7008_v38 = vpop.permute.xlu1 %7007 }
 0xa9f   : > { %7088 = vst.msk [vmem:[#allocation3 + $0x18] sm:$0xff] %vm3797_vm5, %v7072_v44  ;;  %v7069_v24 = vmul.f32 0.5, %v7053_v49  ;;  %v7054_v30 = vadd.f32 %v7008_v38, %v12163_v5 }
 0xaa1   : > { %7085 = vst.msk [vmem:[#allocation3] sm:$0xff] %vm3797_vm5, %v7069_v24  ;;  %v7070_v1 = vmul.f32 0.5, %v7054_v30 }
 0xaa3   : > { %7086 = vst.msk [vmem:[#allocation3 + $0x8] sm:$0xff] %vm3797_vm5, %v7070_v1 }
 0xaa6   : > { %v7105_v29 = vld [vmem:[#allocation3 + $0x10] ss:$2 sm:$0xff]  ;;  %v7121_v37 = vld [vmem:[#allocation3 + $0x11] ss:$2 sm:$0xff] }
 0xaa7   : > { %v7135_v8 = vmax.f32 %v7105_v29, %v7121_v37  ;;  %v9731_v29 = vld [vmem:[%s12521_s15 + $0x58] sm:$0xff]   ;;  %v9733_v37 = vld [vmem:[%s12521_s15 + $0x68] sm:$0xff]  }
 0xaa8   : > { %v7018_v54 = vpop.permute.xlu0 %7017  ;;  %8896 = vmatprep.subr.bf16.mxu1 %v9731_v29 }
 0xaa9   : > { %v7059_v9 = vadd.f32 %v12173_v10, %v7018_v54  ;;  %8897 = vmatpush3.bf16.msra.mxu1 %v9731_v29  ;;  %v9744_v29 = vld [vmem:[%s12521_s15 + $0x80] sm:$0xff]  }
 0xaaa   : > { %v7020_v6 = vpop.permute.xlu1 %7019  ;;  %v7103_v34 = vld [vmem:[#allocation3] ss:$2 sm:$0xff]  ;;  %v7119_v36 = vld [vmem:[#allocation3 + $0x1] ss:$2 sm:$0xff] }
 0xaab   : > { %v7075_v41 = vmul.f32 0.5, %v7059_v9  ;;  %v7060_v59 = vadd.f32 %v12184_v48, %v7020_v6  ;;  %v7134_v4 = vmax.f32 %v7103_v34, %v7119_v36  ;;  %v9734_v9 = vld [vmem:[%s12521_s15 + $0x70] sm:$0xff]   ;;  %v9735_v6 = vld [vmem:[%s12521_s15 + $0x78] sm:$0xff]   ;;  %v9736_v34 = vld [vmem:[%s12521_s15] sm:$0xff]  }
 0xaac   : > { %v7014_v43 = vpop.permute.xlu0 %7013  ;;  %v8671_v36 = vld [vmem:[%s12520_s14] ss:$0 sm:$0xff] }
 0xaad   : > { %7091 = vst.msk [vmem:[#allocation3 + $0x30] sm:$0xff] %vm3797_vm5, %v7075_v41  ;;  %v7076_v13 = vmul.f32 0.5, %v7060_v59  ;;  %v7057_v63 = vadd.f32 %v7014_v43, %v12182_v32  ;;  %v7142_v3 = vpack.c.bf16 %v7135_v8, %v7134_v4 }
 0xaae   : > { %v7016_v15 = vpop.permute.xlu1 %7015 }
 0xaaf   : > { %7092 = vst.msk [vmem:[#allocation3 + $0x38] sm:$0xff] %vm3797_vm5, %v7076_v13  ;;  %v7073_v20 = vmul.f32 0.5, %v7057_v63  ;;  %v7058_v53 = vadd.f32 %v7016_v15, %v12188_v61  ;;  %8882 = vmatprep.mubr.msk.bf16.mxu0 %vm3797_vm5, %v7142_v3 }
 0xab1   : > { %7089 = vst.msk [vmem:[#allocation3 + $0x20] sm:$0xff] %vm3797_vm5, %v7073_v20  ;;  %v7074_v5 = vmul.f32 0.5, %v7058_v53 }
 0xab3   : > { %7090 = vst.msk [vmem:[#allocation3 + $0x28] sm:$0xff] %vm3797_vm5, %v7074_v5 }
 0xab6   : > { %v7109_v22 = vld [vmem:[#allocation3 + $0x30] ss:$2 sm:$0xff]  ;;  %v7125_v62 = vld [vmem:[#allocation3 + $0x31] ss:$2 sm:$0xff] }
 0xab7   : > { %v7137_v61 = vmax.f32 %v7109_v22, %v7125_v62 }
 0xab8   : > { %v7026_v17 = vpop.permute.xlu0 %7025 }
 0xab9   : > { %v7063_v10 = vadd.f32 %v12198_v40, %v7026_v17 }
 0xaba   : > { %v7028_v23 = vpop.permute.xlu1 %7027  ;;  %v7107_v18 = vld [vmem:[#allocation3 + $0x20] ss:$2 sm:$0xff]  ;;  %v7123_v33 = vld [vmem:[#allocation3 + $0x21] ss:$2 sm:$0xff] }
 0xabb   : > { %v7079_v32 = vmul.f32 0.5, %v7063_v10  ;;  %v7064_v48 = vadd.f32 %v12203_v19, %v7028_v23  ;;  %v7136_v28 = vmax.f32 %v7107_v18, %v7123_v33 }
 0xabc   : > { %v7022_v31 = vpop.permute.xlu0 %7021 }
 0xabd   : > { %7095 = vst.msk [vmem:[#allocation3 + $0x50] sm:$0xff] %vm3797_vm5, %v7079_v32  ;;  %v7080_v52 = vmul.f32 0.5, %v7064_v48  ;;  %v7061_v55 = vadd.f32 %v7022_v31, %v12201_v26  ;;  %v7143_v21 = vpack.c.bf16 %v7137_v61, %v7136_v28 }
 0xabe   : > { %v7024_v14 = vpop.permute.xlu1 %7023 }
 0xabf   : > { %7096 = vst.msk [vmem:[#allocation3 + $0x58] sm:$0xff] %vm3797_vm5, %v7080_v52  ;;  %v7077_v35 = vmul.f32 0.5, %v7061_v55  ;;  %v7062_v40 = vadd.f32 %v7024_v14, %v12207_v47  ;;  %8883 = vmatmul.mubr.msk.bf16.vlgmr.msra.gmra.mrb[240].mxu0 %vm3797_vm5, %v7143_v21 }
 0xac1   : > { %7093 = vst.msk [vmem:[#allocation3 + $0x40] sm:$0xff] %vm3797_vm5, %v7077_v35  ;;  %v7078_v19 = vmul.f32 0.5, %v7062_v40 }
 0xac3   : > { %7094 = vst.msk [vmem:[#allocation3 + $0x48] sm:$0xff] %vm3797_vm5, %v7078_v19 }
 0xac6   : > { %v7113_v12 = vld [vmem:[#allocation3 + $0x50] ss:$2 sm:$0xff]  ;;  %v7129_v39 = vld [vmem:[#allocation3 + $0x51] ss:$2 sm:$0xff] }
 0xac7   : > { %v7139_v27 = vmax.f32 %v7113_v12, %v7129_v39 }
 0xac9   : > { %v7030_v7 = vpop.permute.xlu0 %7029 }
 0xaca   : > { %v7065_v25 = vadd.f32 %v7030_v7, %v12218_v57  ;;  %v7111_v26 = vld [vmem:[#allocation3 + $0x40] ss:$2 sm:$0xff]  ;;  %v7127_v50 = vld [vmem:[#allocation3 + $0x41] ss:$2 sm:$0xff] }
 0xacb   : > { %v7032_v45 = vpop.permute.xlu1 %7031  ;;  %v7138_v60 = vmax.f32 %v7111_v26, %v7127_v50 }
 0xacc   : > { %v7081_v42 = vmul.f32 0.5, %v7065_v25  ;;  %v7066_v47 = vadd.f32 %v7032_v45, %v12223_v46 }
 0xacd   : > { %v7034_v58 = vpop.permute.xlu0 %7033  ;;  %v7144_v11 = vpack.c.bf16 %v7139_v27, %v7138_v60 }
 0xace   : > { %7097 = vst.msk [vmem:[#allocation3 + $0x60] sm:$0xff] %vm3797_vm5, %v7081_v42  ;;  %v7082_v2 = vmul.f32 0.5, %v7066_v47  ;;  %v7067_v51 = vadd.f32 %v12214_v56, %v7034_v58 }
 0xacf   : > { %8886 = vmatprep.mubr.msk.bf16.mxu0 %vm3797_vm5, %v7144_v11  ;;  %v7036_v16 = vpop.permute.xlu1 %7035 }
 0xad0   : > { %7098 = vst.msk [vmem:[#allocation3 + $0x68] sm:$0xff] %vm3797_vm5, %v7082_v2  ;;  %v7083_v57 = vmul.f32 0.5, %v7067_v51  ;;  %v7068_v44 = vadd.f32 %v12221_v0, %v7036_v16  ;;  %v9732_v0 = vld [vmem:[%s12521_s15 + $0x60] sm:$0xff]   ;;  %v9737_v2 = vld [vmem:[%s12521_s15 + $0x8] sm:$0xff]  }
 0xad1   : > { %8898 = vmatprep.subr.bf16.mxu1 %v9732_v0 }
 0xad2   : > { %7099 = vst.msk [vmem:[#allocation3 + $0x70] sm:$0xff] %vm3797_vm5, %v7083_v57  ;;  %v7084_v49 = vmul.f32 0.5, %v7068_v44  ;;  %8899 = vmatpush3.bf16.msra.mxu1 %v9732_v0  ;;  %v9745_v0 = vld [vmem:[%s12521_s15 + $0x88] sm:$0xff]  }
 0xad3   : > { %8900 = vmatprep.subr.bf16.mxu1 %v9733_v37 }
 0xad4   : > { %7101 = vst.msk [vmem:[#allocation3 + $0x78] sm:$0xf] %vm7100_vm9, %v7084_v49  ;;  %v9738_v49 = vld [vmem:[%s12521_s15 + $0x10] sm:$0xff]  }
 0xad6   : > { %8901 = vmatpush3.bf16.msra.mxu1 %v9733_v37  ;;  %v9746_v37 = vld [vmem:[%s12521_s15 + $0x90] sm:$0xff]  }
 0xad7   : > { %v7115_v46 = vld [vmem:[#allocation3 + $0x60] ss:$2 sm:$0xff]  ;;  %v7131_v38 = vld [vmem:[#allocation3 + $0x61] ss:$2 sm:$0xff]  ;;  %8902 = vmatprep.subr.bf16.mxu1 %v9734_v9 }
 0xad8   : > { %v7140_v1 = vmax.f32 %v7115_v46, %v7131_v38 }
 0xada   : > { %8903 = vmatpush3.bf16.msra.mxu1 %v9734_v9 }
 0xadb   : > { %v7117_v24 = vld [vmem:[#allocation3 + $0x70] ss:$2 sm:$0xff]  ;;  %v7133_v30 = vld [vmem:[#allocation3 + $0x71] ss:$2 sm:$0xff]  ;;  %8904 = vmatprep.subr.bf16.mxu1 %v9735_v6 }
 0xadc   : > { %v7141_v54 = vmax.f32 %v7117_v24, %v7133_v30  ;;  %v9739_v24 = vld [vmem:[%s12521_s15 + $0x18] sm:$0xff]   ;;  %v9740_v30 = vld [vmem:[%s12521_s15 + $0x20] sm:$0xff]  }
 0xade   : > { %v7145_v56 = vpack.c.bf16 %v7141_v54, %v7140_v1  ;;  %8905 = vmatpush3.bf16.msra.mxu1 %v9735_v6  ;;  %v9741_v1 = vld [vmem:[%s12521_s15 + $0x28] sm:$0xff]   ;;  %v9742_v54 = vld [vmem:[%s12521_s15 + $0x30] sm:$0xff]  }
 0xadf   : > { %8914 = vmatprep.subr.bf16.mxu1 %v9736_v34 }
 0xae0   : > { %8887 = vmatmul.mubr.msk.bf16.gmra.mrb[244].mxu0 %vm3797_vm5, %v7145_v56  ;;  %v9743_v56 = vld [vmem:[%s12521_s15 + $0x38] sm:$0xff]  }
 0xb92   : > { %v8884_v41 = vpop.f32.mrb[240].mxu0 }
 0xb93   : > { %v7240_v59 = vadd.f32 %v8884_v41, %v8671_v36  ;;  %v7231_v4 = vpop.f32.mrb[241].mxu0  ;;  %v9748_v41 = vld [vmem:[%s12521_s15 + $0xa0] sm:$0xff]  }
 0xb94   : > { %v7232_v8 = vadd.f32 %v8671_v36, %v7231_v4  ;;  %v8885_v43 = vpop.f32.mrb[242].mxu0  ;;  %v9750_v4 = vld [vmem:[%s12521_s15 + $0xb0] sm:$0xff]  }
 0xb95   : > { %v7243_v13 = vadd.f32 %v8885_v43, %v8671_v36  ;;  %v7234_v63 = vpop.f32.mrb[243].mxu0  ;;  %v7264_v15 = vmax.f32 %v7240_v59, 0.0  ;;  %v9749_v59 = vld [vmem:[%s12521_s15 + $0xa8] sm:$0xff]  }
 0xb96   : > { %v7235_v3 = vadd.f32 %v8671_v36, %v7234_v63  ;;  %v7262_v53 = vmax.f32 %v7232_v8, 0.0  ;;  %v9751_v8 = vld [vmem:[%s12521_s15 + $0xb8] sm:$0xff]   ;;  %v9753_v63 = vld [vmem:[%s12523_s17 + $0x20] sm:$0xff]  }
 0xb97   : > { %v7265_v20 = vmax.f32 %v7243_v13, 0.0  ;;  %v12387_v13 = vld [vmem:[%s12523_s17] sm:$0xff]   ;;  %8962 = vmatprep.subr.bf16.mxu0 %v9753_v63 }
 0xb98   : > { %v7263_v5 = vmax.f32 %v7235_v3, 0.0  ;;  %v12397_v3 = vld [vmem:[%s12523_s17 + $0x8] sm:$0xff]   ;;  %8963 = vmatpush3.bf16.msra.mxu0 %v9753_v63 }
 0xb99   : > { %v12298_v17 = vpack.c.bf16 %v7265_v20, %v7264_v15  ;;  %v9755_v15 = vld [vmem:[%s12523_s17 + $0x28] sm:$0xff]   ;;  %v12407_v20 = vld [vmem:[%s12523_s17 + $0x10] sm:$0xff]  }
 0xb9a   : > { %v12300_v22 = vpack.c.bf16 %v7263_v5, %v7262_v53  ;;  %8964 = vmatprep.subr.bf16.mxu0 %v9755_v15  ;;  %v9757_v53 = vld [vmem:[%s12523_s17 + $0x30] sm:$0xff]   ;;  %v12417_v5 = vld [vmem:[%s12523_s17 + $0x18] sm:$0xff]  }
 0xb9b   : > { %v7315_v10 = vshll.u32 %v12298_v17, 16  ;;  %v7319_v50 = vshrl.u32 %v12298_v17, 16  ;;  %v7590_v6 = vrot.slane %v12298_v17, 1 }
 0xb9c   : > { %v7310_v62 = vshll.u32 %v12300_v22, 16  ;;  %v7308_v23 = vshrl.u32 %v12300_v22, 16  ;;  %v7589_v9 = vrot.slane %v12300_v22, 1  ;;  %8965 = vmatpush3.bf16.msra.mxu0 %v9755_v15 }
 0xb9d   : > { %v7317_v32 = vrot.slane %v7315_v10, 1  ;;  %8966 = vmatprep.subr.bf16.mxu0 %v9757_v53 }
 0xb9e   : > { %v7312_v18 = vrot.slane %v7310_v62, 1 }
 0xb9f   : > { %v7321_v42 = vor.u32 %v7319_v50, %v7317_v32 }
 0xba0   : > { %v7313_v33 = vor.u32 %v7312_v18, %v7308_v23  ;;  %8967 = vmatpush3.bf16.msra.mxu0 %v9757_v53 }
 0xba2   : > { %v7318_v48 = vsel %vm661_vm1, %v7313_v33, %v7317_v32 }
 0xba3   : > { %8906 = vmatprep.mubr.bf16.mxu1 %v7318_v48 }
 0xbb3   : > { %v8888_v28 = vpop.f32.mrb[244].mxu0 }
 0xbb4   : > { %v7256_v61 = vadd.f32 %v8888_v28, %v8671_v36  ;;  %v7247_v31 = vpop.f32.mrb[245].mxu0 }
 0xbb5   : > { %v7248_v52 = vadd.f32 %v8671_v36, %v7247_v31  ;;  %v8889_v55 = vpop.f32.mrb[246].mxu0 }
 0xbb6   : > { %v7259_v21 = vadd.f32 %v8889_v55, %v8671_v36  ;;  %v7250_v14 = vpop.f32.mrb[247].mxu0  ;;  %v7268_v40 = vmax.f32 %v7256_v61, 0.0 }
 0xbb7   : > { %v7251_v35 = vadd.f32 %v8671_v36, %v7250_v14  ;;  %v7266_v12 = vmax.f32 %v7248_v52, 0.0  ;;  %v7591_v36 = vsel %vm1326_vm3, %v7589_v9, %v7590_v6 }
 0xbb8   : > { %v7269_v19 = vmax.f32 %v7259_v21, 0.0 }
 0xbb9   : > { %v7267_v39 = vmax.f32 %v7251_v35, 0.0 }
 0xbba   : > { %v12306_v7 = vpack.c.bf16 %v7269_v19, %v7268_v40 }
 0xbbb   : > { %v12308_v25 = vpack.c.bf16 %v7267_v39, %v7266_v12 }
 0xbbc   : > { %v7594_v26 = vrot.slane %v12306_v7, 1  ;;  %v7331_v60 = vshll.u32 %v12306_v7, 16  ;;  %v7335_v46 = vshrl.u32 %v12306_v7, 16 }
 0xbbd   : > { %v7323_v45 = vshll.u32 %v12308_v25, 16  ;;  %v7592_v27 = vrot.slane %v12308_v25, 1  ;;  %v7327_v58 = vshrl.u32 %v12308_v25, 16 }
 0xbbe   : > { %v7333_v57 = vrot.slane %v7331_v60, 1 }
 0xbbf   : > { %v7325_v47 = vrot.slane %v7323_v45, 1  ;;  %v12321_v11 = vsel %vm1326_vm3, %v7592_v27, %v7594_v26  ;;  %v7593_v43 = vsel %vm1326_vm3, %v7590_v6, %v7592_v27 }
 0xbc0   : > { %v7337_v38 = vor.u32 %v7335_v46, %v7333_v57 }
 0xbc1   : > { %v7326_v51 = vsel %vm661_vm1, %v7321_v42, %v7325_v47  ;;  %v7329_v16 = vor.u32 %v7327_v58, %v7325_v47 }
 0xbc2   : > { %8907 = vmatmul.mubr.bf16.vlgmr.msra.gmra.mrb[128].mxu1 %v7326_v51 }
 0xbc3   : > { %8915 = vmatpush3.bf16.msra.mxu1 %v9736_v34  ;;  %v7334_v44 = vsel %vm661_vm1, %v7329_v16, %v7333_v57  ;;  %v9747_v34 = vld [vmem:[%s12521_s15 + $0x98] sm:$0xff]  }
 0xbc4   : > { %8910 = vmatprep.mubr.bf16.mxu1 %v7334_v44  ;;  %8916 = vmatprep.subr.bf16.mxu1 %v9737_v2 }
 0xbc7   : > { %8917 = vmatpush3.bf16.msra.mxu1 %v9737_v2 }
 0xbc8   : > { %8918 = vmatprep.subr.bf16.mxu1 %v9738_v49 }
 0xbca   : > { %8911 = vmatmul.mubr.bf16.gmra.mrb[132].mxu1 %v7337_v38 }
 0xbcb   : > { %8919 = vmatpush3.bf16.msra.mxu1 %v9738_v49  ;;  %8930 = vmatprep.mubr.bf16.mxu1 %v12300_v22  ;;  %v8736_v22 = vld [vmem:[%s12522_s16] ss:$0 sm:$0xff] }
 0xbcc   : > { %8920 = vmatprep.subr.bf16.mxu1 %v9739_v24 }
 0xbcf   : > { %8921 = vmatpush3.bf16.msra.mxu1 %v9739_v24 }
 0xbd0   : > { %8922 = vmatprep.subr.bf16.mxu1 %v9740_v30 }
 0xbd3   : > { %8923 = vmatpush3.bf16.msra.mxu1 %v9740_v30 }
 0xbd4   : > { %8924 = vmatprep.subr.bf16.mxu1 %v9741_v1 }
 0xbd7   : > { %8925 = vmatpush3.bf16.msra.mxu1 %v9741_v1 }
 0xbd8   : > { %8926 = vmatprep.subr.bf16.mxu1 %v9742_v54 }
 0xbdb   : > { %8927 = vmatpush3.bf16.msra.mxu1 %v9742_v54 }
 0xbdc   : > { %8928 = vmatprep.subr.bf16.mxu1 %v9743_v56 }
 0xbdf   : > { %8929 = vmatpush3.bf16.msra.mxu1 %v9743_v56 }
 0xbe0   : > { %8938 = vmatprep.subr.bf16.mxu1 %v9744_v29 }
 0xbe2   : > { %8931 = vmatmul.mubr.bf16.vlgmr.msra.gmra.mrb[128].mxu1 %v12298_v17  ;;  %v9759_v17 = vld [vmem:[%s12523_s17 + $0x38] sm:$0xff]  }
 0xbe3   : > { %8934 = vmatprep.mubr.bf16.mxu1 %v12308_v25  ;;  %8939 = vmatpush3.bf16.msra.mxu1 %v9744_v29 }
 0xbe4   : > { %8940 = vmatprep.subr.bf16.mxu1 %v9745_v0  ;;  %8968 = vmatprep.subr.bf16.mxu0 %v9759_v17 }
 0xbe5   : > { %8969 = vmatpush3.bf16.msra.mxu0 %v9759_v17 }
 0xbe6   : > { %8978 = vmatprep.subr.bf16.mxu0 %v12387_v13 }
 0xbe7   : > { %8941 = vmatpush3.bf16.msra.mxu1 %v9745_v0 }
 0xbe8   : > { %8942 = vmatprep.subr.bf16.mxu1 %v9746_v37 }
 0xbea   : > { %8935 = vmatmul.mubr.bf16.gmra.mrb[132].mxu1 %v12306_v7 }
 0xbeb   : > { %8943 = vmatpush3.bf16.msra.mxu1 %v9746_v37  ;;  %8954 = vmatprep.mubr.bf16.mxu1 %v7591_v36 }
 0xbec   : > { %8944 = vmatprep.subr.bf16.mxu1 %v9747_v34 }
 0xbef   : > { %8945 = vmatpush3.bf16.msra.mxu1 %v9747_v34 }
 0xbf0   : > { %8946 = vmatprep.subr.bf16.mxu1 %v9748_v41 }
 0xbf3   : > { %8947 = vmatpush3.bf16.msra.mxu1 %v9748_v41 }
 0xbf4   : > { %8948 = vmatprep.subr.bf16.mxu1 %v9749_v59 }
 0xbf7   : > { %8949 = vmatpush3.bf16.msra.mxu1 %v9749_v59 }
 0xbf8   : > { %8950 = vmatprep.subr.bf16.mxu1 %v9750_v4 }
 0xbfb   : > { %8951 = vmatpush3.bf16.msra.mxu1 %v9750_v4  ;;  %v8761_v4 = vld [vmem:[%s12524_s18] ss:$0 sm:$0xff] }
 0xbfc   : > { %8952 = vmatprep.subr.bf16.mxu1 %v9751_v8 }
 0xbff   : > { %8953 = vmatpush3.bf16.msra.mxu1 %v9751_v8 }
 0xc00   : > { %8994 = vmatprep.subr.bf16.mxu1 %v12387_v13 }
 0xc02   : > { %8955 = vmatmul.mubr.bf16.vlgmr.msra.gmra.mrb[128].mxu1 %v7593_v43 }
 0xc03   : > { %8958 = vmatprep.mubr.bf16.mxu1 %v12321_v11  ;;  %8998 = vmatpush3.bf16.msra.mxu1 %v12387_v13 }
 0xc04   : > { %8995 = vmatprep.subr.bf16.mxu1 %v12397_v3 }
 0xc07   : > { %8999 = vmatpush3.bf16.msra.mxu1 %v12397_v3 }
 0xc08   : > { %8996 = vmatprep.subr.bf16.mxu1 %v12407_v20 }
 0xc0a   : > { %8959 = vmatmul.mubr.bf16.gmra.mrb[132].mxu1 %v7594_v26 }
 0xc0b   : > { %9000 = vmatpush3.bf16.msra.mxu1 %v12407_v20 }
 0xc0c   : > { %8997 = vmatprep.subr.bf16.mxu1 %v12417_v5 }
 0xc0f   : > { %9001 = vmatpush3.bf16.msra.mxu1 %v12417_v5 }
 0xcd5   : > { %v8956_v62 = vpop.f32.mrb[128].mxu1 }
 0xcd6   : > { %v7730_v10 = vadd.f32 %v8956_v62, %v8736_v22  ;;  %v7682_v23 = vpop.f32.mrb[129].mxu1 }
 0xcd7   : > { %v7728_v18 = vadd.f32 %v8736_v22, %v7682_v23  ;;  %v8957_v33 = vpop.f32.mrb[130].mxu1 }
 0xcd8   : > { %v7731_v32 = vadd.f32 %v8957_v33, %v8736_v22  ;;  %v7685_v48 = vpop.f32.mrb[131].mxu1  ;;  %v7738_v61 = vmax.f32 %v7730_v10, 0.0 }
 0xcd9   : > { %v7729_v28 = vadd.f32 %v8736_v22, %v7685_v48  ;;  %v7736_v52 = vmax.f32 %v7728_v18, 0.0 }
 0xcda   : > { %v7739_v31 = vmax.f32 %v7731_v32, 0.0 }
 0xcdb   : > { %v7737_v55 = vmax.f32 %v7729_v28, 0.0 }
 0xcdc   : > { %v7745_v21 = vpack.c.bf16 %v7739_v31, %v7738_v61 }
 0xcdd   : > { %v7744_v14 = vpack.c.bf16 %v7737_v55, %v7736_v52  ;;  %v8960_v35 = vpop.f32.mrb[132].mxu1 }
 0xcde   : > { %v7734_v40 = vadd.f32 %v8960_v35, %v8736_v22  ;;  %v7698_v19 = vpop.f32.mrb[133].mxu1  ;;  %v7773_v12 = vshll.u32 %v7745_v21, 16  ;;  %v7777_v49 = vshrl.u32 %v7745_v21, 16 }
 0xcdf   : > { %v7768_v39 = vshll.u32 %v7744_v14, 16  ;;  %v7732_v7 = vadd.f32 %v8736_v22, %v7698_v19  ;;  %v8961_v25 = vpop.f32.mrb[134].mxu1  ;;  %v7766_v45 = vshrl.u32 %v7744_v14, 16 }
 0xce0   : > { %v7735_v26 = vadd.f32 %v8961_v25, %v8736_v22  ;;  %v7701_v50 = vpop.f32.mrb[135].mxu1  ;;  %v7742_v42 = vmax.f32 %v7734_v40, 0.0  ;;  %v7775_v51 = vrot.slane %v7773_v12, 1 }
 0xce1   : > { %v7770_v60 = vrot.slane %v7768_v39, 1  ;;  %v7733_v27 = vadd.f32 %v8736_v22, %v7701_v50  ;;  %v7740_v58 = vmax.f32 %v7732_v7, 0.0 }
 0xce2   : > { %v7743_v47 = vmax.f32 %v7735_v26, 0.0  ;;  %v7779_v1 = vor.u32 %v7777_v49, %v7775_v51 }
 0xce3   : > { %v7741_v11 = vmax.f32 %v7733_v27, 0.0  ;;  %v7771_v2 = vor.u32 %v7770_v60, %v7766_v45 }
 0xce4   : > { %v7747_v16 = vpack.c.bf16 %v7743_v47, %v7742_v42 }
 0xce5   : > { %v7746_v57 = vpack.c.bf16 %v7741_v11, %v7740_v58  ;;  %v7776_v44 = vsel %vm661_vm1, %v7771_v2, %v7775_v51 }
 0xce6   : > { %8970 = vmatprep.mubr.msk.bf16.mxu0 %vm3797_vm5, %v7776_v44  ;;  %v7789_v46 = vshll.u32 %v7747_v16, 16  ;;  %v7793_v37 = vshrl.u32 %v7747_v16, 16 }
 0xce7   : > { %v7781_v38 = vshll.u32 %v7746_v57, 16  ;;  %8990 = vmatprep.mubr.msk.bf16.mxu1 %vm3797_vm5, %v7746_v57  ;;  %v7785_v30 = vshrl.u32 %v7746_v57, 16 }
 0xce8   : > { %8991 = vmatmul.mubr.msk.bf16.vlgmr.msra.gmra.mrb[136].mxu1 %vm3797_vm5, %v7747_v16  ;;  %v7791_v29 = vrot.slane %v7789_v46, 1 }
 0xce9   : > { %v7783_v24 = vrot.slane %v7781_v38, 1 }
 0xcea   : > { %v7795_v9 = vor.u32 %v7793_v37, %v7791_v29 }
 0xceb   : > { %v7784_v54 = vsel %vm661_vm1, %v7779_v1, %v7783_v24  ;;  %v7787_v56 = vor.u32 %v7785_v30, %v7783_v24 }
 0xcec   : > { %8971 = vmatmul.mubr.msk.bf16.vlgmr.msra.gmra.mrb[248].mxu0 %vm3797_vm5, %v7784_v54 }
 0xced   : > { %8979 = vmatpush3.bf16.msra.mxu0 %v12387_v13  ;;  %v7792_v0 = vsel %vm661_vm1, %v7787_v56, %v7791_v29 }
 0xcee   : > { %8974 = vmatprep.mubr.msk.bf16.mxu0 %vm3797_vm5, %v7792_v0  ;;  %8980 = vmatprep.subr.bf16.mxu0 %v12397_v3 }
 0xcf1   : > { %8981 = vmatpush3.bf16.msra.mxu0 %v12397_v3 }
 0xcf2   : > { %8982 = vmatprep.subr.bf16.mxu0 %v12407_v20 }
 0xcf4   : > { %8975 = vmatmul.mubr.msk.bf16.gmra.mrb[252].mxu0 %vm3797_vm5, %v7795_v9 }
 0xcf5   : > { %8983 = vmatpush3.bf16.msra.mxu0 %v12407_v20  ;;  %8986 = vmatprep.mubr.msk.bf16.mxu0 %vm3797_vm5, %v7744_v14 }
 0xcf6   : > { %8984 = vmatprep.subr.bf16.mxu0 %v12417_v5 }
 0xcf9   : > { %8985 = vmatpush3.bf16.msra.mxu0 %v12417_v5 }
 0xcfc   : > { %8987 = vmatmul.mubr.msk.bf16.vlgmr.msra.gmra.mrb[248].mxu0 %vm3797_vm5, %v7745_v21 }
 0xdbb   : > { %v8992_v6 = vpop.f32.mrb[136].mxu1 }
 0xdbc   : > { %v7979_v34 = vpop.f32.mrb[137].mxu1 }
 0xdbd   : > { %v8993_v36 = vpop.f32.mrb[138].mxu1 }
 0xdbe   : > { %v7982_v41 = vpop.f32.mrb[139].mxu1 }
 0xdc7   : > { %v8976_v59 = vpop.f32.mrb[252].mxu0 }
 0xdc8   : > { %v7988_v8 = vadd.f32 %v8992_v6, %v8976_v59  ;;  %v7882_v43 = vpop.f32.mrb[253].mxu0 }
 0xdc9   : > { %v7980_v13 = vadd.f32 %v7979_v34, %v7882_v43  ;;  %v8977_v63 = vpop.f32.mrb[254].mxu0 }
 0xdca   : > { %v8007_v3 = vadd.f32 %v8761_v4, %v7988_v8  ;;  %v7991_v15 = vadd.f32 %v8993_v36, %v8977_v63  ;;  %v7885_v20 = vpop.f32.mrb[255].mxu0 }
 0xdcb   : > { %v8005_v53 = vadd.f32 %v8761_v4, %v7980_v13  ;;  %v7983_v5 = vadd.f32 %v7982_v41, %v7885_v20 }
 0xdcc   : > { %8016 = vst.msk [vmem:[#allocation4 + $0x30] sm:$0xff] %vm8009_vm10, %v8007_v3  ;;  %v8008_v17 = vadd.f32 %v8761_v4, %v7991_v15 }
 0xdcd   : > { %8014 = vst.msk [vmem:[#allocation4 + $0x20] sm:$0xff] %vm8009_vm10, %v8005_v53  ;;  %v8006_v22 = vadd.f32 %v8761_v4, %v7983_v5 }
 0xdce   : > { %8018 = vst.msk [vmem:[#allocation4 + $0x38] sm:$0x1f] %vm8017_vm11, %v8008_v17 }
 0xdcf   : > { %8015 = vst.msk [vmem:[#allocation4 + $0x28] sm:$0xff] %vm8009_vm10, %v8006_v22  ;;  %v8988_v62 = vpop.f32.mrb[248].mxu0 }
 0xdd0   : > { %v8003_v10 = vadd.f32 %v8988_v62, %v8761_v4  ;;  %v7963_v23 = vpop.f32.mrb[249].mxu0 }
 0xdd1   : > { %v8001_v18 = vadd.f32 %v8761_v4, %v7963_v23  ;;  %v8989_v33 = vpop.f32.mrb[250].mxu0 }
 0xdd2   : > { %8012 = vst.msk [vmem:[#allocation4 + $0x10] sm:$0xff] %vm8009_vm10, %v8003_v10  ;;  %v8004_v32 = vadd.f32 %v8989_v33, %v8761_v4  ;;  %v7966_v48 = vpop.f32.mrb[251].mxu0 }
 0xdd3   : > { %8010 = vst.msk [vmem:[#allocation4] sm:$0xff] %vm8009_vm10, %v8001_v18  ;;  %v8002_v28 = vadd.f32 %v8761_v4, %v7966_v48 }
 0xdd4   : > { %8013 = vst.msk [vmem:[#allocation4 + $0x18] sm:$0xff] %vm8009_vm10, %v8004_v32 }
 0xdd5   : > { %8011 = vst.msk [vmem:[#allocation4 + $0x8] sm:$0xff] %vm8009_vm10, %v8002_v28 }
 0xdd6   : > { %v8020_v31 = vld [vmem:[#allocation4] ss:$8 sm:$0xf0] }
 0xddc   : > { %v8019_v61 = vld [vmem:[#allocation4] ss:$8 sm:$0xf] }
 0xddd   : > { %v8021_v52 = vor.u32 %v8020_v31, %v8019_v61 }
 0xddf   : > { %v8022_v55 = vsel %vm8009_vm10, %v8021_v52, -inf }
 0xde0   : > { %8023 = vmax.xlane.f32.xlu0 %v8022_v55 }
 0xe6d   : > { %v8024_v21 = vpop.xlane.xlu0 %8023 }
 0xe6e   : > { %v8025_v14 = vsub.f32 %v8021_v52, %v8024_v21 }
 0xe70   : > { %v8026_v35 = vmul.f32 1.442695, %v8025_v14 }
 0xe72   : > { %9760 = vpow2.f32 %v8026_v35 }
 0xe7c   : > { %v9761_v40 = vpop.eup %9760 }
 0xe7d   : > { %v8028_v19 = vsel %vm8009_vm10, %v9761_v40, 0.0 }
 0xe7e   : > { %8029 = vadd.xlane.f32.xlu1 %v8028_v19 }
 0xf0b   : > { %v8030_v12 = vpop.xlane.xlu1 %8029 }
 0xf0c   : > { %9762 = vlog2.f32 %v8030_v12 }
 0xf16   : > { %v9763_v39 = vpop.eup %9762 }
 0xf17   : > { %v8032_v7 = vmul.f32 0.6931472, %v9763_v39 }
 0xf19   : > { %v8033_v25 = vsub.f32 %v8025_v14, %v8032_v7 }
 0xf1b   : > { %8034 = vst.msk [vmem:[%s596_s24] sm:$0xff] %vm8009_vm10, %v8033_v25 }
 0xf1c   : > { %9777 = shalt.err (!%p9774_p3)
}
 0xf1d   : > { %s9778_s0 = scalar_lea.hbm %s12463_s2, 128  ;;  %s9782_s28 = scalar_lea.hbm %s12525_s19, 256 }
 0xf1e   : > { %p9779_p4 = scmp.ne.s32.totalorder %s12463_s2, %s9778_s0  ;;  %p9783_p9 = scmp.lt.u32.totalorder %s12463_s2, %s12525_s19 }
 0xf1f   : > { %p9784_p10 = scmp.lt.u32.totalorder %s9782_s28, %s9778_s0  ;;  %p9786_p12 = scmp.lt.u32.totalorder %s9778_s0, %s12463_s2 }
 0xf20   : > { %p9780_p7 = pnand %p9779_p4, %p9971_p5 }
 0xf21   : > { %p9785_p11 = por %p9784_p10, %p9783_p9 }
 0xf22   : > { %p9781_p8 = pneg %p9780_p7 }
 0xf23   : > { %p9787_p13 = por %p9786_p12, %p9785_p11 }
 0xf25   : > { %p9788_p0 = pnand %p9787_p13, %p9781_p8 }
 0xf27   : > { %9791 = shalt.err (!%p9788_p0)
}
 0xf28   : > { %9346 = dma.vmem_to_hbm [thread:$0]  (%p9971_p5), %s12465_s27, 128, %s12463_s2, %s8036_s22  }
 0xf29 PF: > { %s12553_s5 = sld [smem:[#allocation8_spill]]  ;;  %p9352_p1 = scmp.ge.s32.totalorder %s9826_s21, 2 }
 0xf2b   : > { %p9349_p2 = pnand %p9352_p1, %p9975_p6 }
 0xf2f   : > { %s8061_s4 = sand.u32 1, %s12553_s5  }
 0xf30   : > { %s8062_s26 = scalar_lea.sflag [#allocation6], %s8061_s4 }
 0xf31   : > { %9809 = dma.done.wait (!%p9349_p2), %s8062_s26, 128  }
 0xf32   : > { %9811 = vsyncadd (!%p9349_p2), %s8062_s26, 4294967168  ;;  %s12555_s21 = sld [smem:[#allocation10_spill]]  ;;  %s12556_s24 = sld [smem:[#allocation9_spill]] }
 0xf33   : > { %s12557_s20 = sld [smem:[#allocation11_spill]]  ;;  %s12558_s0 = smov %s9818_s30 }
 0xf38   : > { %p29_p3 = scmp.ge.s32.totalorder %s12555_s21, 4   ;;  %s12559_s30 = smov %s12556_s24 }
 0xf3a   :  { %31 = sbr.rel (!%p29_p3) target bundleno = 10 (0xa), region = 188 }
 0xf41   :  { %8067 = vsyncpa [#allocation6], 1 }
 0xf42   :  { %8069 = vsyncpa [#allocation6 + $0x1], 1 }

</bundles_post_ra>
